<compile_context>
chip_gen: v6e
topology: v6e:2x2x1
jax: 0.10.0
libtpu: 0.0.40
codegen_flags: <defaults>
</compile_context>

<pallas_src>
import numpy as np
import jax
import jax.numpy as jnp
from jax import lax
from jax.experimental import pallas as pl
from jax.experimental.pallas import tpu as pltpu

F32 = jnp.float32


# ----------------------------- fused kernel --------------------------------
def _mnist_fused_kernel(x_ref, w1_ref, b1_ref, w2_ref, b2_ref,
                        wf1_ref, bf1_ref, wf2_ref, bf2_ref, o_ref):
    TB = x_ref.shape[0]
    x = x_ref[...]                                        # (TB, 28, 32) f32

    # ---- conv1 (1->10, k=5) as 5 row-shifted MXU matmuls ------------------
    # w1_ref[q] maps one shifted input row (28 cols padded to 32) to one full
    # conv-output row: 24 cols x 10 ch, packed by column parity:
    #   lane = 128*parity + pooled_col*10 + ch   (lanes 120..127/248..255 = 0)
    acc1 = jnp.zeros((TB * 24, 256), F32)
    for q in range(5):
        slab = x[:, q:q + 24, :].reshape(TB * 24, 32)     # layout-preserving
        acc1 = acc1 + jnp.dot(slab, w1_ref[q], preferred_element_type=F32)

    # 2x2 max-pool: column pairs are the two aligned 128-lane halves (packed
    # into the weights); row pairs are adjacent conv rows.  Then bias + ReLU.
    cp1 = jnp.maximum(acc1[:, :128], acc1[:, 128:]).reshape(TB, 24, 128)
    b1 = b1_ref[...]                                      # (1, 128)
    p1 = []                                               # 12 x (TB,128); lane = col*10 + ci
    for i in range(12):
        r = jnp.maximum(cp1[:, 2 * i, :], cp1[:, 2 * i + 1, :])
        p1.append(jnp.maximum(r + b1, 0.0))

    # ---- conv2 (10->20, k=5) per output row, same parity-packed trick -----
    # TODO(synk): nn.Dropout2d is identity in eval mode; training-mode channel
    # dropout is not implemented.
    y2 = [jnp.zeros((TB, 256), F32) for _ in range(8)]
    for q in range(5):
        wq = w2_ref[q]                                    # (128, 256), reused over 8 rows
        for r in range(8):
            y2[r] = y2[r] + jnp.dot(p1[r + q], wq, preferred_element_type=F32)
    b2 = b2_ref[...]                                      # (1, 128)
    c2 = [jnp.maximum(y[:, :128], y[:, 128:]) for y in y2]              # col pool
    a2 = [jnp.maximum(jnp.maximum(c2[2 * i], c2[2 * i + 1]) + b2, 0.0)  # row pool + ReLU
          for i in range(4)]                              # lane = pooled_col*20 + co

    # ---- fc1 -> ReLU -> fc2 -> log_softmax (all 128-lane padded) ----------
    h = jnp.zeros((TB, 128), F32)
    for i in range(4):
        h = h + jnp.dot(a2[i], wf1_ref[i], preferred_element_type=F32)
    h = jnp.maximum(h + bf1_ref[...], 0.0)                # lanes 60..127 stay 0
    logits = jnp.dot(h, wf2_ref[...], preferred_element_type=F32) + bf2_ref[...]
    m = jnp.max(logits, axis=-1, keepdims=True)           # pad lanes are ~ -1e30
    s = logits - m
    lse = jnp.log(jnp.sum(jnp.exp(s), axis=-1, keepdims=True))
    o_ref[...] = s - lse                                  # (TB, 128); lanes 0..9 valid


# ----------------------------- parameters ----------------------------------
def init_params(key):
    ks = jax.random.split(key, 8)
    return {
        "conv1_w": 0.1 * jax.random.normal(ks[0], (10, 1, 5, 5), F32),
        "conv1_b": 0.1 * jax.random.normal(ks[1], (10,), F32),
        "conv2_w": 0.1 * jax.random.normal(ks[2], (20, 10, 5, 5), F32),
        "conv2_b": 0.1 * jax.random.normal(ks[3], (20,), F32),
        "fc1_w": 0.1 * jax.random.normal(ks[4], (60, 320), F32),
        "fc1_b": 0.1 * jax.random.normal(ks[5], (60,), F32),
        "fc2_w": 0.1 * jax.random.normal(ks[6], (10, 60), F32),
        "fc2_b": 0.1 * jax.random.normal(ks[7], (10,), F32),
    }


def pack_params(p):
    """One-time weight repack into lane-dense, zero-padded MXU matrices."""
    w1 = np.asarray(p["conv1_w"], np.float32)   # (10,1,5,5)
    b1 = np.asarray(p["conv1_b"], np.float32)
    w2 = np.asarray(p["conv2_w"], np.float32)   # (20,10,5,5)
    b2 = np.asarray(p["conv2_b"], np.float32)
    fw1 = np.asarray(p["fc1_w"], np.float32)    # (60,320)
    fb1 = np.asarray(p["fc1_b"], np.float32)
    fw2 = np.asarray(p["fc2_w"], np.float32)    # (10,60)
    fb2 = np.asarray(p["fc2_b"], np.float32)

    # conv1: (5, 32, 256); out lane = 128*par + e*10 + ch, conv col = 2e+par
    W1 = np.zeros((5, 32, 256), np.float32)
    for q in range(5):
        for dj in range(5):
            for e in range(12):
                for par in range(2):
                    col_in = 2 * e + par + dj
                    base = 128 * par + e * 10
                    W1[q, col_in, base:base + 10] = w1[:, 0, q, dj]
    b1t = np.zeros((1, 128), np.float32)
    for e in range(12):
        b1t[0, e * 10:e * 10 + 10] = b1

    # conv2: (5, 128, 256); in lane = j*10+ci, out lane = 128*par + e*20 + co
    W2 = np.zeros((5, 128, 256), np.float32)
    for q in range(5):
        for dj in range(5):
            for e in range(4):
                for par in range(2):
                    j = 2 * e + par + dj
                    base = 128 * par + e * 20
                    for ci in range(10):
                        W2[q, j * 10 + ci, base:base + 20] = w2[:, ci, q, dj]
    b2t = np.zeros((1, 128), np.float32)
    for e in range(4):
        b2t[0, e * 20:e * 20 + 20] = b2

    # fc1: PyTorch NCHW flatten f = co*16 + ip*4 + jp folded into the packing.
    Wf1 = np.zeros((4, 128, 128), np.float32)
    for ip in range(4):
        for jp in range(4):
            for co in range(20):
                Wf1[ip, jp * 20 + co, :60] = fw1[:, co * 16 + ip * 4 + jp]
    bf1 = np.zeros((1, 128), np.float32)
    bf1[0, :60] = fb1

    # fc2: (128, 128); rows 60.., cols 10.. zero; pad bias -1e30 masks softmax.
    Wf2 = np.zeros((128, 128), np.float32)
    Wf2[:60, :10] = fw2.T
    bf2 = np.full((1, 128), -1e30, np.float32)
    bf2[0, :10] = fb2

    return {k: jnp.asarray(v) for k, v in
            dict(w1=W1, b1t=b1t, w2=W2, b2t=b2t,
                 wf1=Wf1, bf1=bf1, wf2=Wf2, bf2=bf2).items()}


# ----------------------------- forward --------------------------------------
def _choose_tile(N):
    if N <= 8:
        return N, N                      # single full-batch block (block == array dim)
    TB = min(128, max(8, (N // 2) // 8 * 8))   # >=2 grid steps (megacore), mult of 8
    Nb = ((N + TB - 1) // TB) * TB
    return TB, Nb


def forward(packed, x_nchw):
    N = x_nchw.shape[0]
    TB, Nb = _choose_tile(N)
    x = x_nchw.reshape(N, 28, 28)
    x = jnp.pad(x, ((0, Nb - N), (0, 0), (0, 4)))        # batch pad + 28->32 cols

    out = pl.pallas_call(
        _mnist_fused_kernel,
        out_shape=jax.ShapeDtypeStruct((Nb, 128), F32),
        grid=(Nb // TB,),
        in_specs=[
            pl.BlockSpec((TB, 28, 32), lambda i: (i, 0, 0)),
            pl.BlockSpec((5, 32, 256), lambda i: (0, 0, 0)),
            pl.BlockSpec((1, 128), lambda i: (0, 0)),
            pl.BlockSpec((5, 128, 256), lambda i: (0, 0, 0)),
            pl.BlockSpec((1, 128), lambda i: (0, 0)),
            pl.BlockSpec((4, 128, 128), lambda i: (0, 0, 0)),
            pl.BlockSpec((1, 128), lambda i: (0, 0)),
            pl.BlockSpec((128, 128), lambda i: (0, 0)),
            pl.BlockSpec((1, 128), lambda i: (0, 0)),
        ],
        out_specs=pl.BlockSpec((TB, 128), lambda i: (i, 0)),
        compiler_params=pltpu.CompilerParams(
            dimension_semantics=("parallel",),            # shard batch tiles across TCs
            vmem_limit_bytes=48 * 1024 * 1024,            # safe on v7x (64 MiB VMEM)
        ),
    )(x, packed["w1"], packed["b1t"], packed["w2"], packed["b2t"],
      packed["wf1"], packed["bf1"], packed["wf2"], packed["bf2"])
    return out[:N, :10]


# ------------------------- pure-JAX reference -------------------------------
def _pool2(y):                                            # (N,C,H,W) -> (N,C,H/2,W/2)
    n, c, h, w = y.shape
    return y.reshape(n, c, h // 2, 2, w // 2, 2).max(axis=(3, 5))


def _reference_forward(p, x):
    dn = ("NCHW", "OIHW", "NCHW")
    y = lax.conv_general_dilated(x, p["conv1_w"], (1, 1), "VALID", dimension_numbers=dn)
    y = jnp.maximum(_pool2(y + p["conv1_b"].reshape(1, 10, 1, 1)), 0.0)
    y = lax.conv_general_dilated(y, p["conv2_w"], (1, 1), "VALID", dimension_numbers=dn)
    y = jnp.maximum(_pool2(y + p["conv2_b"].reshape(1, 20, 1, 1)), 0.0)
    y = y.reshape(-1, 320)
    y = jnp.maximum(y @ p["fc1_w"].T + p["fc1_b"], 0.0)
    y = y @ p["fc2_w"].T + p["fc2_b"]
    return jax.nn.log_softmax(y, axis=-1)


if __name__ == "__main__":
    key = jax.random.PRNGKey(0)
    pkey, xkey = jax.random.split(key)
    params = init_params(pkey)
    packed = pack_params(params)
    x = jax.random.normal(xkey, (2, 1, 28, 28), F32)      # MNIST-shaped demo batch

    out = jax.jit(forward)(packed, x)
    out = jax.block_until_ready(out)

    assert out.shape == (2, 10)
    assert bool(jnp.all(jnp.isfinite(out)))
    assert bool(jnp.allclose(jnp.sum(jnp.exp(out), axis=-1), 1.0, atol=1e-3))
    ref = _reference_forward(params, x)
    assert bool(jnp.allclose(out, ref, atol=5e-2, rtol=5e-2))
    print("KERNEL_OK")
</pallas_src>

<mosaic_0001>
module attributes {stable_mosaic.version = 11 : i64} {
  func.func @_mnist_fused_kernel(%arg0: i32, %arg1: memref<2x28x32xf32, #tpu.memory_space<vmem>>, %arg2: memref<5x32x256xf32, #tpu.memory_space<vmem>>, %arg3: memref<1x128xf32, #tpu.memory_space<vmem>>, %arg4: memref<5x128x256xf32, #tpu.memory_space<vmem>>, %arg5: memref<1x128xf32, #tpu.memory_space<vmem>>, %arg6: memref<4x128x128xf32, #tpu.memory_space<vmem>>, %arg7: memref<1x128xf32, #tpu.memory_space<vmem>>, %arg8: memref<128x128xf32, #tpu.memory_space<vmem>>, %arg9: memref<1x128xf32, #tpu.memory_space<vmem>>, %arg10: memref<2x128xf32, #tpu.memory_space<vmem>>) attributes {dimension_semantics = [#tpu.dimension_semantics<parallel>], iteration_bounds = array<i64: 1>, scalar_prefetch = 0 : i64, scratch_operands = 0 : i64, tpu.core_type = #tpu.core_type<tc>, window_params = [{transform_indices = @transform_0, window_bounds = array<i64: 2, 28, 32>}, {pipeline_mode = #tpu.pipeline_mode<synchronous>, transform_indices = @transform_1, window_bounds = array<i64: 5, 32, 256>}, {pipeline_mode = #tpu.pipeline_mode<synchronous>, transform_indices = @transform_2, window_bounds = array<i64: 1, 128>}, {pipeline_mode = #tpu.pipeline_mode<synchronous>, transform_indices = @transform_3, window_bounds = array<i64: 5, 128, 256>}, {pipeline_mode = #tpu.pipeline_mode<synchronous>, transform_indices = @transform_4, window_bounds = array<i64: 1, 128>}, {pipeline_mode = #tpu.pipeline_mode<synchronous>, transform_indices = @transform_5, window_bounds = array<i64: 4, 128, 128>}, {pipeline_mode = #tpu.pipeline_mode<synchronous>, transform_indices = @transform_6, window_bounds = array<i64: 1, 128>}, {pipeline_mode = #tpu.pipeline_mode<synchronous>, transform_indices = @transform_7, window_bounds = array<i64: 128, 128>}, {pipeline_mode = #tpu.pipeline_mode<synchronous>, transform_indices = @transform_8, window_bounds = array<i64: 1, 128>}, {transform_indices = @transform_9, window_bounds = array<i64: 2, 128>}]} {
    %c0 = arith.constant 0 : index
    %c0_0 = arith.constant 0 : index
    %c0_1 = arith.constant 0 : index
    %0 = vector.load %arg1[%c0, %c0_0, %c0_1] : memref<2x28x32xf32, #tpu.memory_space<vmem>>, vector<2x28x32xf32>
    %cst = arith.constant 0.000000e+00 : f32
    %1 = vector.broadcast %cst : f32 to vector<48x256xf32>
    %2 = vector.extract_strided_slice %0 {offsets = [0, 0, 0], sizes = [2, 24, 32], strides = [1, 1, 1]} : vector<2x28x32xf32> to vector<2x24x32xf32>
    %3 = vector.shape_cast %2 : vector<2x24x32xf32> to vector<48x32xf32>
    %c0_2 = arith.constant 0 : index
    %c0_3 = arith.constant 0 : index
    %c0_4 = arith.constant 0 : index
    %4 = vector.load %arg2[%c0_2, %c0_3, %c0_4] : memref<5x32x256xf32, #tpu.memory_space<vmem>>, vector<1x32x256xf32>
    %5 = vector.shape_cast %4 : vector<1x32x256xf32> to vector<32x256xf32>
    %cst_5 = arith.constant dense<0.000000e+00> : vector<48x256xf32>
    %6 = tpu.matmul %3, %5, %cst_5 {dimension_numbers = #tpu.dot_dimension_numbers<[1], [0], [0], [1], [0, 0, 1, 1], [], []>} : vector<48x32xf32>, vector<32x256xf32>, vector<48x256xf32> -> vector<48x256xf32>
    %7 = arith.addf %1, %6 : vector<48x256xf32>
    %8 = vector.extract_strided_slice %0 {offsets = [0, 1, 0], sizes = [2, 24, 32], strides = [1, 1, 1]} : vector<2x28x32xf32> to vector<2x24x32xf32>
    %9 = vector.shape_cast %8 : vector<2x24x32xf32> to vector<48x32xf32>
    %c1 = arith.constant 1 : index
    %c0_6 = arith.constant 0 : index
    %c0_7 = arith.constant 0 : index
    %10 = vector.load %arg2[%c1, %c0_6, %c0_7] : memref<5x32x256xf32, #tpu.memory_space<vmem>>, vector<1x32x256xf32>
    %11 = vector.shape_cast %10 : vector<1x32x256xf32> to vector<32x256xf32>
    %cst_8 = arith.constant dense<0.000000e+00> : vector<48x256xf32>
    %12 = tpu.matmul %9, %11, %cst_8 {dimension_numbers = #tpu.dot_dimension_numbers<[1], [0], [0], [1], [0, 0, 1, 1], [], []>} : vector<48x32xf32>, vector<32x256xf32>, vector<48x256xf32> -> vector<48x256xf32>
    %13 = arith.addf %7, %12 : vector<48x256xf32>
    %14 = vector.extract_strided_slice %0 {offsets = [0, 2, 0], sizes = [2, 24, 32], strides = [1, 1, 1]} : vector<2x28x32xf32> to vector<2x24x32xf32>
    %15 = vector.shape_cast %14 : vector<2x24x32xf32> to vector<48x32xf32>
    %c2 = arith.constant 2 : index
    %c0_9 = arith.constant 0 : index
    %c0_10 = arith.constant 0 : index
    %16 = vector.load %arg2[%c2, %c0_9, %c0_10] : memref<5x32x256xf32, #tpu.memory_space<vmem>>, vector<1x32x256xf32>
    %17 = vector.shape_cast %16 : vector<1x32x256xf32> to vector<32x256xf32>
    %cst_11 = arith.constant dense<0.000000e+00> : vector<48x256xf32>
    %18 = tpu.matmul %15, %17, %cst_11 {dimension_numbers = #tpu.dot_dimension_numbers<[1], [0], [0], [1], [0, 0, 1, 1], [], []>} : vector<48x32xf32>, vector<32x256xf32>, vector<48x256xf32> -> vector<48x256xf32>
    %19 = arith.addf %13, %18 : vector<48x256xf32>
    %20 = vector.extract_strided_slice %0 {offsets = [0, 3, 0], sizes = [2, 24, 32], strides = [1, 1, 1]} : vector<2x28x32xf32> to vector<2x24x32xf32>
    %21 = vector.shape_cast %20 : vector<2x24x32xf32> to vector<48x32xf32>
    %c3 = arith.constant 3 : index
    %c0_12 = arith.constant 0 : index
    %c0_13 = arith.constant 0 : index
    %22 = vector.load %arg2[%c3, %c0_12, %c0_13] : memref<5x32x256xf32, #tpu.memory_space<vmem>>, vector<1x32x256xf32>
    %23 = vector.shape_cast %22 : vector<1x32x256xf32> to vector<32x256xf32>
    %cst_14 = arith.constant dense<0.000000e+00> : vector<48x256xf32>
    %24 = tpu.matmul %21, %23, %cst_14 {dimension_numbers = #tpu.dot_dimension_numbers<[1], [0], [0], [1], [0, 0, 1, 1], [], []>} : vector<48x32xf32>, vector<32x256xf32>, vector<48x256xf32> -> vector<48x256xf32>
    %25 = arith.addf %19, %24 : vector<48x256xf32>
    %26 = vector.extract_strided_slice %0 {offsets = [0, 4, 0], sizes = [2, 24, 32], strides = [1, 1, 1]} : vector<2x28x32xf32> to vector<2x24x32xf32>
    %27 = vector.shape_cast %26 : vector<2x24x32xf32> to vector<48x32xf32>
    %c4 = arith.constant 4 : index
    %c0_15 = arith.constant 0 : index
    %c0_16 = arith.constant 0 : index
    %28 = vector.load %arg2[%c4, %c0_15, %c0_16] : memref<5x32x256xf32, #tpu.memory_space<vmem>>, vector<1x32x256xf32>
    %29 = vector.shape_cast %28 : vector<1x32x256xf32> to vector<32x256xf32>
    %cst_17 = arith.constant dense<0.000000e+00> : vector<48x256xf32>
    %30 = tpu.matmul %27, %29, %cst_17 {dimension_numbers = #tpu.dot_dimension_numbers<[1], [0], [0], [1], [0, 0, 1, 1], [], []>} : vector<48x32xf32>, vector<32x256xf32>, vector<48x256xf32> -> vector<48x256xf32>
    %31 = arith.addf %25, %30 : vector<48x256xf32>
    %32 = vector.extract_strided_slice %31 {offsets = [0, 0], sizes = [48, 128], strides = [1, 1]} : vector<48x256xf32> to vector<48x128xf32>
    %33 = vector.extract_strided_slice %31 {offsets = [0, 128], sizes = [48, 128], strides = [1, 1]} : vector<48x256xf32> to vector<48x128xf32>
    %34 = arith.maximumf %32, %33 : vector<48x128xf32>
    %35 = vector.shape_cast %34 : vector<48x128xf32> to vector<2x24x128xf32>
    %c0_18 = arith.constant 0 : index
    %c0_19 = arith.constant 0 : index
    %36 = vector.load %arg3[%c0_18, %c0_19] : memref<1x128xf32, #tpu.memory_space<vmem>>, vector<1x128xf32>
    %37 = vector.extract_strided_slice %35 {offsets = [0, 0, 0], sizes = [2, 1, 128], strides = [1, 1, 1]} : vector<2x24x128xf32> to vector<2x1x128xf32>
    %38 = vector.shape_cast %37 : vector<2x1x128xf32> to vector<2x128xf32>
    %39 = vector.extract_strided_slice %35 {offsets = [0, 1, 0], sizes = [2, 1, 128], strides = [1, 1, 1]} : vector<2x24x128xf32> to vector<2x1x128xf32>
    %40 = vector.shape_cast %39 : vector<2x1x128xf32> to vector<2x128xf32>
    %41 = arith.maximumf %38, %40 : vector<2x128xf32>
    %42 = vector.broadcast %36 : vector<1x128xf32> to vector<2x128xf32>
    %43 = arith.addf %41, %42 : vector<2x128xf32>
    %cst_20 = arith.constant 0.000000e+00 : f32
    %44 = vector.broadcast %cst_20 : f32 to vector<2x128xf32>
    %45 = arith.maximumf %43, %44 : vector<2x128xf32>
    %46 = vector.extract_strided_slice %35 {offsets = [0, 2, 0], sizes = [2, 1, 128], strides = [1, 1, 1]} : vector<2x24x128xf32> to vector<2x1x128xf32>
    %47 = vector.shape_cast %46 : vector<2x1x128xf32> to vector<2x128xf32>
    %48 = vector.extract_strided_slice %35 {offsets = [0, 3, 0], sizes = [2, 1, 128], strides = [1, 1, 1]} : vector<2x24x128xf32> to vector<2x1x128xf32>
    %49 = vector.shape_cast %48 : vector<2x1x128xf32> to vector<2x128xf32>
    %50 = arith.maximumf %47, %49 : vector<2x128xf32>
    %51 = vector.broadcast %36 : vector<1x128xf32> to vector<2x128xf32>
    %52 = arith.addf %50, %51 : vector<2x128xf32>
    %cst_21 = arith.constant 0.000000e+00 : f32
    %53 = vector.broadcast %cst_21 : f32 to vector<2x128xf32>
    %54 = arith.maximumf %52, %53 : vector<2x128xf32>
    %55 = vector.extract_strided_slice %35 {offsets = [0, 4, 0], sizes = [2, 1, 128], strides = [1, 1, 1]} : vector<2x24x128xf32> to vector<2x1x128xf32>
    %56 = vector.shape_cast %55 : vector<2x1x128xf32> to vector<2x128xf32>
    %57 = vector.extract_strided_slice %35 {offsets = [0, 5, 0], sizes = [2, 1, 128], strides = [1, 1, 1]} : vector<2x24x128xf32> to vector<2x1x128xf32>
    %58 = vector.shape_cast %57 : vector<2x1x128xf32> to vector<2x128xf32>
    %59 = arith.maximumf %56, %58 : vector<2x128xf32>
    %60 = vector.broadcast %36 : vector<1x128xf32> to vector<2x128xf32>
    %61 = arith.addf %59, %60 : vector<2x128xf32>
    %cst_22 = arith.constant 0.000000e+00 : f32
    %62 = vector.broadcast %cst_22 : f32 to vector<2x128xf32>
    %63 = arith.maximumf %61, %62 : vector<2x128xf32>
    %64 = vector.extract_strided_slice %35 {offsets = [0, 6, 0], sizes = [2, 1, 128], strides = [1, 1, 1]} : vector<2x24x128xf32> to vector<2x1x128xf32>
    %65 = vector.shape_cast %64 : vector<2x1x128xf32> to vector<2x128xf32>
    %66 = vector.extract_strided_slice %35 {offsets = [0, 7, 0], sizes = [2, 1, 128], strides = [1, 1, 1]} : vector<2x24x128xf32> to vector<2x1x128xf32>
    %67 = vector.shape_cast %66 : vector<2x1x128xf32> to vector<2x128xf32>
    %68 = arith.maximumf %65, %67 : vector<2x128xf32>
    %69 = vector.broadcast %36 : vector<1x128xf32> to vector<2x128xf32>
    %70 = arith.addf %68, %69 : vector<2x128xf32>
    %cst_23 = arith.constant 0.000000e+00 : f32
    %71 = vector.broadcast %cst_23 : f32 to vector<2x128xf32>
    %72 = arith.maximumf %70, %71 : vector<2x128xf32>
    %73 = vector.extract_strided_slice %35 {offsets = [0, 8, 0], sizes = [2, 1, 128], strides = [1, 1, 1]} : vector<2x24x128xf32> to vector<2x1x128xf32>
    %74 = vector.shape_cast %73 : vector<2x1x128xf32> to vector<2x128xf32>
    %75 = vector.extract_strided_slice %35 {offsets = [0, 9, 0], sizes = [2, 1, 128], strides = [1, 1, 1]} : vector<2x24x128xf32> to vector<2x1x128xf32>
    %76 = vector.shape_cast %75 : vector<2x1x128xf32> to vector<2x128xf32>
    %77 = arith.maximumf %74, %76 : vector<2x128xf32>
    %78 = vector.broadcast %36 : vector<1x128xf32> to vector<2x128xf32>
    %79 = arith.addf %77, %78 : vector<2x128xf32>
    %cst_24 = arith.constant 0.000000e+00 : f32
    %80 = vector.broadcast %cst_24 : f32 to vector<2x128xf32>
    %81 = arith.maximumf %79, %80 : vector<2x128xf32>
    %82 = vector.extract_strided_slice %35 {offsets = [0, 10, 0], sizes = [2, 1, 128], strides = [1, 1, 1]} : vector<2x24x128xf32> to vector<2x1x128xf32>
    %83 = vector.shape_cast %82 : vector<2x1x128xf32> to vector<2x128xf32>
    %84 = vector.extract_strided_slice %35 {offsets = [0, 11, 0], sizes = [2, 1, 128], strides = [1, 1, 1]} : vector<2x24x128xf32> to vector<2x1x128xf32>
    %85 = vector.shape_cast %84 : vector<2x1x128xf32> to vector<2x128xf32>
    %86 = arith.maximumf %83, %85 : vector<2x128xf32>
    %87 = vector.broadcast %36 : vector<1x128xf32> to vector<2x128xf32>
    %88 = arith.addf %86, %87 : vector<2x128xf32>
    %cst_25 = arith.constant 0.000000e+00 : f32
    %89 = vector.broadcast %cst_25 : f32 to vector<2x128xf32>
    %90 = arith.maximumf %88, %89 : vector<2x128xf32>
    %91 = vector.extract_strided_slice %35 {offsets = [0, 12, 0], sizes = [2, 1, 128], strides = [1, 1, 1]} : vector<2x24x128xf32> to vector<2x1x128xf32>
    %92 = vector.shape_cast %91 : vector<2x1x128xf32> to vector<2x128xf32>
    %93 = vector.extract_strided_slice %35 {offsets = [0, 13, 0], sizes = [2, 1, 128], strides = [1, 1, 1]} : vector<2x24x128xf32> to vector<2x1x128xf32>
    %94 = vector.shape_cast %93 : vector<2x1x128xf32> to vector<2x128xf32>
    %95 = arith.maximumf %92, %94 : vector<2x128xf32>
    %96 = vector.broadcast %36 : vector<1x128xf32> to vector<2x128xf32>
    %97 = arith.addf %95, %96 : vector<2x128xf32>
    %cst_26 = arith.constant 0.000000e+00 : f32
    %98 = vector.broadcast %cst_26 : f32 to vector<2x128xf32>
    %99 = arith.maximumf %97, %98 : vector<2x128xf32>
    %100 = vector.extract_strided_slice %35 {offsets = [0, 14, 0], sizes = [2, 1, 128], strides = [1, 1, 1]} : vector<2x24x128xf32> to vector<2x1x128xf32>
    %101 = vector.shape_cast %100 : vector<2x1x128xf32> to vector<2x128xf32>
    %102 = vector.extract_strided_slice %35 {offsets = [0, 15, 0], sizes = [2, 1, 128], strides = [1, 1, 1]} : vector<2x24x128xf32> to vector<2x1x128xf32>
    %103 = vector.shape_cast %102 : vector<2x1x128xf32> to vector<2x128xf32>
    %104 = arith.maximumf %101, %103 : vector<2x128xf32>
    %105 = vector.broadcast %36 : vector<1x128xf32> to vector<2x128xf32>
    %106 = arith.addf %104, %105 : vector<2x128xf32>
    %cst_27 = arith.constant 0.000000e+00 : f32
    %107 = vector.broadcast %cst_27 : f32 to vector<2x128xf32>
    %108 = arith.maximumf %106, %107 : vector<2x128xf32>
    %109 = vector.extract_strided_slice %35 {offsets = [0, 16, 0], sizes = [2, 1, 128], strides = [1, 1, 1]} : vector<2x24x128xf32> to vector<2x1x128xf32>
    %110 = vector.shape_cast %109 : vector<2x1x128xf32> to vector<2x128xf32>
    %111 = vector.extract_strided_slice %35 {offsets = [0, 17, 0], sizes = [2, 1, 128], strides = [1, 1, 1]} : vector<2x24x128xf32> to vector<2x1x128xf32>
    %112 = vector.shape_cast %111 : vector<2x1x128xf32> to vector<2x128xf32>
    %113 = arith.maximumf %110, %112 : vector<2x128xf32>
    %114 = vector.broadcast %36 : vector<1x128xf32> to vector<2x128xf32>
    %115 = arith.addf %113, %114 : vector<2x128xf32>
    %cst_28 = arith.constant 0.000000e+00 : f32
    %116 = vector.broadcast %cst_28 : f32 to vector<2x128xf32>
    %117 = arith.maximumf %115, %116 : vector<2x128xf32>
    %118 = vector.extract_strided_slice %35 {offsets = [0, 18, 0], sizes = [2, 1, 128], strides = [1, 1, 1]} : vector<2x24x128xf32> to vector<2x1x128xf32>
    %119 = vector.shape_cast %118 : vector<2x1x128xf32> to vector<2x128xf32>
    %120 = vector.extract_strided_slice %35 {offsets = [0, 19, 0], sizes = [2, 1, 128], strides = [1, 1, 1]} : vector<2x24x128xf32> to vector<2x1x128xf32>
    %121 = vector.shape_cast %120 : vector<2x1x128xf32> to vector<2x128xf32>
    %122 = arith.maximumf %119, %121 : vector<2x128xf32>
    %123 = vector.broadcast %36 : vector<1x128xf32> to vector<2x128xf32>
    %124 = arith.addf %122, %123 : vector<2x128xf32>
    %cst_29 = arith.constant 0.000000e+00 : f32
    %125 = vector.broadcast %cst_29 : f32 to vector<2x128xf32>
    %126 = arith.maximumf %124, %125 : vector<2x128xf32>
    %127 = vector.extract_strided_slice %35 {offsets = [0, 20, 0], sizes = [2, 1, 128], strides = [1, 1, 1]} : vector<2x24x128xf32> to vector<2x1x128xf32>
    %128 = vector.shape_cast %127 : vector<2x1x128xf32> to vector<2x128xf32>
    %129 = vector.extract_strided_slice %35 {offsets = [0, 21, 0], sizes = [2, 1, 128], strides = [1, 1, 1]} : vector<2x24x128xf32> to vector<2x1x128xf32>
    %130 = vector.shape_cast %129 : vector<2x1x128xf32> to vector<2x128xf32>
    %131 = arith.maximumf %128, %130 : vector<2x128xf32>
    %132 = vector.broadcast %36 : vector<1x128xf32> to vector<2x128xf32>
    %133 = arith.addf %131, %132 : vector<2x128xf32>
    %cst_30 = arith.constant 0.000000e+00 : f32
    %134 = vector.broadcast %cst_30 : f32 to vector<2x128xf32>
    %135 = arith.maximumf %133, %134 : vector<2x128xf32>
    %136 = vector.extract_strided_slice %35 {offsets = [0, 22, 0], sizes = [2, 1, 128], strides = [1, 1, 1]} : vector<2x24x128xf32> to vector<2x1x128xf32>
    %137 = vector.shape_cast %136 : vector<2x1x128xf32> to vector<2x128xf32>
    %138 = vector.extract_strided_slice %35 {offsets = [0, 23, 0], sizes = [2, 1, 128], strides = [1, 1, 1]} : vector<2x24x128xf32> to vector<2x1x128xf32>
    %139 = vector.shape_cast %138 : vector<2x1x128xf32> to vector<2x128xf32>
    %140 = arith.maximumf %137, %139 : vector<2x128xf32>
    %141 = vector.broadcast %36 : vector<1x128xf32> to vector<2x128xf32>
    %142 = arith.addf %140, %141 : vector<2x128xf32>
    %cst_31 = arith.constant 0.000000e+00 : f32
    %143 = vector.broadcast %cst_31 : f32 to vector<2x128xf32>
    %144 = arith.maximumf %142, %143 : vector<2x128xf32>
    %cst_32 = arith.constant 0.000000e+00 : f32
    %145 = vector.broadcast %cst_32 : f32 to vector<2x256xf32>
    %cst_33 = arith.constant 0.000000e+00 : f32
    %146 = vector.broadcast %cst_33 : f32 to vector<2x256xf32>
    %cst_34 = arith.constant 0.000000e+00 : f32
    %147 = vector.broadcast %cst_34 : f32 to vector<2x256xf32>
    %cst_35 = arith.constant 0.000000e+00 : f32
    %148 = vector.broadcast %cst_35 : f32 to vector<2x256xf32>
    %cst_36 = arith.constant 0.000000e+00 : f32
    %149 = vector.broadcast %cst_36 : f32 to vector<2x256xf32>
    %cst_37 = arith.constant 0.000000e+00 : f32
    %150 = vector.broadcast %cst_37 : f32 to vector<2x256xf32>
    %cst_38 = arith.constant 0.000000e+00 : f32
    %151 = vector.broadcast %cst_38 : f32 to vector<2x256xf32>
    %cst_39 = arith.constant 0.000000e+00 : f32
    %152 = vector.broadcast %cst_39 : f32 to vector<2x256xf32>
    %c0_40 = arith.constant 0 : index
    %c0_41 = arith.constant 0 : index
    %c0_42 = arith.constant 0 : index
    %153 = vector.load %arg4[%c0_40, %c0_41, %c0_42] : memref<5x128x256xf32, #tpu.memory_space<vmem>>, vector<1x128x256xf32>
    %154 = vector.shape_cast %153 : vector<1x128x256xf32> to vector<128x256xf32>
    %cst_43 = arith.constant dense<0.000000e+00> : vector<2x256xf32>
    %155 = tpu.matmul %45, %154, %cst_43 {dimension_numbers = #tpu.dot_dimension_numbers<[1], [0], [0], [1], [0, 0, 1, 1], [], []>} : vector<2x128xf32>, vector<128x256xf32>, vector<2x256xf32> -> vector<2x256xf32>
    %156 = arith.addf %145, %155 : vector<2x256xf32>
    %cst_44 = arith.constant dense<0.000000e+00> : vector<2x256xf32>
    %157 = tpu.matmul %54, %154, %cst_44 {dimension_numbers = #tpu.dot_dimension_numbers<[1], [0], [0], [1], [0, 0, 1, 1], [], []>} : vector<2x128xf32>, vector<128x256xf32>, vector<2x256xf32> -> vector<2x256xf32>
    %158 = arith.addf %146, %157 : vector<2x256xf32>
    %cst_45 = arith.constant dense<0.000000e+00> : vector<2x256xf32>
    %159 = tpu.matmul %63, %154, %cst_45 {dimension_numbers = #tpu.dot_dimension_numbers<[1], [0], [0], [1], [0, 0, 1, 1], [], []>} : vector<2x128xf32>, vector<128x256xf32>, vector<2x256xf32> -> vector<2x256xf32>
    %160 = arith.addf %147, %159 : vector<2x256xf32>
    %cst_46 = arith.constant dense<0.000000e+00> : vector<2x256xf32>
    %161 = tpu.matmul %72, %154, %cst_46 {dimension_numbers = #tpu.dot_dimension_numbers<[1], [0], [0], [1], [0, 0, 1, 1], [], []>} : vector<2x128xf32>, vector<128x256xf32>, vector<2x256xf32> -> vector<2x256xf32>
    %162 = arith.addf %148, %161 : vector<2x256xf32>
    %cst_47 = arith.constant dense<0.000000e+00> : vector<2x256xf32>
    %163 = tpu.matmul %81, %154, %cst_47 {dimension_numbers = #tpu.dot_dimension_numbers<[1], [0], [0], [1], [0, 0, 1, 1], [], []>} : vector<2x128xf32>, vector<128x256xf32>, vector<2x256xf32> -> vector<2x256xf32>
    %164 = arith.addf %149, %163 : vector<2x256xf32>
    %cst_48 = arith.constant dense<0.000000e+00> : vector<2x256xf32>
    %165 = tpu.matmul %90, %154, %cst_48 {dimension_numbers = #tpu.dot_dimension_numbers<[1], [0], [0], [1], [0, 0, 1, 1], [], []>} : vector<2x128xf32>, vector<128x256xf32>, vector<2x256xf32> -> vector<2x256xf32>
    %166 = arith.addf %150, %165 : vector<2x256xf32>
    %cst_49 = arith.constant dense<0.000000e+00> : vector<2x256xf32>
    %167 = tpu.matmul %99, %154, %cst_49 {dimension_numbers = #tpu.dot_dimension_numbers<[1], [0], [0], [1], [0, 0, 1, 1], [], []>} : vector<2x128xf32>, vector<128x256xf32>, vector<2x256xf32> -> vector<2x256xf32>
    %168 = arith.addf %151, %167 : vector<2x256xf32>
    %cst_50 = arith.constant dense<0.000000e+00> : vector<2x256xf32>
    %169 = tpu.matmul %108, %154, %cst_50 {dimension_numbers = #tpu.dot_dimension_numbers<[1], [0], [0], [1], [0, 0, 1, 1], [], []>} : vector<2x128xf32>, vector<128x256xf32>, vector<2x256xf32> -> vector<2x256xf32>
    %170 = arith.addf %152, %169 : vector<2x256xf32>
    %c1_51 = arith.constant 1 : index
    %c0_52 = arith.constant 0 : index
    %c0_53 = arith.constant 0 : index
    %171 = vector.load %arg4[%c1_51, %c0_52, %c0_53] : memref<5x128x256xf32, #tpu.memory_space<vmem>>, vector<1x128x256xf32>
    %172 = vector.shape_cast %171 : vector<1x128x256xf32> to vector<128x256xf32>
    %cst_54 = arith.constant dense<0.000000e+00> : vector<2x256xf32>
    %173 = tpu.matmul %54, %172, %cst_54 {dimension_numbers = #tpu.dot_dimension_numbers<[1], [0], [0], [1], [0, 0, 1, 1], [], []>} : vector<2x128xf32>, vector<128x256xf32>, vector<2x256xf32> -> vector<2x256xf32>
    %174 = arith.addf %156, %173 : vector<2x256xf32>
    %cst_55 = arith.constant dense<0.000000e+00> : vector<2x256xf32>
    %175 = tpu.matmul %63, %172, %cst_55 {dimension_numbers = #tpu.dot_dimension_numbers<[1], [0], [0], [1], [0, 0, 1, 1], [], []>} : vector<2x128xf32>, vector<128x256xf32>, vector<2x256xf32> -> vector<2x256xf32>
    %176 = arith.addf %158, %175 : vector<2x256xf32>
    %cst_56 = arith.constant dense<0.000000e+00> : vector<2x256xf32>
    %177 = tpu.matmul %72, %172, %cst_56 {dimension_numbers = #tpu.dot_dimension_numbers<[1], [0], [0], [1], [0, 0, 1, 1], [], []>} : vector<2x128xf32>, vector<128x256xf32>, vector<2x256xf32> -> vector<2x256xf32>
    %178 = arith.addf %160, %177 : vector<2x256xf32>
    %cst_57 = arith.constant dense<0.000000e+00> : vector<2x256xf32>
    %179 = tpu.matmul %81, %172, %cst_57 {dimension_numbers = #tpu.dot_dimension_numbers<[1], [0], [0], [1], [0, 0, 1, 1], [], []>} : vector<2x128xf32>, vector<128x256xf32>, vector<2x256xf32> -> vector<2x256xf32>
    %180 = arith.addf %162, %179 : vector<2x256xf32>
    %cst_58 = arith.constant dense<0.000000e+00> : vector<2x256xf32>
    %181 = tpu.matmul %90, %172, %cst_58 {dimension_numbers = #tpu.dot_dimension_numbers<[1], [0], [0], [1], [0, 0, 1, 1], [], []>} : vector<2x128xf32>, vector<128x256xf32>, vector<2x256xf32> -> vector<2x256xf32>
    %182 = arith.addf %164, %181 : vector<2x256xf32>
    %cst_59 = arith.constant dense<0.000000e+00> : vector<2x256xf32>
    %183 = tpu.matmul %99, %172, %cst_59 {dimension_numbers = #tpu.dot_dimension_numbers<[1], [0], [0], [1], [0, 0, 1, 1], [], []>} : vector<2x128xf32>, vector<128x256xf32>, vector<2x256xf32> -> vector<2x256xf32>
    %184 = arith.addf %166, %183 : vector<2x256xf32>
    %cst_60 = arith.constant dense<0.000000e+00> : vector<2x256xf32>
    %185 = tpu.matmul %108, %172, %cst_60 {dimension_numbers = #tpu.dot_dimension_numbers<[1], [0], [0], [1], [0, 0, 1, 1], [], []>} : vector<2x128xf32>, vector<128x256xf32>, vector<2x256xf32> -> vector<2x256xf32>
    %186 = arith.addf %168, %185 : vector<2x256xf32>
    %cst_61 = arith.constant dense<0.000000e+00> : vector<2x256xf32>
    %187 = tpu.matmul %117, %172, %cst_61 {dimension_numbers = #tpu.dot_dimension_numbers<[1], [0], [0], [1], [0, 0, 1, 1], [], []>} : vector<2x128xf32>, vector<128x256xf32>, vector<2x256xf32> -> vector<2x256xf32>
    %188 = arith.addf %170, %187 : vector<2x256xf32>
    %c2_62 = arith.constant 2 : index
    %c0_63 = arith.constant 0 : index
    %c0_64 = arith.constant 0 : index
    %189 = vector.load %arg4[%c2_62, %c0_63, %c0_64] : memref<5x128x256xf32, #tpu.memory_space<vmem>>, vector<1x128x256xf32>
    %190 = vector.shape_cast %189 : vector<1x128x256xf32> to vector<128x256xf32>
    %cst_65 = arith.constant dense<0.000000e+00> : vector<2x256xf32>
    %191 = tpu.matmul %63, %190, %cst_65 {dimension_numbers = #tpu.dot_dimension_numbers<[1], [0], [0], [1], [0, 0, 1, 1], [], []>} : vector<2x128xf32>, vector<128x256xf32>, vector<2x256xf32> -> vector<2x256xf32>
    %192 = arith.addf %174, %191 : vector<2x256xf32>
    %cst_66 = arith.constant dense<0.000000e+00> : vector<2x256xf32>
    %193 = tpu.matmul %72, %190, %cst_66 {dimension_numbers = #tpu.dot_dimension_numbers<[1], [0], [0], [1], [0, 0, 1, 1], [], []>} : vector<2x128xf32>, vector<128x256xf32>, vector<2x256xf32> -> vector<2x256xf32>
    %194 = arith.addf %176, %193 : vector<2x256xf32>
    %cst_67 = arith.constant dense<0.000000e+00> : vector<2x256xf32>
    %195 = tpu.matmul %81, %190, %cst_67 {dimension_numbers = #tpu.dot_dimension_numbers<[1], [0], [0], [1], [0, 0, 1, 1], [], []>} : vector<2x128xf32>, vector<128x256xf32>, vector<2x256xf32> -> vector<2x256xf32>
    %196 = arith.addf %178, %195 : vector<2x256xf32>
    %cst_68 = arith.constant dense<0.000000e+00> : vector<2x256xf32>
    %197 = tpu.matmul %90, %190, %cst_68 {dimension_numbers = #tpu.dot_dimension_numbers<[1], [0], [0], [1], [0, 0, 1, 1], [], []>} : vector<2x128xf32>, vector<128x256xf32>, vector<2x256xf32> -> vector<2x256xf32>
    %198 = arith.addf %180, %197 : vector<2x256xf32>
    %cst_69 = arith.constant dense<0.000000e+00> : vector<2x256xf32>
    %199 = tpu.matmul %99, %190, %cst_69 {dimension_numbers = #tpu.dot_dimension_numbers<[1], [0], [0], [1], [0, 0, 1, 1], [], []>} : vector<2x128xf32>, vector<128x256xf32>, vector<2x256xf32> -> vector<2x256xf32>
    %200 = arith.addf %182, %199 : vector<2x256xf32>
    %cst_70 = arith.constant dense<0.000000e+00> : vector<2x256xf32>
    %201 = tpu.matmul %108, %190, %cst_70 {dimension_numbers = #tpu.dot_dimension_numbers<[1], [0], [0], [1], [0, 0, 1, 1], [], []>} : vector<2x128xf32>, vector<128x256xf32>, vector<2x256xf32> -> vector<2x256xf32>
    %202 = arith.addf %184, %201 : vector<2x256xf32>
    %cst_71 = arith.constant dense<0.000000e+00> : vector<2x256xf32>
    %203 = tpu.matmul %117, %190, %cst_71 {dimension_numbers = #tpu.dot_dimension_numbers<[1], [0], [0], [1], [0, 0, 1, 1], [], []>} : vector<2x128xf32>, vector<128x256xf32>, vector<2x256xf32> -> vector<2x256xf32>
    %204 = arith.addf %186, %203 : vector<2x256xf32>
    %cst_72 = arith.constant dense<0.000000e+00> : vector<2x256xf32>
    %205 = tpu.matmul %126, %190, %cst_72 {dimension_numbers = #tpu.dot_dimension_numbers<[1], [0], [0], [1], [0, 0, 1, 1], [], []>} : vector<2x128xf32>, vector<128x256xf32>, vector<2x256xf32> -> vector<2x256xf32>
    %206 = arith.addf %188, %205 : vector<2x256xf32>
    %c3_73 = arith.constant 3 : index
    %c0_74 = arith.constant 0 : index
    %c0_75 = arith.constant 0 : index
    %207 = vector.load %arg4[%c3_73, %c0_74, %c0_75] : memref<5x128x256xf32, #tpu.memory_space<vmem>>, vector<1x128x256xf32>
    %208 = vector.shape_cast %207 : vector<1x128x256xf32> to vector<128x256xf32>
    %cst_76 = arith.constant dense<0.000000e+00> : vector<2x256xf32>
    %209 = tpu.matmul %72, %208, %cst_76 {dimension_numbers = #tpu.dot_dimension_numbers<[1], [0], [0], [1], [0, 0, 1, 1], [], []>} : vector<2x128xf32>, vector<128x256xf32>, vector<2x256xf32> -> vector<2x256xf32>
    %210 = arith.addf %192, %209 : vector<2x256xf32>
    %cst_77 = arith.constant dense<0.000000e+00> : vector<2x256xf32>
    %211 = tpu.matmul %81, %208, %cst_77 {dimension_numbers = #tpu.dot_dimension_numbers<[1], [0], [0], [1], [0, 0, 1, 1], [], []>} : vector<2x128xf32>, vector<128x256xf32>, vector<2x256xf32> -> vector<2x256xf32>
    %212 = arith.addf %194, %211 : vector<2x256xf32>
    %cst_78 = arith.constant dense<0.000000e+00> : vector<2x256xf32>
    %213 = tpu.matmul %90, %208, %cst_78 {dimension_numbers = #tpu.dot_dimension_numbers<[1], [0], [0], [1], [0, 0, 1, 1], [], []>} : vector<2x128xf32>, vector<128x256xf32>, vector<2x256xf32> -> vector<2x256xf32>
    %214 = arith.addf %196, %213 : vector<2x256xf32>
    %cst_79 = arith.constant dense<0.000000e+00> : vector<2x256xf32>
    %215 = tpu.matmul %99, %208, %cst_79 {dimension_numbers = #tpu.dot_dimension_numbers<[1], [0], [0], [1], [0, 0, 1, 1], [], []>} : vector<2x128xf32>, vector<128x256xf32>, vector<2x256xf32> -> vector<2x256xf32>
    %216 = arith.addf %198, %215 : vector<2x256xf32>
    %cst_80 = arith.constant dense<0.000000e+00> : vector<2x256xf32>
    %217 = tpu.matmul %108, %208, %cst_80 {dimension_numbers = #tpu.dot_dimension_numbers<[1], [0], [0], [1], [0, 0, 1, 1], [], []>} : vector<2x128xf32>, vector<128x256xf32>, vector<2x256xf32> -> vector<2x256xf32>
    %218 = arith.addf %200, %217 : vector<2x256xf32>
    %cst_81 = arith.constant dense<0.000000e+00> : vector<2x256xf32>
    %219 = tpu.matmul %117, %208, %cst_81 {dimension_numbers = #tpu.dot_dimension_numbers<[1], [0], [0], [1], [0, 0, 1, 1], [], []>} : vector<2x128xf32>, vector<128x256xf32>, vector<2x256xf32> -> vector<2x256xf32>
    %220 = arith.addf %202, %219 : vector<2x256xf32>
    %cst_82 = arith.constant dense<0.000000e+00> : vector<2x256xf32>
    %221 = tpu.matmul %126, %208, %cst_82 {dimension_numbers = #tpu.dot_dimension_numbers<[1], [0], [0], [1], [0, 0, 1, 1], [], []>} : vector<2x128xf32>, vector<128x256xf32>, vector<2x256xf32> -> vector<2x256xf32>
    %222 = arith.addf %204, %221 : vector<2x256xf32>
    %cst_83 = arith.constant dense<0.000000e+00> : vector<2x256xf32>
    %223 = tpu.matmul %135, %208, %cst_83 {dimension_numbers = #tpu.dot_dimension_numbers<[1], [0], [0], [1], [0, 0, 1, 1], [], []>} : vector<2x128xf32>, vector<128x256xf32>, vector<2x256xf32> -> vector<2x256xf32>
    %224 = arith.addf %206, %223 : vector<2x256xf32>
    %c4_84 = arith.constant 4 : index
    %c0_85 = arith.constant 0 : index
    %c0_86 = arith.constant 0 : index
    %225 = vector.load %arg4[%c4_84, %c0_85, %c0_86] : memref<5x128x256xf32, #tpu.memory_space<vmem>>, vector<1x128x256xf32>
    %226 = vector.shape_cast %225 : vector<1x128x256xf32> to vector<128x256xf32>
    %cst_87 = arith.constant dense<0.000000e+00> : vector<2x256xf32>
    %227 = tpu.matmul %81, %226, %cst_87 {dimension_numbers = #tpu.dot_dimension_numbers<[1], [0], [0], [1], [0, 0, 1, 1], [], []>} : vector<2x128xf32>, vector<128x256xf32>, vector<2x256xf32> -> vector<2x256xf32>
    %228 = arith.addf %210, %227 : vector<2x256xf32>
    %cst_88 = arith.constant dense<0.000000e+00> : vector<2x256xf32>
    %229 = tpu.matmul %90, %226, %cst_88 {dimension_numbers = #tpu.dot_dimension_numbers<[1], [0], [0], [1], [0, 0, 1, 1], [], []>} : vector<2x128xf32>, vector<128x256xf32>, vector<2x256xf32> -> vector<2x256xf32>
    %230 = arith.addf %212, %229 : vector<2x256xf32>
    %cst_89 = arith.constant dense<0.000000e+00> : vector<2x256xf32>
    %231 = tpu.matmul %99, %226, %cst_89 {dimension_numbers = #tpu.dot_dimension_numbers<[1], [0], [0], [1], [0, 0, 1, 1], [], []>} : vector<2x128xf32>, vector<128x256xf32>, vector<2x256xf32> -> vector<2x256xf32>
    %232 = arith.addf %214, %231 : vector<2x256xf32>
    %cst_90 = arith.constant dense<0.000000e+00> : vector<2x256xf32>
    %233 = tpu.matmul %108, %226, %cst_90 {dimension_numbers = #tpu.dot_dimension_numbers<[1], [0], [0], [1], [0, 0, 1, 1], [], []>} : vector<2x128xf32>, vector<128x256xf32>, vector<2x256xf32> -> vector<2x256xf32>
    %234 = arith.addf %216, %233 : vector<2x256xf32>
    %cst_91 = arith.constant dense<0.000000e+00> : vector<2x256xf32>
    %235 = tpu.matmul %117, %226, %cst_91 {dimension_numbers = #tpu.dot_dimension_numbers<[1], [0], [0], [1], [0, 0, 1, 1], [], []>} : vector<2x128xf32>, vector<128x256xf32>, vector<2x256xf32> -> vector<2x256xf32>
    %236 = arith.addf %218, %235 : vector<2x256xf32>
    %cst_92 = arith.constant dense<0.000000e+00> : vector<2x256xf32>
    %237 = tpu.matmul %126, %226, %cst_92 {dimension_numbers = #tpu.dot_dimension_numbers<[1], [0], [0], [1], [0, 0, 1, 1], [], []>} : vector<2x128xf32>, vector<128x256xf32>, vector<2x256xf32> -> vector<2x256xf32>
    %238 = arith.addf %220, %237 : vector<2x256xf32>
    %cst_93 = arith.constant dense<0.000000e+00> : vector<2x256xf32>
    %239 = tpu.matmul %135, %226, %cst_93 {dimension_numbers = #tpu.dot_dimension_numbers<[1], [0], [0], [1], [0, 0, 1, 1], [], []>} : vector<2x128xf32>, vector<128x256xf32>, vector<2x256xf32> -> vector<2x256xf32>
    %240 = arith.addf %222, %239 : vector<2x256xf32>
    %cst_94 = arith.constant dense<0.000000e+00> : vector<2x256xf32>
    %241 = tpu.matmul %144, %226, %cst_94 {dimension_numbers = #tpu.dot_dimension_numbers<[1], [0], [0], [1], [0, 0, 1, 1], [], []>} : vector<2x128xf32>, vector<128x256xf32>, vector<2x256xf32> -> vector<2x256xf32>
    %242 = arith.addf %224, %241 : vector<2x256xf32>
    %c0_95 = arith.constant 0 : index
    %c0_96 = arith.constant 0 : index
    %243 = vector.load %arg5[%c0_95, %c0_96] : memref<1x128xf32, #tpu.memory_space<vmem>>, vector<1x128xf32>
    %244 = vector.extract_strided_slice %228 {offsets = [0, 0], sizes = [2, 128], strides = [1, 1]} : vector<2x256xf32> to vector<2x128xf32>
    %245 = vector.extract_strided_slice %228 {offsets = [0, 128], sizes = [2, 128], strides = [1, 1]} : vector<2x256xf32> to vector<2x128xf32>
    %246 = arith.maximumf %244, %245 : vector<2x128xf32>
    %247 = vector.extract_strided_slice %230 {offsets = [0, 0], sizes = [2, 128], strides = [1, 1]} : vector<2x256xf32> to vector<2x128xf32>
    %248 = vector.extract_strided_slice %230 {offsets = [0, 128], sizes = [2, 128], strides = [1, 1]} : vector<2x256xf32> to vector<2x128xf32>
    %249 = arith.maximumf %247, %248 : vector<2x128xf32>
    %250 = vector.extract_strided_slice %232 {offsets = [0, 0], sizes = [2, 128], strides = [1, 1]} : vector<2x256xf32> to vector<2x128xf32>
    %251 = vector.extract_strided_slice %232 {offsets = [0, 128], sizes = [2, 128], strides = [1, 1]} : vector<2x256xf32> to vector<2x128xf32>
    %252 = arith.maximumf %250, %251 : vector<2x128xf32>
    %253 = vector.extract_strided_slice %234 {offsets = [0, 0], sizes = [2, 128], strides = [1, 1]} : vector<2x256xf32> to vector<2x128xf32>
    %254 = vector.extract_strided_slice %234 {offsets = [0, 128], sizes = [2, 128], strides = [1, 1]} : vector<2x256xf32> to vector<2x128xf32>
    %255 = arith.maximumf %253, %254 : vector<2x128xf32>
    %256 = vector.extract_strided_slice %236 {offsets = [0, 0], sizes = [2, 128], strides = [1, 1]} : vector<2x256xf32> to vector<2x128xf32>
    %257 = vector.extract_strided_slice %236 {offsets = [0, 128], sizes = [2, 128], strides = [1, 1]} : vector<2x256xf32> to vector<2x128xf32>
    %258 = arith.maximumf %256, %257 : vector<2x128xf32>
    %259 = vector.extract_strided_slice %238 {offsets = [0, 0], sizes = [2, 128], strides = [1, 1]} : vector<2x256xf32> to vector<2x128xf32>
    %260 = vector.extract_strided_slice %238 {offsets = [0, 128], sizes = [2, 128], strides = [1, 1]} : vector<2x256xf32> to vector<2x128xf32>
    %261 = arith.maximumf %259, %260 : vector<2x128xf32>
    %262 = vector.extract_strided_slice %240 {offsets = [0, 0], sizes = [2, 128], strides = [1, 1]} : vector<2x256xf32> to vector<2x128xf32>
    %263 = vector.extract_strided_slice %240 {offsets = [0, 128], sizes = [2, 128], strides = [1, 1]} : vector<2x256xf32> to vector<2x128xf32>
    %264 = arith.maximumf %262, %263 : vector<2x128xf32>
    %265 = vector.extract_strided_slice %242 {offsets = [0, 0], sizes = [2, 128], strides = [1, 1]} : vector<2x256xf32> to vector<2x128xf32>
    %266 = vector.extract_strided_slice %242 {offsets = [0, 128], sizes = [2, 128], strides = [1, 1]} : vector<2x256xf32> to vector<2x128xf32>
    %267 = arith.maximumf %265, %266 : vector<2x128xf32>
    %268 = arith.maximumf %246, %249 : vector<2x128xf32>
    %269 = vector.broadcast %243 : vector<1x128xf32> to vector<2x128xf32>
    %270 = arith.addf %268, %269 : vector<2x128xf32>
    %cst_97 = arith.constant 0.000000e+00 : f32
    %271 = vector.broadcast %cst_97 : f32 to vector<2x128xf32>
    %272 = arith.maximumf %270, %271 : vector<2x128xf32>
    %273 = arith.maximumf %252, %255 : vector<2x128xf32>
    %274 = vector.broadcast %243 : vector<1x128xf32> to vector<2x128xf32>
    %275 = arith.addf %273, %274 : vector<2x128xf32>
    %cst_98 = arith.constant 0.000000e+00 : f32
    %276 = vector.broadcast %cst_98 : f32 to vector<2x128xf32>
    %277 = arith.maximumf %275, %276 : vector<2x128xf32>
    %278 = arith.maximumf %258, %261 : vector<2x128xf32>
    %279 = vector.broadcast %243 : vector<1x128xf32> to vector<2x128xf32>
    %280 = arith.addf %278, %279 : vector<2x128xf32>
    %cst_99 = arith.constant 0.000000e+00 : f32
    %281 = vector.broadcast %cst_99 : f32 to vector<2x128xf32>
    %282 = arith.maximumf %280, %281 : vector<2x128xf32>
    %283 = arith.maximumf %264, %267 : vector<2x128xf32>
    %284 = vector.broadcast %243 : vector<1x128xf32> to vector<2x128xf32>
    %285 = arith.addf %283, %284 : vector<2x128xf32>
    %cst_100 = arith.constant 0.000000e+00 : f32
    %286 = vector.broadcast %cst_100 : f32 to vector<2x128xf32>
    %287 = arith.maximumf %285, %286 : vector<2x128xf32>
    %cst_101 = arith.constant 0.000000e+00 : f32
    %288 = vector.broadcast %cst_101 : f32 to vector<2x128xf32>
    %c0_102 = arith.constant 0 : index
    %c0_103 = arith.constant 0 : index
    %c0_104 = arith.constant 0 : index
    %289 = vector.load %arg6[%c0_102, %c0_103, %c0_104] : memref<4x128x128xf32, #tpu.memory_space<vmem>>, vector<1x128x128xf32>
    %290 = vector.shape_cast %289 : vector<1x128x128xf32> to vector<128x128xf32>
    %cst_105 = arith.constant dense<0.000000e+00> : vector<2x128xf32>
    %291 = tpu.matmul %272, %290, %cst_105 {dimension_numbers = #tpu.dot_dimension_numbers<[1], [0], [0], [1], [0, 0, 1, 1], [], []>} : vector<2x128xf32>, vector<128x128xf32>, vector<2x128xf32> -> vector<2x128xf32>
    %292 = arith.addf %288, %291 : vector<2x128xf32>
    %c1_106 = arith.constant 1 : index
    %c0_107 = arith.constant 0 : index
    %c0_108 = arith.constant 0 : index
    %293 = vector.load %arg6[%c1_106, %c0_107, %c0_108] : memref<4x128x128xf32, #tpu.memory_space<vmem>>, vector<1x128x128xf32>
    %294 = vector.shape_cast %293 : vector<1x128x128xf32> to vector<128x128xf32>
    %cst_109 = arith.constant dense<0.000000e+00> : vector<2x128xf32>
    %295 = tpu.matmul %277, %294, %cst_109 {dimension_numbers = #tpu.dot_dimension_numbers<[1], [0], [0], [1], [0, 0, 1, 1], [], []>} : vector<2x128xf32>, vector<128x128xf32>, vector<2x128xf32> -> vector<2x128xf32>
    %296 = arith.addf %292, %295 : vector<2x128xf32>
    %c2_110 = arith.constant 2 : index
    %c0_111 = arith.constant 0 : index
    %c0_112 = arith.constant 0 : index
    %297 = vector.load %arg6[%c2_110, %c0_111, %c0_112] : memref<4x128x128xf32, #tpu.memory_space<vmem>>, vector<1x128x128xf32>
    %298 = vector.shape_cast %297 : vector<1x128x128xf32> to vector<128x128xf32>
    %cst_113 = arith.constant dense<0.000000e+00> : vector<2x128xf32>
    %299 = tpu.matmul %282, %298, %cst_113 {dimension_numbers = #tpu.dot_dimension_numbers<[1], [0], [0], [1], [0, 0, 1, 1], [], []>} : vector<2x128xf32>, vector<128x128xf32>, vector<2x128xf32> -> vector<2x128xf32>
    %300 = arith.addf %296, %299 : vector<2x128xf32>
    %c3_114 = arith.constant 3 : index
    %c0_115 = arith.constant 0 : index
    %c0_116 = arith.constant 0 : index
    %301 = vector.load %arg6[%c3_114, %c0_115, %c0_116] : memref<4x128x128xf32, #tpu.memory_space<vmem>>, vector<1x128x128xf32>
    %302 = vector.shape_cast %301 : vector<1x128x128xf32> to vector<128x128xf32>
    %cst_117 = arith.constant dense<0.000000e+00> : vector<2x128xf32>
    %303 = tpu.matmul %287, %302, %cst_117 {dimension_numbers = #tpu.dot_dimension_numbers<[1], [0], [0], [1], [0, 0, 1, 1], [], []>} : vector<2x128xf32>, vector<128x128xf32>, vector<2x128xf32> -> vector<2x128xf32>
    %304 = arith.addf %300, %303 : vector<2x128xf32>
    %c0_118 = arith.constant 0 : index
    %c0_119 = arith.constant 0 : index
    %305 = vector.load %arg7[%c0_118, %c0_119] : memref<1x128xf32, #tpu.memory_space<vmem>>, vector<1x128xf32>
    %306 = vector.broadcast %305 : vector<1x128xf32> to vector<2x128xf32>
    %307 = arith.addf %304, %306 : vector<2x128xf32>
    %cst_120 = arith.constant 0.000000e+00 : f32
    %308 = vector.broadcast %cst_120 : f32 to vector<2x128xf32>
    %309 = arith.maximumf %307, %308 : vector<2x128xf32>
    %c0_121 = arith.constant 0 : index
    %c0_122 = arith.constant 0 : index
    %310 = vector.load %arg8[%c0_121, %c0_122] : memref<128x128xf32, #tpu.memory_space<vmem>>, vector<128x128xf32>
    %cst_123 = arith.constant dense<0.000000e+00> : vector<2x128xf32>
    %311 = tpu.matmul %309, %310, %cst_123 {dimension_numbers = #tpu.dot_dimension_numbers<[1], [0], [0], [1], [0, 0, 1, 1], [], []>} : vector<2x128xf32>, vector<128x128xf32>, vector<2x128xf32> -> vector<2x128xf32>
    %c0_124 = arith.constant 0 : index
    %c0_125 = arith.constant 0 : index
    %312 = vector.load %arg9[%c0_124, %c0_125] : memref<1x128xf32, #tpu.memory_space<vmem>>, vector<1x128xf32>
    %313 = vector.broadcast %312 : vector<1x128xf32> to vector<2x128xf32>
    %314 = arith.addf %311, %313 : vector<2x128xf32>
    %cst_126 = arith.constant dense<0xFF800000> : vector<2xf32>
    %315 = vector.multi_reduction <maximumf>, %314, %cst_126 [1] : vector<2x128xf32> to vector<2xf32>
    %316 = vector.shape_cast %315 : vector<2xf32> to vector<2x1xf32>
    %317 = vector.broadcast %316 : vector<2x1xf32> to vector<2x128xf32>
    %318 = arith.subf %314, %317 : vector<2x128xf32>
    %319 = math.exp %318 : vector<2x128xf32>
    %cst_127 = arith.constant dense<0.000000e+00> : vector<2xf32>
    %320 = vector.multi_reduction <add>, %319, %cst_127 [1] : vector<2x128xf32> to vector<2xf32>
    %321 = vector.shape_cast %320 : vector<2xf32> to vector<2x1xf32>
    %322 = math.log %321 : vector<2x1xf32>
    %323 = vector.broadcast %322 : vector<2x1xf32> to vector<2x128xf32>
    %324 = arith.subf %318, %323 : vector<2x128xf32>
    %c0_128 = arith.constant 0 : index
    %c0_129 = arith.constant 0 : index
    %325 = vector.load %arg10[%c0_128, %c0_129] : memref<2x128xf32, #tpu.memory_space<vmem>>, vector<2x128xf32>
    tpu.vector_store %arg10[%c0_128, %c0_129], %324 {strides = array<i32>} : memref<2x128xf32, #tpu.memory_space<vmem>>, vector<2x128xf32>,
    return
  }
  func.func @transform_0(%arg0: i32) -> (i32, i32, i32) {
    %c0_i32 = arith.constant 0 : i32
    %c0_i32_0 = arith.constant 0 : i32
    %c0_i32_1 = arith.constant 0 : i32
    return %arg0, %c0_i32, %c0_i32_0 : i32, i32, i32
  }
  func.func @transform_1(%arg0: i32) -> (i32, i32, i32) {
    %c0_i32 = arith.constant 0 : i32
    %c0_i32_0 = arith.constant 0 : i32
    %c0_i32_1 = arith.constant 0 : i32
    %c0_i32_2 = arith.constant 0 : i32
    return %c0_i32, %c0_i32_0, %c0_i32_1 : i32, i32, i32
  }
  func.func @transform_2(%arg0: i32) -> (i32, i32) {
    %c0_i32 = arith.constant 0 : i32
    %c0_i32_0 = arith.constant 0 : i32
    %c0_i32_1 = arith.constant 0 : i32
    return %c0_i32, %c0_i32_0 : i32, i32
  }
  func.func @transform_3(%arg0: i32) -> (i32, i32, i32) {
    %c0_i32 = arith.constant 0 : i32
    %c0_i32_0 = arith.constant 0 : i32
    %c0_i32_1 = arith.constant 0 : i32
    %c0_i32_2 = arith.constant 0 : i32
    return %c0_i32, %c0_i32_0, %c0_i32_1 : i32, i32, i32
  }
  func.func @transform_4(%arg0: i32) -> (i32, i32) {
    %c0_i32 = arith.constant 0 : i32
    %c0_i32_0 = arith.constant 0 : i32
    %c0_i32_1 = arith.constant 0 : i32
    return %c0_i32, %c0_i32_0 : i32, i32
  }
  func.func @transform_5(%arg0: i32) -> (i32, i32, i32) {
    %c0_i32 = arith.constant 0 : i32
    %c0_i32_0 = arith.constant 0 : i32
    %c0_i32_1 = arith.constant 0 : i32
    %c0_i32_2 = arith.constant 0 : i32
    return %c0_i32, %c0_i32_0, %c0_i32_1 : i32, i32, i32
  }
  func.func @transform_6(%arg0: i32) -> (i32, i32) {
    %c0_i32 = arith.constant 0 : i32
    %c0_i32_0 = arith.constant 0 : i32
    %c0_i32_1 = arith.constant 0 : i32
    return %c0_i32, %c0_i32_0 : i32, i32
  }
  func.func @transform_7(%arg0: i32) -> (i32, i32) {
    %c0_i32 = arith.constant 0 : i32
    %c0_i32_0 = arith.constant 0 : i32
    %c0_i32_1 = arith.constant 0 : i32
    return %c0_i32, %c0_i32_0 : i32, i32
  }
  func.func @transform_8(%arg0: i32) -> (i32, i32) {
    %c0_i32 = arith.constant 0 : i32
    %c0_i32_0 = arith.constant 0 : i32
    %c0_i32_1 = arith.constant 0 : i32
    return %c0_i32, %c0_i32_0 : i32, i32
  }
  func.func @transform_9(%arg0: i32) -> (i32, i32) {
    %c0_i32 = arith.constant 0 : i32
    %c0_i32_0 = arith.constant 0 : i32
    return %arg0, %c0_i32 : i32, i32
  }
}

</mosaic_0001>

<bundles_post_ra>
// kernel: forward.1
= control target key start
LH: loop header
LB: loop body
LE: loop exit
PB: predicated region body
PF: predicated region fallthrough
CT: control target
= control target key end

     0   :  { %14 = vsyncpa [#allocation3], 0  ;;  %s7421_s0 = inlined_call_operand.vmem [shape: f32[2,28,32], index: 0, kind: input, shape index: {}]   ;;  %s7422_s1 = inlined_call_operand.vmem [shape: f32[5,32,256], index: 1, kind: input, shape index: {}]   ;;  %s7423_s2 = inlined_call_operand.vmem [shape: f32[1,128], index: 2, kind: input, shape index: {}]   ;;  %s7424_s3 = inlined_call_operand.hbm [shape: f32[5,128,256], index: 3, kind: input, shape index: {}]   ;;  %s7425_s4 = inlined_call_operand.vmem [shape: f32[1,128], index: 4, kind: input, shape index: {}]   ;;  %s7426_s5 = inlined_call_operand.hbm [shape: f32[4,128,128], index: 5, kind: input, shape index: {}]   ;;  %s7427_s6 = inlined_call_operand.vmem [shape: f32[1,128], index: 6, kind: input, shape index: {}]   ;;  %s7428_s7 = inlined_call_operand.hbm [shape: f32[128,128], index: 7, kind: input, shape index: {}]   ;;  %s7429_s8 = inlined_call_operand.vmem [shape: f32[1,128], index: 8, kind: input, shape index: {}]   ;;  %s7430_s9 = inlined_call_operand.hbm [shape: f32[2,128], index: 9, kind: output, shape index: {}]  }
   0x1   :  { %15 = vsyncpa [#allocation6], 0 }
   0x2   :  { %16 = vsyncpa [#allocation4], 0  ;;  %s4947_s30 = smov [#allocation5]  }
   0x3   :  { %s42_s10 = sshll.u32 %s4947_s30, 4  ;;  %s43_s10 = int_to_ptr.vmem [resolvable:$true] %s42_s10 }
   0x4   :  { %s4869_s11 = scalar_lea.vmem %s43_s10, 8192  ;;  %p4874_p1 = scmp.lt.s32.totalorder %s43_s10, %s43_s10 }
   0x5   :  { %p4870_p0 = scmp.ne.s32.totalorder %s43_s10, %s4869_s11  ;;  %p4875_p2 = scmp.lt.s32.totalorder %s4869_s11, %s4869_s11 }
   0x7   :  { %p4876_p3 = por %p4875_p2, %p4874_p1 }
   0x9   :  { %p4877_p4 = pnand %p4876_p3, %p4870_p0 }
   0xb   :  { %4880 = shalt.err (!%p4877_p4)
}
   0xc   :  { %s4948_s12 = smov 128   ;;  %s4949_s13 = smov 8  }
   0xd   :  { %48 = dma.hbm_to_vmem [thread:$0]  %s7426_s5, 8192, %s43_s10, [#allocation6], %s4948_s12, %s4948_s12, %s4949_s13  }
   0xe   :  { %s4950_s16 = smov [#allocation2]  }
   0xf   :  { %s28_s17 = sshll.u32 %s4950_s16, 4  ;;  %s29_s17 = int_to_ptr.vmem [resolvable:$true] %s28_s17 }
  0x10   :  { %s4889_s18 = scalar_lea.vmem %s29_s17, 20480  ;;  %p4894_p6 = scmp.lt.s32.totalorder %s29_s17, %s29_s17 }
  0x11   :  { %p4890_p5 = scmp.ne.s32.totalorder %s29_s17, %s4889_s18  ;;  %p4895_p7 = scmp.lt.s32.totalorder %s4889_s18, %s4889_s18 }
  0x13   :  { %p4896_p8 = por %p4895_p7, %p4894_p6 }
  0x15   :  { %p4897_p9 = pnand %p4896_p8, %p4890_p5 }
  0x17   :  { %4900 = shalt.err (!%p4897_p9)
}
  0x18   :  { %s4951_s19 = smov 256   ;;  %s4952_s20 = smov 16  }
  0x19   :  { %34 = dma.hbm_to_vmem [thread:$0]  %s7424_s3, 20480, %s29_s17, [#allocation3], %s4951_s19, %s4951_s19, %s4952_s20  }
  0x1a   :  { %s4953_s23 = smov [#allocation7]  }
  0x1b   :  { %s56_s24 = sshll.u32 %s4953_s23, 4  ;;  %s57_s24 = int_to_ptr.vmem [resolvable:$true] %s56_s24 }
  0x1c   :  { %s4909_s5 = scalar_lea.vmem %s57_s24, 2048  ;;  %p4914_p11 = scmp.lt.s32.totalorder %s57_s24, %s57_s24 }
  0x1d   :  { %p4910_p10 = scmp.ne.s32.totalorder %s57_s24, %s4909_s5  ;;  %p4915_p12 = scmp.lt.s32.totalorder %s4909_s5, %s4909_s5 }
  0x1f   :  { %p4916_p13 = por %p4915_p12, %p4914_p11 }
  0x21   :  { %p4917_p0 = pnand %p4916_p13, %p4910_p10 }
  0x23   :  { %4920 = shalt.err (!%p4917_p0)
}
  0x24   :  { %62 = dma.hbm_to_vmem [thread:$0]  %s7428_s7, 2048, %s57_s24, [#allocation6], %s4948_s12, %s4948_s12, %s4949_s13  }
  0x25   :  { %4941 = dma.done.wait [#allocation3], 20480  }
  0x26   :  { %4942 = vsyncadd [#allocation3], 4294946816 }
  0x27   :  { %4943 = dma.done.wait [#allocation6], 10240  }
  0x28   :  { %4944 = vsyncadd [#allocation6], 4294957056  ;;  %v7431_v0 = vmov 0.0   ;;  %v4464_v1 = vld [vmem:[%s7422_s1 + $0x78] sm:$0xff]  ;;  %v4463_v3 = vld [vmem:[%s7422_s1 + $0x70] sm:$0xff]  ;;  %vm98_vm0 = vcmask 1046528  }
  0x29   :  { %199 = vmatprep.mubr.f32.mxu0 %v7431_v0  ;;  %312 = vmatprep.mubr.f32.mxu1 %v7431_v0  ;;  %v89_v2 = vld [vmem:[%s7422_s1 + $0x38] sm:$0xff]  ;;  %v88_v4 = vld [vmem:[%s7422_s1 + $0x30] sm:$0xff]  ;;  %v4462_v5 = vld [vmem:[%s7422_s1 + $0x68] sm:$0xff]  ;;  %vm122_vm1 = vcmask 261120   ;;  %vm349_vm2 = vcmask 1045504   ;;  %vm498_vm3 = vcmask 1044480  }
  0x2a   :  { %159 = vmatprep.subr.mxu0 %v4464_v1  ;;  %272 = vmatprep.subr.mxu1 %v89_v2  ;;  %v87_v6 = vld [vmem:[%s7422_s1 + $0x28] sm:$0xff]  ;;  %v4461_v7 = vld [vmem:[%s7422_s1 + $0x60] sm:$0xff]  ;;  %v4460_v9 = vld [vmem:[%s7422_s1 + $0x58] sm:$0xff]  ;;  %vm647_vm4 = vcmask 1043456   ;;  %vm914_vm5 = vcmask 1041409   ;;  %vm4955_vm6 = vmmov 0  }
  0x2b   :  { %160 = vmatpush1.msra.mxu0 %v4463_v3  ;;  %273 = vmatpush1.msra.mxu1 %v88_v4  ;;  %v86_v8 = vld [vmem:[%s7422_s1 + $0x20] sm:$0xff]  ;;  %v85_v10 = vld [vmem:[%s7422_s1 + $0x18] sm:$0xff]  ;;  %v4459_v11 = vld [vmem:[%s7422_s1 + $0x50] sm:$0xff]  ;;  %vm4427_vm7 = vcmask 1041408  }
  0x2c   :  { %161 = vmatprep.subr.mxu0 %v4462_v5  ;;  %274 = vmatprep.subr.mxu1 %v87_v6  ;;  %v84_v12 = vld [vmem:[%s7422_s1 + $0x10] sm:$0xff]  ;;  %v4458_v13 = vld [vmem:[%s7422_s1 + $0x48] sm:$0xff]  ;;  %v4457_v15 = vld [vmem:[%s7422_s1 + $0x40] sm:$0xff] }
  0x2d   :  { %162 = vmatpush1.msra.mxu0 %v4461_v7  ;;  %275 = vmatpush1.msra.mxu1 %v86_v8  ;;  %v83_v14 = vld [vmem:[%s7422_s1 + $0x8] sm:$0xff]  ;;  %v82_v16 = vld [vmem:[%s7422_s1] sm:$0xff]  ;;  %v5081_v21 = vld [vmem:[%s7421_s0 + $0x10] sm:$0xff] }
  0x2e   :  { %163 = vmatprep.subr.mxu0 %v4460_v9  ;;  %276 = vmatprep.subr.mxu1 %v85_v10  ;;  %v5069_v17 = vld [vmem:[%s7421_s0] sm:$0xff]  ;;  %v5074_v18 = vld [vmem:[%s7421_s0 + $0x8] sm:$0xff]  ;;  %v4484_v22 = vld [vmem:[%s7422_s1 + $0xb8] sm:$0xff]  ;;  %v102_v23 = vrot.slane %v5081_v21, 1  ;;  %v353_v62 = vrot.slane %v5081_v21, 2  ;;  %v502_v63 = vrot.slane %v5081_v21, 3 }
  0x2f   :  { %164 = vmatpush1.msra.mxu0 %v4459_v11  ;;  %277 = vmatpush1.msra.mxu1 %v84_v12  ;;  %v99_v19 = vrot.slane %v5069_v17, 1  ;;  %v100_v20 = vrot.slane %v5074_v18, 1  ;;  %v5090_v24 = vld [vmem:[%s7421_s0 + $0x18] sm:$0xf]  ;;  %v4483_v26 = vld [vmem:[%s7422_s1 + $0xb0] sm:$0xff]  ;;  %v4482_v27 = vld [vmem:[%s7422_s1 + $0xa8] sm:$0xff] }
  0x30   :  { %165 = vmatprep.subr.mxu0 %v4458_v13  ;;  %278 = vmatprep.subr.mxu1 %v83_v14  ;;  %v104_v29 = vrot.slane %v5090_v24, 1  ;;  %v4498_v30 = vld [vmem:[%s7422_s1 + $0xf8] sm:$0xff]  ;;  %v5112_v31 = vld [vmem:[%s7421_s0 + $0x20] sm:$0xff]  ;;  %v5117_v32 = vld [vmem:[%s7421_s0 + $0x28] sm:$0xff]  ;;  %v350_v55 = vrot.slane %v5069_v17, 2  ;;  %v351_v57 = vrot.slane %v5074_v18, 2 }
  0x31   :  { %166 = vmatpush1.msra.mxu0 %v4457_v15  ;;  %279 = vmatpush1.msra.mxu1 %v82_v16  ;;  %v101_v25 = vsel %vm98_vm0, %v99_v19, %v100_v20  ;;  %v103_v28 = vsel %vm98_vm0, %v100_v20, %v102_v23  ;;  %v4481_v33 = vld [vmem:[%s7422_s1 + $0xa0] sm:$0xff]  ;;  %v4497_v34 = vld [vmem:[%s7422_s1 + $0xf0] sm:$0xff]  ;;  %v4480_v35 = vld [vmem:[%s7422_s1 + $0x98] sm:$0xff]  ;;  %v106_v38 = vrot.slane %v5112_v31, 1  ;;  %v107_v39 = vrot.slane %v5117_v32, 1 }
  0x32   :  { %4465 = vmatmul.mubr.msk.f32.vlgmr.msra.gmra.mxu0 %vm122_vm1, %v101_v25  ;;  %4471 = vmatmul.mubr.msk.f32.vlgmr.msra.gmra.mxu1 %vm122_vm1, %v5069_v17  ;;  %v4496_v36 = vld [vmem:[%s7422_s1 + $0xe8] sm:$0xff]  ;;  %v105_v37 = vsel %vm98_vm0, %v102_v23, %v104_v29  ;;  %v5142_v40 = vld [vmem:[%s7421_s0 + $0x30] sm:$0xff]  ;;  %v4495_v42 = vld [vmem:[%s7422_s1 + $0xe0] sm:$0xff]  ;;  %v499_v58 = vrot.slane %v5069_v17, 3  ;;  %v500_v59 = vrot.slane %v5074_v18, 3  ;;  %v352_v60 = vsel %vm349_vm2, %v350_v55, %v351_v57 }
  0x33   :  { %409 = vmatprep.subr.mxu0 %v4484_v22  ;;  %205 = vmatprep.mubr.f32.mxu0 %v7431_v0  ;;  %v4479_v41 = vld [vmem:[%s7422_s1 + $0x90] sm:$0xff]  ;;  %v4478_v43 = vld [vmem:[%s7422_s1 + $0x88] sm:$0xff]  ;;  %v4494_v44 = vld [vmem:[%s7422_s1 + $0xd8] sm:$0xff]  ;;  %v108_v45 = vsel %vm98_vm0, %v106_v38, %v107_v39  ;;  %v109_v46 = vrot.slane %v5142_v40, 1  ;;  %v355_v4 = vrot.slane %v5090_v24, 2  ;;  %v354_v5 = vsel %vm349_vm2, %v351_v57, %v353_v62 }
  0x34   :  { %410 = vmatpush1.msra.mxu0 %v4483_v26  ;;  %318 = vmatprep.mubr.f32.mxu1 %v7431_v0  ;;  %v5166_v47 = vld [vmem:[%s7421_s0 + $0x38] sm:$0xf]  ;;  %v4477_v48 = vld [vmem:[%s7422_s1 + $0x80] sm:$0xff]  ;;  %v4493_v49 = vld [vmem:[%s7422_s1 + $0xd0] sm:$0xff]  ;;  %v501_v61 = vsel %vm498_vm3, %v499_v58, %v500_v59  ;;  %v503_v6 = vsel %vm498_vm3, %v500_v59, %v502_v63  ;;  %v504_v7 = vrot.slane %v5090_v24, 3  ;;  %v357_v10 = vrot.slane %v5112_v31, 2 }
  0x35   :  { %411 = vmatprep.subr.mxu0 %v4482_v27  ;;  %558 = vmatprep.subr.mxu1 %v4498_v30  ;;  %v4492_v50 = vld [vmem:[%s7422_s1 + $0xc8] sm:$0xff]  ;;  %v4512_v51 = vld [vmem:[%s7422_s1 + $0x138] sm:$0xff]  ;;  %v110_v52 = vsel %vm98_vm0, %v107_v39, %v109_v46  ;;  %v111_v53 = vrot.slane %v5166_v47, 1  ;;  %v4491_v54 = vld [vmem:[%s7422_s1 + $0xc0] sm:$0xff]  ;;  %v356_v9 = vsel %vm349_vm2, %v353_v62, %v355_v4  ;;  %v358_v13 = vrot.slane %v5117_v32, 2 }
  0x36   :  { %4466 = vmatmul.mubr.msk.f32.gmra.mxu0 %vm122_vm1, %v103_v28  ;;  %4472 = vmatmul.mubr.msk.f32.gmra.mxu1 %vm122_vm1, %v5074_v18  ;;  %v4511_v1 = vld [vmem:[%s7422_s1 + $0x130] sm:$0xff]  ;;  %v4510_v2 = vld [vmem:[%s7422_s1 + $0x128] sm:$0xff]  ;;  %v4509_v3 = vld [vmem:[%s7422_s1 + $0x120] sm:$0xff]  ;;  %v505_v12 = vsel %vm498_vm3, %v502_v63, %v504_v7  ;;  %v506_v14 = vrot.slane %v5112_v31, 3  ;;  %v507_v15 = vrot.slane %v5117_v32, 3  ;;  %v360_v23 = vrot.slane %v5142_v40, 2 }
  0x37   :  { %211 = vmatprep.mubr.f32.mxu0 %v7431_v0  ;;  %324 = vmatprep.mubr.f32.mxu1 %v7431_v0  ;;  %v112_v56 = vsel %vm98_vm0, %v109_v46, %v111_v53  ;;  %v4508_v8 = vld [vmem:[%s7422_s1 + $0x118] sm:$0xff]  ;;  %v4507_v11 = vld [vmem:[%s7422_s1 + $0x110] sm:$0xff]  ;;  %v4506_v16 = vld [vmem:[%s7422_s1 + $0x108] sm:$0xff]  ;;  %v359_v20 = vsel %vm349_vm2, %v357_v10, %v358_v13  ;;  %v509_v25 = vrot.slane %v5142_v40, 3  ;;  %v362_v28 = vrot.slane %v5166_v47, 2 }
  0x38   :  { %412 = vmatpush1.msra.mxu0 %v4481_v33  ;;  %559 = vmatpush1.msra.mxu1 %v4497_v34  ;;  %v4505_v19 = vld [vmem:[%s7422_s1 + $0x100] sm:$0xff]  ;;  %v508_v22 = vsel %vm498_vm3, %v506_v14, %v507_v15  ;;  %v361_v26 = vsel %vm349_vm2, %v358_v13, %v360_v23  ;;  %v511_v29 = vrot.slane %v5166_v47, 3  ;;  %v648_v34 = vrot.slane %v5069_v17, 4  ;;  %v5312_v46 = vld [vmem:[#allocation2 + $0x1e8] sm:$0xff]  ;;  %v5332_v53 = vld [vmem:[#allocation2 + $0xd0] sm:$0xff] }
  0x39   :  { %413 = vmatprep.subr.mxu0 %v4480_v35  ;;  %560 = vmatprep.subr.mxu1 %v4496_v36  ;;  %v510_v27 = vsel %vm498_vm3, %v507_v15, %v509_v25  ;;  %v363_v30 = vsel %vm349_vm2, %v360_v23, %v362_v28  ;;  %v649_v35 = vrot.slane %v5074_v18, 4  ;;  %v653_v18 = vrot.slane %v5090_v24, 4  ;;  %v5338_v55 = vld [vmem:[#allocation2 + $0xc8] sm:$0xff]  ;;  %v5344_v57 = vld [vmem:[#allocation2 + $0xc0] sm:$0xff]  ;;  %v5348_v58 = vld [vmem:[#allocation2 + $0x1b8] sm:$0xff] }
  0x3a   :  { %4467 = vmatmul.mubr.msk.f32.gmra.mxu0 %vm122_vm1, %v105_v37  ;;  %4473 = vmatmul.mubr.msk.f32.gmra.mxu1 %vm122_vm1, %v5081_v21  ;;  %v512_v33 = vsel %vm498_vm3, %v509_v25, %v511_v29  ;;  %v651_v37 = vrot.slane %v5081_v21, 4  ;;  %v655_v39 = vrot.slane %v5112_v31, 4  ;;  %v656_v21 = vrot.slane %v5117_v32, 4  ;;  %v5350_v59 = vld [vmem:[#allocation2 + $0xb8] sm:$0xff]  ;;  %v5360_v62 = vld [vmem:[#allocation2 + $0x1a8] sm:$0xff]  ;;  %v5392_v10 = vld [vmem:[#allocation2 + $0x80] sm:$0xff] }
  0x3b   :  { %217 = vmatprep.mubr.f32.mxu0 %v7431_v0  ;;  %330 = vmatprep.mubr.f32.mxu1 %v7431_v0  ;;  %v650_v36 = vsel %vm647_vm4, %v648_v34, %v649_v35  ;;  %v5362_v63 = vld [vmem:[#allocation2 + $0xa8] sm:$0xff]  ;;  %v5374_v4 = vld [vmem:[#allocation2 + $0x98] sm:$0xff]  ;;  %7554 = vst [vmem:[#allocation22_spill] sm:$0xff] %v5392_v10  ;;  %v5402_v13 = vld [vmem:[#allocation2 + $0x170] sm:$0xff] }
  0x3c   :  { %414 = vmatpush1.msra.mxu0 %v4479_v41  ;;  %561 = vmatpush1.msra.mxu1 %v4495_v42  ;;  %v652_v17 = vsel %vm647_vm4, %v649_v35, %v651_v37  ;;  %v654_v38 = vsel %vm647_vm4, %v651_v37, %v653_v18  ;;  %v657_v41 = vsel %vm647_vm4, %v655_v39, %v656_v21  ;;  %v658_v42 = vrot.slane %v5142_v40, 4  ;;  %v5384_v7 = vld [vmem:[#allocation2 + $0x188] sm:$0xff]  ;;  %v5404_v14 = vld [vmem:[#allocation2 + $0x70] sm:$0xff]  ;;  %v5422_v23 = vld [vmem:[#allocation2 + $0x58] sm:$0xff] }
  0x3d   :  { %415 = vmatprep.subr.mxu0 %v4478_v43  ;;  %562 = vmatprep.subr.mxu1 %v4494_v44  ;;  %v660_v43 = vrot.slane %v5166_v47, 4  ;;  %v5306_v44 = vld [vmem:[#allocation2 + $0x1f0] sm:$0xff]  ;;  %v5314_v47 = vld [vmem:[#allocation2 + $0xe8] sm:$0xff]  ;;  %7548 = vst [vmem:[#allocation16_spill] sm:$0xff] %v5374_v4  ;;  %7551 = vst [vmem:[#allocation19_spill] sm:$0xff] %v5384_v7 }
  0x3e   :  { %4468 = vmatmul.mubr.msk.f32.gmra.mxu0 %vm122_vm1, %v108_v45  ;;  %4474 = vmatmul.mubr.msk.f32.gmra.mxu1 %vm122_vm1, %v5112_v31  ;;  %v659_v24 = vsel %vm647_vm4, %v656_v21, %v658_v42  ;;  %v5308_v45 = vld [vmem:[#allocation2 + $0xf0] sm:$0xff]  ;;  %7557 = vst [vmem:[#allocation25_spill] sm:$0xff] %v5402_v13  ;;  %7558 = vst [vmem:[#allocation26_spill] sm:$0xff] %v5404_v14  ;;  %v5408_v15 = vld [vmem:[#allocation2 + $0x168] sm:$0xff] }
  0x3f   :  { %223 = vmatprep.mubr.f32.mxu0 %v7431_v0  ;;  %336 = vmatprep.mubr.f32.mxu1 %v7431_v0  ;;  %v661_v31 = vsel %vm647_vm4, %v658_v42, %v660_v43  ;;  %7559 = vst [vmem:[#allocation27_spill] sm:$0xff] %v5408_v15  ;;  %7564 = vst [vmem:[#allocation32_spill] sm:$0xff] %v5422_v23  ;;  %v5426_v25 = vld [vmem:[#allocation2 + $0x150] sm:$0xff]  ;;  %v5434_v28 = vld [vmem:[#allocation2 + $0x48] sm:$0xff] }
  0x40   :  { %416 = vmatpush1.msra.mxu0 %v4477_v48  ;;  %563 = vmatpush1.msra.mxu1 %v4493_v49  ;;  %v5318_v48 = vld [vmem:[#allocation2 + $0x1e0] sm:$0xff]  ;;  %7565 = vst [vmem:[#allocation33_spill] sm:$0xff] %v5426_v25  ;;  %7568 = vst [vmem:[#allocation36_spill] sm:$0xff] %v5434_v28  ;;  %v5446_v34 = vld [vmem:[#allocation2 + $0x38] sm:$0xff] }
  0x41   :  { %564 = vmatprep.subr.mxu1 %v4492_v50  ;;  %707 = vmatprep.subr.mxu0 %v4512_v51  ;;  %v5320_v49 = vld [vmem:[#allocation2 + $0xe0] sm:$0xff]  ;;  %v5324_v50 = vld [vmem:[#allocation2 + $0x1d8] sm:$0xff]  ;;  %7572 = vst [vmem:[#allocation40_spill] sm:$0xff] %v5446_v34  ;;  %v5450_v35 = vld [vmem:[#allocation2 + $0x130] sm:$0xff] }
  0x42   :  { %4469 = vmatmul.mubr.msk.f32.gmra.mxu0 %vm122_vm1, %v110_v52  ;;  %4475 = vmatmul.mubr.msk.f32.gmra.mxu1 %vm122_vm1, %v5117_v32  ;;  %v5300_v32 = vld [vmem:[#allocation2 + $0x1f8] sm:$0xff]  ;;  %v5330_v52 = vld [vmem:[#allocation2 + $0x1d0] sm:$0xff]  ;;  %v5438_v29 = vld [vmem:[#allocation2 + $0x140] sm:$0xff]  ;;  %7573 = vst [vmem:[#allocation41_spill] sm:$0xff] %v5450_v35 }
  0x43   :  { %229 = vmatprep.mubr.f32.mxu0 %v7431_v0  ;;  %342 = vmatprep.mubr.f32.mxu1 %v7431_v0  ;;  %7544 = vst [vmem:[#allocation12_spill] sm:$0xff] %v5300_v32  ;;  %v5326_v51 = vld [vmem:[#allocation2 + $0xd8] sm:$0xff]  ;;  %7569 = vst [vmem:[#allocation37_spill] sm:$0xff] %v5438_v29  ;;  %v5456_v37 = vld [vmem:[#allocation2 + $0x128] sm:$0xff] }
  0x44   :  { %565 = vmatpush1.msra.mxu1 %v4491_v54  ;;  %v5336_v54 = vld [vmem:[#allocation2 + $0x1c8] sm:$0xff]  ;;  %7575 = vst [vmem:[#allocation43_spill] sm:$0xff] %v5456_v37  ;;  %v5462_v18 = vld [vmem:[#allocation2 + $0x120] sm:$0xff]  ;;  %v5468_v39 = vld [vmem:[#allocation2 + $0x118] sm:$0xff] }
  0x45   :  { %917 = vmatprep.subr.mxu1 %v5300_v32  ;;  %7577 = vst [vmem:[#allocation45_spill] sm:$0xff] %v5462_v18  ;;  %7579 = vst [vmem:[#allocation47_spill] sm:$0xff] %v5468_v39  ;;  %v5470_v21 = vld [vmem:[#allocation2 + $0x18] sm:$0xff]  ;;  %v5476_v42 = vld [vmem:[#allocation2 + $0x10] sm:$0xff] }
  0x46   :  { %4470 = vmatmul.mubr.msk.f32.gmra.mxu0 %vm122_vm1, %v112_v56  ;;  %4476 = vmatmul.mubr.msk.f32.gmra.mxu1 %vm122_vm1, %v5142_v40  ;;  %v5302_v40 = vld [vmem:[#allocation2 + $0xf8] sm:$0xff]  ;;  %v5342_v56 = vld [vmem:[#allocation2 + $0x1c0] sm:$0xff]  ;;  %7580 = vst [vmem:[#allocation48_spill] sm:$0xff] %v5470_v21  ;;  %7582 = vst [vmem:[#allocation50_spill] sm:$0xff] %v5476_v42 }
  0x47   :  { %449 = vmatprep.mubr.f32.mxu0 %v7431_v0  ;;  %598 = vmatprep.mubr.f32.mxu1 %v7431_v0  ;;  %7545 = vst [vmem:[#allocation13_spill] sm:$0xff] %v5302_v40  ;;  %v5482_v43 = vld [vmem:[#allocation2 + $0x8] sm:$0xff] }
  0x48   :  { %7584 = vst [vmem:[#allocation52_spill] sm:$0xff] %v5482_v43 }
  0x4a   :  { %4485 = vmatmul.mubr.msk.f32.vlgmr.msra.gmra.mxu0 %vm122_vm1, %v352_v60  ;;  %4499 = vmatmul.mubr.msk.f32.vlgmr.msra.gmra.mxu1 %vm122_vm1, %v501_v61  ;;  %v5354_v60 = vld [vmem:[#allocation2 + $0x1b0] sm:$0xff] }
  0x4b   :  { %708 = vmatpush1.msra.mxu0 %v4511_v1  ;;  %455 = vmatprep.mubr.f32.mxu0 %v7431_v0  ;;  %v5356_v61 = vld [vmem:[#allocation2 + $0xb0] sm:$0xff]  ;;  %v5366_v1 = vld [vmem:[#allocation2 + $0x1a0] sm:$0xff] }
  0x4c   :  { %604 = vmatprep.mubr.f32.mxu1 %v7431_v0  ;;  %709 = vmatprep.subr.mxu0 %v4510_v2  ;;  %v5368_v2 = vld [vmem:[#allocation2 + $0xa0] sm:$0xff] }
  0x4d   :  { %710 = vmatpush1.msra.mxu0 %v4509_v3  ;;  %918 = vmatpush1.msra.mxu1 %v5306_v44  ;;  %7546 = vst [vmem:[#allocation14_spill] sm:$0xff] %v5368_v2  ;;  %v5372_v3 = vld [vmem:[#allocation2 + $0x198] sm:$0xff] }
  0x4e   :  { %4486 = vmatmul.mubr.msk.f32.gmra.mxu0 %vm122_vm1, %v354_v5  ;;  %4500 = vmatmul.mubr.msk.f32.gmra.mxu1 %vm122_vm1, %v503_v6  ;;  %7547 = vst [vmem:[#allocation15_spill] sm:$0xff] %v5372_v3  ;;  %v5378_v5 = vld [vmem:[#allocation2 + $0x190] sm:$0xff] }
  0x4f   :  { %461 = vmatprep.mubr.f32.mxu0 %v7431_v0  ;;  %610 = vmatprep.mubr.f32.mxu1 %v7431_v0  ;;  %7549 = vst [vmem:[#allocation17_spill] sm:$0xff] %v5378_v5  ;;  %v5380_v6 = vld [vmem:[#allocation2 + $0x90] sm:$0xff] }
  0x50   :  { %711 = vmatprep.subr.mxu0 %v4508_v8  ;;  %919 = vmatprep.subr.mxu1 %v5312_v46  ;;  %7550 = vst [vmem:[#allocation18_spill] sm:$0xff] %v5380_v6  ;;  %v5386_v8 = vld [vmem:[#allocation2 + $0x88] sm:$0xff] }
  0x51   :  { %712 = vmatpush1.msra.mxu0 %v4507_v11  ;;  %920 = vmatpush1.msra.mxu1 %v5318_v48  ;;  %7552 = vst [vmem:[#allocation20_spill] sm:$0xff] %v5386_v8  ;;  %v5396_v11 = vld [vmem:[#allocation2 + $0x178] sm:$0xff] }
  0x52   :  { %4487 = vmatmul.mubr.msk.f32.gmra.mxu0 %vm122_vm1, %v356_v9  ;;  %4501 = vmatmul.mubr.msk.f32.gmra.mxu1 %vm122_vm1, %v505_v12  ;;  %v5390_v9 = vld [vmem:[#allocation2 + $0x180] sm:$0xff]  ;;  %7555 = vst [vmem:[#allocation23_spill] sm:$0xff] %v5396_v11  ;;  %v5398_v12 = vld [vmem:[#allocation2 + $0x78] sm:$0xff] }
  0x53   :  { %467 = vmatprep.mubr.f32.mxu0 %v7431_v0  ;;  %616 = vmatprep.mubr.f32.mxu1 %v7431_v0  ;;  %7553 = vst [vmem:[#allocation21_spill] sm:$0xff] %v5390_v9  ;;  %7556 = vst [vmem:[#allocation24_spill] sm:$0xff] %v5398_v12 }
  0x54   :  { %713 = vmatprep.subr.mxu0 %v4506_v16  ;;  %921 = vmatprep.subr.mxu1 %v5324_v50  ;;  %v5410_v16 = vld [vmem:[#allocation2 + $0x68] sm:$0xff] }
  0x55   :  { %714 = vmatpush1.msra.mxu0 %v4505_v19  ;;  %922 = vmatpush1.msra.mxu1 %v5330_v52  ;;  %7560 = vst [vmem:[#allocation28_spill] sm:$0xff] %v5410_v16  ;;  %v5414_v19 = vld [vmem:[#allocation2 + $0x160] sm:$0xff] }
  0x56   :  { %4488 = vmatmul.mubr.msk.f32.gmra.mxu0 %vm122_vm1, %v359_v20  ;;  %4502 = vmatmul.mubr.msk.f32.gmra.mxu1 %vm122_vm1, %v508_v22  ;;  %7561 = vst [vmem:[#allocation29_spill] sm:$0xff] %v5414_v19  ;;  %v5416_v20 = vld [vmem:[#allocation2 + $0x60] sm:$0xff]  ;;  %v5420_v22 = vld [vmem:[#allocation2 + $0x158] sm:$0xff] }
  0x57   :  { %473 = vmatprep.mubr.f32.mxu0 %v7431_v0  ;;  %622 = vmatprep.mubr.f32.mxu1 %v7431_v0  ;;  %7562 = vst [vmem:[#allocation30_spill] sm:$0xff] %v5416_v20  ;;  %7563 = vst [vmem:[#allocation31_spill] sm:$0xff] %v5420_v22 }
  0x58   :  { %991 = vmatprep.subr.mxu0 %v5302_v40  ;;  %923 = vmatprep.subr.mxu1 %v5336_v54 }
  0x59   :  { %924 = vmatpush1.msra.mxu1 %v5342_v56 }
  0x5a   :  { %4489 = vmatmul.mubr.msk.f32.gmra.mxu0 %vm122_vm1, %v361_v26  ;;  %4503 = vmatmul.mubr.msk.f32.gmra.mxu1 %vm122_vm1, %v510_v27  ;;  %v5428_v26 = vld [vmem:[#allocation2 + $0x50] sm:$0xff]  ;;  %v5432_v27 = vld [vmem:[#allocation2 + $0x148] sm:$0xff] }
  0x5b   :  { %479 = vmatprep.mubr.f32.mxu0 %v7431_v0  ;;  %628 = vmatprep.mubr.f32.mxu1 %v7431_v0  ;;  %7566 = vst [vmem:[#allocation34_spill] sm:$0xff] %v5428_v26  ;;  %7567 = vst [vmem:[#allocation35_spill] sm:$0xff] %v5432_v27 }
  0x5c   :  { %925 = vmatprep.subr.mxu1 %v5348_v58 }
  0x5d   :  { %926 = vmatpush1.msra.mxu1 %v5354_v60 }
  0x5e   :  { %4490 = vmatmul.mubr.msk.f32.gmra.mxu0 %vm122_vm1, %v363_v30  ;;  %4504 = vmatmul.mubr.msk.f32.gmra.mxu1 %vm122_vm1, %v512_v33  ;;  %v5440_v30 = vld [vmem:[#allocation2 + $0x40] sm:$0xff]  ;;  %v5444_v33 = vld [vmem:[#allocation2 + $0x138] sm:$0xff] }
  0x5f   :  { %747 = vmatprep.mubr.f32.mxu0 %v7431_v0  ;;  %981 = vmatprep.mubr.f32.mxu1 %v7431_v0  ;;  %7570 = vst [vmem:[#allocation38_spill] sm:$0xff] %v5440_v30  ;;  %7571 = vst [vmem:[#allocation39_spill] sm:$0xff] %v5444_v33 }
  0x60   :  { %927 = vmatprep.subr.mxu1 %v5360_v62 }
  0x61   :  { %928 = vmatpush1.msra.mxu1 %v5366_v1 }
  0x62   :  { %4513 = vmatmul.mubr.msk.f32.vlgmr.msra.gmra.mxu0 %vm122_vm1, %v650_v36  ;;  %929 = vmatprep.subr.mxu1 %v5372_v3  ;;  %v5452_v36 = vld [vmem:[#allocation2 + $0x30] sm:$0xff] }
  0x63   :  { %753 = vmatprep.mubr.f32.mxu0 %v7431_v0  ;;  %992 = vmatpush1.msra.mxu0 %v5308_v45  ;;  %7574 = vst [vmem:[#allocation42_spill] sm:$0xff] %v5452_v36 }
  0x64   :  { %993 = vmatprep.subr.mxu0 %v5314_v47  ;;  %930 = vmatpush1.msra.mxu1 %v5378_v5 }
  0x65   :  { %994 = vmatpush1.msra.mxu0 %v5320_v49  ;;  %931 = vmatprep.subr.mxu1 %v5384_v7 }
  0x66   :  { %4514 = vmatmul.mubr.msk.f32.gmra.mxu0 %vm122_vm1, %v652_v17  ;;  %995 = vmatprep.subr.mxu0 %v5326_v51  ;;  %v5458_v17 = vld [vmem:[#allocation2 + $0x28] sm:$0xff] }
  0x67   :  { %759 = vmatprep.mubr.f32.mxu0 %v7431_v0  ;;  %996 = vmatpush1.msra.mxu0 %v5332_v53  ;;  %7576 = vst [vmem:[#allocation44_spill] sm:$0xff] %v5458_v17 }
  0x68   :  { %997 = vmatprep.subr.mxu0 %v5338_v55  ;;  %932 = vmatpush1.msra.mxu1 %v5390_v9 }
  0x69   :  { %998 = vmatpush1.msra.mxu0 %v5344_v57  ;;  %933 = vmatprep.subr.mxu1 %v5396_v11 }
  0x6a   :  { %4515 = vmatmul.mubr.msk.f32.gmra.mxu0 %vm122_vm1, %v654_v38  ;;  %999 = vmatprep.subr.mxu0 %v5350_v59  ;;  %v5464_v38 = vld [vmem:[#allocation2 + $0x20] sm:$0xff] }
  0x6b   :  { %765 = vmatprep.mubr.f32.mxu0 %v7431_v0  ;;  %1000 = vmatpush1.msra.mxu0 %v5356_v61  ;;  %7578 = vst [vmem:[#allocation46_spill] sm:$0xff] %v5464_v38 }
  0x6c   :  { %1001 = vmatprep.subr.mxu0 %v5362_v63  ;;  %934 = vmatpush1.msra.mxu1 %v5402_v13 }
  0x6d   :  { %1002 = vmatpush1.msra.mxu0 %v5368_v2  ;;  %935 = vmatprep.subr.mxu1 %v5408_v15 }
  0x6e   :  { %4516 = vmatmul.mubr.msk.f32.gmra.mxu0 %vm122_vm1, %v657_v41  ;;  %1003 = vmatprep.subr.mxu0 %v5374_v4  ;;  %v5474_v41 = vld [vmem:[#allocation2 + $0x110] sm:$0xff] }
  0x6f   :  { %771 = vmatprep.mubr.f32.mxu0 %v7431_v0  ;;  %1004 = vmatpush1.msra.mxu0 %v5380_v6  ;;  %7581 = vst [vmem:[#allocation49_spill] sm:$0xff] %v5474_v41 }
  0x70   :  { %1005 = vmatprep.subr.mxu0 %v5386_v8  ;;  %936 = vmatpush1.msra.mxu1 %v5414_v19 }
  0x71   :  { %1006 = vmatpush1.msra.mxu0 %v5392_v10  ;;  %937 = vmatprep.subr.mxu1 %v5420_v22 }
  0x72   :  { %4517 = vmatmul.mubr.msk.f32.gmra.mxu0 %vm122_vm1, %v659_v24  ;;  %1007 = vmatprep.subr.mxu0 %v5398_v12  ;;  %v5480_v24 = vld [vmem:[#allocation2 + $0x108] sm:$0xff] }
  0x73   :  { %777 = vmatprep.mubr.f32.mxu0 %v7431_v0  ;;  %1008 = vmatpush1.msra.mxu0 %v5404_v14  ;;  %7583 = vst [vmem:[#allocation51_spill] sm:$0xff] %v5480_v24 }
  0x74   :  { %1009 = vmatprep.subr.mxu0 %v5410_v16  ;;  %938 = vmatpush1.msra.mxu1 %v5426_v25 }
  0x75   :  { %1010 = vmatpush1.msra.mxu0 %v5416_v20  ;;  %939 = vmatprep.subr.mxu1 %v5432_v27 }
  0x76   :  { %4518 = vmatmul.mubr.msk.f32.gmra.mxu0 %vm122_vm1, %v661_v31  ;;  %1011 = vmatprep.subr.mxu0 %v5422_v23  ;;  %v5486_v31 = vld [vmem:[#allocation2 + $0x100] sm:$0xff] }
  0x77   :  { %1055 = vmatprep.mubr.f32.mxu0 %v7431_v0  ;;  %1012 = vmatpush1.msra.mxu0 %v5428_v26  ;;  %7585 = vst [vmem:[#allocation53_spill] sm:$0xff] %v5486_v31  ;;  %v5488_v0 = vld [vmem:[#allocation2] sm:$0xff] }
  0x78   :  { %1013 = vmatprep.subr.mxu0 %v5434_v28  ;;  %940 = vmatpush1.msra.mxu1 %v5438_v29  ;;  %7586 = vst [vmem:[#allocation54_spill] sm:$0xff] %v5488_v0 }
  0x79   :  { %1014 = vmatpush1.msra.mxu0 %v5440_v30  ;;  %941 = vmatprep.subr.mxu1 %v5444_v33 }
  0x7a   :  { %1015 = vmatprep.subr.mxu0 %v5446_v34  ;;  %942 = vmatpush1.msra.mxu1 %v5450_v35 }
  0x7b   :  { %1016 = vmatpush1.msra.mxu0 %v5452_v36  ;;  %943 = vmatprep.subr.mxu1 %v5456_v37 }
  0x7c   :  { %1017 = vmatprep.subr.mxu0 %v5458_v17  ;;  %944 = vmatpush1.msra.mxu1 %v5462_v18 }
  0x7d   :  { %1018 = vmatpush1.msra.mxu0 %v5464_v38  ;;  %945 = vmatprep.subr.mxu1 %v5468_v39 }
  0x7e   :  { %1019 = vmatprep.subr.mxu0 %v5470_v21  ;;  %946 = vmatpush1.msra.mxu1 %v5474_v41 }
  0x7f   :  { %1020 = vmatpush1.msra.mxu0 %v5476_v42  ;;  %947 = vmatprep.subr.mxu1 %v5480_v24 }
  0x80   :  { %1021 = vmatprep.subr.mxu0 %v5482_v43  ;;  %948 = vmatpush1.msra.mxu1 %v5486_v31 }
  0x81   :  { %1022 = vmatpush1.msra.mxu0 %v5488_v0  ;;  %1066 = vmatprep.subr.mxu1 %v5300_v32 }
  0x82   :  { %1137 = vmatprep.subr.mxu0 %v5302_v40 }
  0xf2   :  { %v201_v42 = vpop.f32.mrf.mxu0  ;;  %v314_v41 = vpop.f32.mrf.mxu1 }
  0xf4   :  { %v203_v21 = vpop.f32.mrf.mxu0  ;;  %v316_v39 = vpop.f32.mrf.mxu1 }
  0xf5   :  { %v317_v3 = vadd.f32 %v316_v39, %v203_v21 }
  0xf6   :  { %v207_v38 = vpop.f32.mrf.mxu0  ;;  %v320_v24 = vpop.f32.mrf.mxu1 }
  0xf7   :  { %v321_v18 = vadd.f32 %v320_v24, %v207_v38 }
  0xf8   :  { %v209_v43 = vpop.f32.mrf.mxu0  ;;  %v322_v17 = vpop.f32.mrf.mxu1 }
  0xf9   :  { %v323_v37 = vadd.f32 %v322_v17, %v209_v43 }
  0xfa   :  { %v213_v36 = vpop.f32.mrf.mxu0  ;;  %v326_v35 = vpop.f32.mrf.mxu1 }
  0xfb   :  { %v327_v34 = vadd.f32 %v326_v35, %v213_v36 }
  0xfc   :  { %v215_v31 = vpop.f32.mrf.mxu0  ;;  %v328_v33 = vpop.f32.mrf.mxu1 }
  0xfd   :  { %v329_v0 = vadd.f32 %v328_v33, %v215_v31 }
  0xfe   :  { %v5494_v30 = vpop.f32.mrf.mxu0  ;;  %v332_v32 = vpop.f32.mrf.mxu1 }
  0xff   :  { %v333_v21 = vadd.f32 %v332_v32, %v5494_v30  ;;  %v4519_v32 = vld [vmem:[%s7423_s2] ss:$0 sm:$0xff] }
 0x100   :  { %v221_v40 = vpop.f32.mrf.mxu0  ;;  %v334_v29 = vpop.f32.mrf.mxu1 }
 0x102   :  { %v225_v28 = vpop.f32.mrf.mxu0  ;;  %v338_v27 = vpop.f32.mrf.mxu1 }
 0x103   :  { %v339_v26 = vadd.f32 %v338_v27, %v225_v28 }
 0x104   :  { %v227_v25 = vpop.f32.mrf.mxu0  ;;  %v340_v23 = vpop.f32.mrf.mxu1 }
 0x105   :  { %v341_v38 = vadd.f32 %v340_v23, %v227_v25 }
 0x106   :  { %v231_v24 = vpop.f32.mrf.mxu0  ;;  %v344_v22 = vpop.f32.mrf.mxu1 }
 0x107   :  { %v345_v17 = vadd.f32 %v344_v22, %v231_v24 }
 0x108   :  { %v233_v43 = vpop.f32.mrf.mxu0  ;;  %v346_v20 = vpop.f32.mrf.mxu1 }
 0x109   :  { %v347_v35 = vadd.f32 %v346_v20, %v233_v43 }
 0x10a   :  { %v451_v36 = vpop.f32.mrf.mxu0  ;;  %v600_v19 = vpop.f32.mrf.mxu1 }
 0x10c   :  { %v453_v33 = vpop.f32.mrf.mxu0  ;;  %v602_v31 = vpop.f32.mrf.mxu1 }
 0x10e   :  { %v457_v16 = vpop.f32.mrf.mxu0  ;;  %v606_v15 = vpop.f32.mrf.mxu1 }
 0x10f   :  { %v488_v14 = vadd.f32 %v457_v16, %v321_v18  ;;  %v315_v18 = vadd.f32 %v314_v41, %v201_v42 }
 0x110   :  { %v459_v13 = vpop.f32.mrf.mxu0  ;;  %v608_v12 = vpop.f32.mrf.mxu1 }
 0x111   :  { %v489_v11 = vadd.f32 %v459_v13, %v323_v37  ;;  %v637_v27 = vadd.f32 %v606_v15, %v488_v14  ;;  %v487_v13 = vadd.f32 %v453_v33, %v317_v3  ;;  %v486_v15 = vadd.f32 %v451_v36, %v315_v18 }
 0x112   :  { %v463_v28 = vpop.f32.mrf.mxu0  ;;  %v612_v10 = vpop.f32.mrf.mxu1  ;;  %v335_v3 = vadd.f32 %v334_v29, %v221_v40 }
 0x113   :  { %v490_v23 = vadd.f32 %v463_v28, %v327_v34  ;;  %v638_v25 = vadd.f32 %v608_v12, %v489_v11  ;;  %v636_v28 = vadd.f32 %v602_v31, %v487_v13 }
 0x114   :  { %v465_v9 = vpop.f32.mrf.mxu0  ;;  %v614_v22 = vpop.f32.mrf.mxu1 }
 0x115   :  { %v491_v24 = vadd.f32 %v465_v9, %v329_v0  ;;  %v639_v8 = vadd.f32 %v612_v10, %v490_v23  ;;  %v635_v0 = vadd.f32 %v600_v19, %v486_v15 }
 0x116   :  { %v469_v20 = vpop.f32.mrf.mxu0  ;;  %v618_v37 = vpop.f32.mrf.mxu1 }
 0x117   :  { %v640_v43 = vadd.f32 %v614_v22, %v491_v24  ;;  %v492_v42 = vadd.f32 %v469_v20, %v333_v21 }
 0x118   :  { %v471_v7 = vpop.f32.mrf.mxu0  ;;  %v620_v9 = vpop.f32.mrf.mxu1 }
 0x119   :  { %v641_v15 = vadd.f32 %v618_v37, %v492_v42 }
 0x11a   :  { %v475_v6 = vpop.f32.mrf.mxu0 }
 0x11b   :  { %v494_v5 = vadd.f32 %v475_v6, %v339_v26  ;;  %v624_v26 = vpop.f32.mrf.mxu1 }
 0x11c   :  { %v477_v4 = vpop.f32.mrf.mxu0 }
 0x11d   :  { %v495_v16 = vadd.f32 %v477_v4, %v341_v38  ;;  %v493_v38 = vadd.f32 %v471_v7, %v335_v3  ;;  %v626_v36 = vpop.f32.mrf.mxu1 }
 0x11e   :  { %v481_v2 = vpop.f32.mrf.mxu0 }
 0x11f   :  { %v496_v14 = vadd.f32 %v481_v2, %v345_v17 }
 0x120   :  { %v483_v34 = vpop.f32.mrf.mxu0 }
 0x121   :  { %v497_v11 = vadd.f32 %v483_v34, %v347_v35 }
 0x122   :  { %v749_v12 = vpop.f32.mrf.mxu0 }
 0x123   :  { %v784_v22 = vadd.f32 %v749_v12, %v635_v0  ;;  %v643_v0 = vadd.f32 %v624_v26, %v494_v5 }
 0x124   :  { %v751_v10 = vpop.f32.mrf.mxu0 }
 0x125   :  { %v785_v23 = vadd.f32 %v751_v10, %v636_v28  ;;  %v630_v28 = vpop.f32.mrf.mxu1  ;;  %v644_v10 = vadd.f32 %v626_v36, %v495_v16 }
 0x126   :  { %v755_v24 = vpop.f32.mrf.mxu0 }
 0x127   :  { %v786_v6 = vadd.f32 %v755_v24, %v637_v27  ;;  %v796_v39 = vmax.f32 %v784_v22, %v785_v23  ;;  %v642_v27 = vadd.f32 %v620_v9, %v493_v38  ;;  %v632_v37 = vpop.f32.mrf.mxu1 }
 0x128   :  { %v757_v4 = vpop.f32.mrf.mxu0 }
 0x129   :  { %v787_v2 = vadd.f32 %v757_v4, %v638_v25  ;;  %v805_v19 = vrot.slane %v796_v39, 1 }
 0x12a   :  { %v761_v41 = vpop.f32.mrf.mxu0 }
 0x12b   :  { %v797_v17 = vmax.f32 %v786_v6, %v787_v2  ;;  %v788_v35 = vadd.f32 %v761_v41, %v639_v8  ;;  %v809_v40 = vmax.f32 %v796_v39, %v805_v19  ;;  %v645_v2 = vadd.f32 %v630_v28, %v496_v14 }
 0x12c   :  { %v763_v33 = vpop.f32.mrf.mxu0  ;;  %v646_v39 = vadd.f32 %v632_v37, %v497_v11 }
 0x12d   :  { %v823_v31 = vrot.slane %v797_v17, 1  ;;  %v789_v18 = vadd.f32 %v763_v33, %v640_v43  ;;  %v817_v9 = vadd.f32 %v4519_v32, %v809_v40 }
 0x12e   :  { %v767_v13 = vpop.f32.mrf.mxu0 }
 0x12f   :  { %v827_v34 = vmax.f32 %v797_v17, %v823_v31  ;;  %v798_v12 = vmax.f32 %v788_v35, %v789_v18  ;;  %v790_v8 = vadd.f32 %v767_v13, %v641_v15  ;;  %v5500_v38 = vmax.f32 %v817_v9, 0.0 }
 0x130   :  { %v769_v29 = vpop.f32.mrf.mxu0 }
 0x131   :  { %v829_v7 = vadd.f32 %v4519_v32, %v827_v34  ;;  %v835_v30 = vrot.slane %v798_v12, 1  ;;  %v791_v25 = vadd.f32 %v769_v29, %v642_v27  ;;  %v912_v18 = vrot.slane %v5500_v38, 2 }
 0x132   :  { %v773_v20 = vpop.f32.mrf.mxu0  ;;  %v1208_v27 = vrot.slane %v5500_v38, 6 }
 0x133   :  { %v839_v43 = vmax.f32 %v798_v12, %v835_v30  ;;  %v799_v23 = vmax.f32 %v790_v8, %v791_v25  ;;  %v792_v4 = vadd.f32 %v773_v20, %v643_v0  ;;  %v831_v31 = vmax.f32 %v829_v7, 0.0 }
 0x134   :  { %v775_v22 = vpop.f32.mrf.mxu0 }
 0x135   :  { %v841_v24 = vadd.f32 %v4519_v32, %v839_v43  ;;  %v806_v6 = vrot.slane %v799_v23, 1  ;;  %v793_v21 = vadd.f32 %v775_v22, %v644_v10  ;;  %v1501_v8 = vrot.slane %v831_v31, 2 }
 0x136   :  { %v779_v3 = vpop.f32.mrf.mxu0  ;;  %v1647_v25 = vrot.slane %v831_v31, 4 }
 0x137   :  { %v810_v41 = vmax.f32 %v799_v23, %v806_v6  ;;  %v800_v42 = vmax.f32 %v792_v4, %v793_v21  ;;  %v794_v16 = vadd.f32 %v779_v3, %v645_v2  ;;  %v843_v7 = vmax.f32 %v841_v24, 0.0 }
 0x138   :  { %v781_v17 = vpop.f32.mrf.mxu0  ;;  %v1793_v23 = vrot.slane %v831_v31, 6 }
 0x139   :  { %v818_v35 = vadd.f32 %v4519_v32, %v810_v41  ;;  %v824_v5 = vrot.slane %v800_v42, 1  ;;  %v795_v26 = vadd.f32 %v781_v17, %v646_v39  ;;  %v2630_v4 = vrot.slane %v843_v7, 2 }
 0x13a   :  { %v3251_v21 = vrot.slane %v843_v7, 4 }
 0x13b   :  { %v5502_v36 = vmax.f32 %v818_v35, 0.0  ;;  %v828_v19 = vmax.f32 %v800_v42, %v824_v5  ;;  %v801_v33 = vmax.f32 %v794_v16, %v795_v26  ;;  %v3872_v42 = vrot.slane %v843_v7, 6  ;;  %v7596_v26 = vld [vmem:[#allocation14_spill] sm:$0xff] }
 0x13d   :  { %v830_v13 = vadd.f32 %v4519_v32, %v828_v19  ;;  %v836_v14 = vrot.slane %v801_v33, 1  ;;  %v913_v11 = vrot.slane %v5502_v36, 1  ;;  %v988_v15 = vrot.slane %v5502_v36, 7  ;;  %v7597_v19 = vld [vmem:[#allocation15_spill] sm:$0xff] }
 0x13e   :  { %v1209_v34 = vrot.slane %v5502_v36, 5 }
 0x13f   :  { %v832_v12 = vmax.f32 %v830_v13, 0.0  ;;  %v840_v28 = vmax.f32 %v801_v33, %v836_v14  ;;  %v5510_v40 = vsel %vm914_vm5, %v913_v11, %v912_v18  ;;  %v989_v29 = vsel %vm914_vm5, %v988_v15, %v5500_v38  ;;  %v7598_v33 = vld [vmem:[#allocation16_spill] sm:$0xff]  ;;  %v7600_v18 = vld [vmem:[#allocation18_spill] sm:$0xff]  ;;  %v7601_v13 = vld [vmem:[#allocation19_spill] sm:$0xff] }
 0x140   :  { %982 = vmatmul.mubr.f32.vlgmr.msra.gmra.mxu1 %v5510_v40  ;;  %1056 = vmatmul.mubr.f32.vlgmr.msra.gmra.mxu0 %v989_v29  ;;  %v5516_v30 = vsel %vm914_vm5, %v1209_v34, %v1208_v27  ;;  %v7602_v14 = vld [vmem:[#allocation20_spill] sm:$0xff]  ;;  %v7603_v11 = vld [vmem:[#allocation21_spill] sm:$0xff]  ;;  %v7604_v15 = vld [vmem:[#allocation22_spill] sm:$0xff] }
 0x141   :  { %7587 = vst [vmem:[#allocation55_spill] sm:$0xff] %v5516_v30  ;;  %v842_v20 = vadd.f32 %v4519_v32, %v840_v28  ;;  %1067 = vmatpush1.msra.mxu1 %v5306_v44  ;;  %1138 = vmatpush1.msra.mxu0 %v5308_v45  ;;  %v1356_v0 = vrot.slane %v832_v12, 7  ;;  %v1502_v10 = vrot.slane %v832_v12, 1  ;;  %v1648_v43 = vrot.slane %v832_v12, 3  ;;  %v7605_v27 = vld [vmem:[#allocation23_spill] sm:$0xff]  ;;  %v7606_v34 = vld [vmem:[#allocation24_spill] sm:$0xff] }
 0x142   :  { %1068 = vmatprep.subr.mxu1 %v5312_v46  ;;  %1139 = vmatprep.subr.mxu0 %v5314_v47  ;;  %v1794_v37 = vrot.slane %v832_v12, 5  ;;  %v7607_v12 = vld [vmem:[#allocation25_spill] sm:$0xff]  ;;  %v7608_v28 = vld [vmem:[#allocation26_spill] sm:$0xff]  ;;  %v7609_v29 = vld [vmem:[#allocation27_spill] sm:$0xff] }
 0x143   :  { %v844_v9 = vmax.f32 %v842_v20, 0.0  ;;  %1069 = vmatpush1.msra.mxu1 %v5318_v48  ;;  %1140 = vmatpush1.msra.mxu0 %v5320_v49  ;;  %v5525_v32 = vsel %vm914_vm5, %v1356_v0, %v831_v31  ;;  %v5528_v22 = vsel %vm914_vm5, %v1502_v10, %v1501_v8  ;;  %v5531_v24 = vsel %vm914_vm5, %v1648_v43, %v1647_v25  ;;  %v7599_v31 = vld [vmem:[#allocation17_spill] sm:$0xff]  ;;  %v7612_v25 = vld [vmem:[#allocation30_spill] sm:$0xff]  ;;  %v7613_v20 = vld [vmem:[#allocation31_spill] sm:$0xff] }
 0x144   :  { %7588 = vst [vmem:[#allocation56_spill] sm:$0xff] %v5525_v32  ;;  %7589 = vst [vmem:[#allocation57_spill] sm:$0xff] %v5528_v22  ;;  %1070 = vmatprep.subr.mxu1 %v5324_v50  ;;  %1141 = vmatprep.subr.mxu0 %v5326_v51  ;;  %v5536_v6 = vsel %vm914_vm5, %v1794_v37, %v1793_v23  ;;  %v7611_v8 = vld [vmem:[#allocation29_spill] sm:$0xff]  ;;  %v7614_v0 = vld [vmem:[#allocation32_spill] sm:$0xff] }
 0x145   :  { %7590 = vst [vmem:[#allocation58_spill] sm:$0xff] %v5531_v24  ;;  %7591 = vst [vmem:[#allocation59_spill] sm:$0xff] %v5536_v6  ;;  %1071 = vmatpush1.msra.mxu1 %v5330_v52  ;;  %1142 = vmatpush1.msra.mxu0 %v5332_v53  ;;  %v1941_v3 = vrot.slane %v844_v9, 7  ;;  %v2631_v2 = vrot.slane %v844_v9, 1  ;;  %v3252_v39 = vrot.slane %v844_v9, 3  ;;  %v3873_v41 = vrot.slane %v844_v9, 5 }
 0x146   :  { %1072 = vmatprep.subr.mxu1 %v5336_v54  ;;  %1143 = vmatprep.subr.mxu0 %v5338_v55  ;;  %v7615_v10 = vld [vmem:[#allocation33_spill] sm:$0xff]  ;;  %v7616_v43 = vld [vmem:[#allocation34_spill] sm:$0xff]  ;;  %v7617_v23 = vld [vmem:[#allocation35_spill] sm:$0xff]  ;;  %v1063_v6 = vrot.slane %v5502_v36, 3 }
 0x147   :  { %1073 = vmatpush1.msra.mxu1 %v5342_v56  ;;  %1144 = vmatpush1.msra.mxu0 %v5344_v57  ;;  %v5545_v17 = vsel %vm914_vm5, %v1941_v3, %v843_v7  ;;  %v5548_v35 = vsel %vm914_vm5, %v2631_v2, %v2630_v4  ;;  %v5551_v5 = vsel %vm914_vm5, %v3252_v39, %v3251_v21  ;;  %v7610_v7 = vld [vmem:[#allocation28_spill] sm:$0xff]  ;;  %v7619_v9 = vld [vmem:[#allocation37_spill] sm:$0xff]  ;;  %v7620_v4 = vld [vmem:[#allocation38_spill] sm:$0xff] }
 0x148   :  { %7592 = vst [vmem:[#allocation60_spill] sm:$0xff] %v5545_v17  ;;  %7593 = vst [vmem:[#allocation61_spill] sm:$0xff] %v5548_v35  ;;  %1074 = vmatprep.subr.mxu1 %v5348_v58  ;;  %1145 = vmatprep.subr.mxu0 %v5350_v59  ;;  %v5556_v16 = vsel %vm914_vm5, %v3873_v41, %v3872_v42  ;;  %v7618_v37 = vld [vmem:[#allocation36_spill] sm:$0xff]  ;;  %v7621_v21 = vld [vmem:[#allocation39_spill] sm:$0xff] }
 0x149   :  { %7594 = vst [vmem:[#allocation62_spill] sm:$0xff] %v5551_v5  ;;  %7595 = vst [vmem:[#allocation63_spill] sm:$0xff] %v5556_v16  ;;  %1075 = vmatpush1.msra.mxu1 %v5354_v60  ;;  %1146 = vmatpush1.msra.mxu0 %v5356_v61  ;;  %v7622_v3 = vld [vmem:[#allocation40_spill] sm:$0xff]  ;;  %v7623_v2 = vld [vmem:[#allocation41_spill] sm:$0xff] }
 0x14a   :  { %1076 = vmatprep.subr.mxu1 %v5360_v62  ;;  %1147 = vmatprep.subr.mxu0 %v5362_v63  ;;  %v7624_v39 = vld [vmem:[#allocation42_spill] sm:$0xff]  ;;  %v7625_v41 = vld [vmem:[#allocation43_spill] sm:$0xff]  ;;  %v7626_v42 = vld [vmem:[#allocation44_spill] sm:$0xff] }
 0x14b   :  { %1077 = vmatpush1.msra.mxu1 %v5366_v1  ;;  %1148 = vmatpush1.msra.mxu0 %v7596_v26  ;;  %v7627_v16 = vld [vmem:[#allocation45_spill] sm:$0xff]  ;;  %v7628_v5 = vld [vmem:[#allocation46_spill] sm:$0xff]  ;;  %v7629_v35 = vld [vmem:[#allocation47_spill] sm:$0xff] }
 0x14c   :  { %1078 = vmatprep.subr.mxu1 %v7597_v19  ;;  %1149 = vmatprep.subr.mxu0 %v7598_v33  ;;  %v7630_v17 = vld [vmem:[#allocation48_spill] sm:$0xff]  ;;  %v7631_v24 = vld [vmem:[#allocation49_spill] sm:$0xff]  ;;  %v7632_v22 = vld [vmem:[#allocation50_spill] sm:$0xff] }
 0x14d   :  { %1079 = vmatpush1.msra.mxu1 %v7599_v31  ;;  %1150 = vmatpush1.msra.mxu0 %v7600_v18  ;;  %v7633_v32 = vld [vmem:[#allocation51_spill] sm:$0xff]  ;;  %v7634_v30 = vld [vmem:[#allocation52_spill] sm:$0xff] }
 0x14e   :  { %1080 = vmatprep.subr.mxu1 %v7601_v13  ;;  %1151 = vmatprep.subr.mxu0 %v7602_v14 }
 0x14f   :  { %1081 = vmatpush1.msra.mxu1 %v7603_v11  ;;  %1152 = vmatpush1.msra.mxu0 %v7604_v15 }
 0x150   :  { %1082 = vmatprep.subr.mxu1 %v7605_v27  ;;  %1153 = vmatprep.subr.mxu0 %v7606_v34 }
 0x151   :  { %1083 = vmatpush1.msra.mxu1 %v7607_v12  ;;  %1154 = vmatpush1.msra.mxu0 %v7608_v28 }
 0x152   :  { %1084 = vmatprep.subr.mxu1 %v7609_v29  ;;  %1155 = vmatprep.subr.mxu0 %v7610_v7 }
 0x153   :  { %1085 = vmatpush1.msra.mxu1 %v7611_v8  ;;  %1156 = vmatpush1.msra.mxu0 %v7612_v25 }
 0x154   :  { %1086 = vmatprep.subr.mxu1 %v7613_v20  ;;  %1157 = vmatprep.subr.mxu0 %v7614_v0 }
 0x155   :  { %1087 = vmatpush1.msra.mxu1 %v7615_v10  ;;  %1158 = vmatpush1.msra.mxu0 %v7616_v43 }
 0x156   :  { %1088 = vmatprep.subr.mxu1 %v7617_v23  ;;  %1159 = vmatprep.subr.mxu0 %v7618_v37 }
 0x157   :  { %1089 = vmatpush1.msra.mxu1 %v7619_v9  ;;  %1160 = vmatpush1.msra.mxu0 %v7620_v4 }
 0x158   :  { %1090 = vmatprep.subr.mxu1 %v7621_v21  ;;  %1161 = vmatprep.subr.mxu0 %v7622_v3 }
 0x159   :  { %1091 = vmatpush1.msra.mxu1 %v7623_v2  ;;  %1162 = vmatpush1.msra.mxu0 %v7624_v39 }
 0x15a   :  { %1092 = vmatprep.subr.mxu1 %v7625_v41  ;;  %1163 = vmatprep.subr.mxu0 %v7626_v42  ;;  %v1062_v42 = vrot.slane %v5500_v38, 4  ;;  %v7635_v41 = vld [vmem:[#allocation53_spill] sm:$0xff]  ;;  %v7641_v38 = vld [vmem:[#allocation43_spill] sm:$0xff] }
 0x15b   :  { %1093 = vmatpush1.msra.mxu1 %v7627_v16  ;;  %1164 = vmatpush1.msra.mxu0 %v7628_v5  ;;  %v7636_v16 = vmov 0.0   ;;  %v7637_v5 = vld [vmem:[#allocation54_spill] sm:$0xff] }
 0x15c   :  { %1094 = vmatprep.subr.mxu1 %v7629_v35  ;;  %1165 = vmatprep.subr.mxu0 %v7630_v17  ;;  %v5609_v36 = vsel %vm914_vm5, %v1063_v6, %v1062_v42  ;;  %v7643_v6 = vld [vmem:[#allocation45_spill] sm:$0xff]  ;;  %v7644_v42 = vld [vmem:[#allocation46_spill] sm:$0xff] }
 0x15d   :  { %1095 = vmatpush1.msra.mxu1 %v7631_v24  ;;  %1166 = vmatpush1.msra.mxu0 %v7632_v22  ;;  %7638 = vst [vmem:[#allocation14_spill] sm:$0xff] %v5609_v36 }
 0x15e   :  { %1096 = vmatprep.subr.mxu1 %v7633_v32  ;;  %1167 = vmatprep.subr.mxu0 %v7634_v30  ;;  %v7639_v32 = vld [vmem:[#allocation12_spill] sm:$0xff]  ;;  %v7640_v30 = vld [vmem:[#allocation13_spill] sm:$0xff] }
 0x15f   :  { %1097 = vmatpush1.msra.mxu1 %v7635_v41  ;;  %1130 = vmatprep.mubr.f32.mxu1 %v7636_v16 }
 0x160   :  { %1168 = vmatpush1.msra.mxu0 %v7637_v5  ;;  %1201 = vmatprep.mubr.f32.mxu0 %v7636_v16 }
 0x161   :  { %1131 = vmatmul.mubr.f32.vlgmr.msra.gmra.mxu1 %v5609_v36  ;;  %1202 = vmatmul.mubr.f32.vlgmr.msra.gmra.mxu0 %v5510_v40  ;;  %v7642_v40 = vld [vmem:[#allocation44_spill] sm:$0xff] }
 0x162   :  { %1212 = vmatprep.subr.mxu1 %v7639_v32  ;;  %1283 = vmatprep.subr.mxu0 %v7640_v30 }
 0x163   :  { %1213 = vmatpush1.msra.mxu1 %v5306_v44  ;;  %1284 = vmatpush1.msra.mxu0 %v5308_v45 }
 0x164   :  { %1214 = vmatprep.subr.mxu1 %v5312_v46  ;;  %1285 = vmatprep.subr.mxu0 %v5314_v47 }
 0x165   :  { %1215 = vmatpush1.msra.mxu1 %v5318_v48  ;;  %1286 = vmatpush1.msra.mxu0 %v5320_v49 }
 0x166   :  { %1216 = vmatprep.subr.mxu1 %v5324_v50  ;;  %1287 = vmatprep.subr.mxu0 %v5326_v51 }
 0x167   :  { %1217 = vmatpush1.msra.mxu1 %v5330_v52  ;;  %1288 = vmatpush1.msra.mxu0 %v5332_v53 }
 0x168   :  { %1218 = vmatprep.subr.mxu1 %v5336_v54  ;;  %1289 = vmatprep.subr.mxu0 %v5338_v55 }
 0x169   :  { %1219 = vmatpush1.msra.mxu1 %v5342_v56  ;;  %1290 = vmatpush1.msra.mxu0 %v5344_v57 }
 0x16a   :  { %1220 = vmatprep.subr.mxu1 %v5348_v58  ;;  %1291 = vmatprep.subr.mxu0 %v5350_v59 }
 0x16b   :  { %1221 = vmatpush1.msra.mxu1 %v5354_v60  ;;  %1292 = vmatpush1.msra.mxu0 %v5356_v61 }
 0x16c   :  { %1222 = vmatprep.subr.mxu1 %v5360_v62  ;;  %1293 = vmatprep.subr.mxu0 %v5362_v63 }
 0x16d   :  { %1223 = vmatpush1.msra.mxu1 %v5366_v1  ;;  %1294 = vmatpush1.msra.mxu0 %v7596_v26 }
 0x16e   :  { %1224 = vmatprep.subr.mxu1 %v7597_v19  ;;  %1295 = vmatprep.subr.mxu0 %v7598_v33 }
 0x16f   :  { %1225 = vmatpush1.msra.mxu1 %v7599_v31  ;;  %1296 = vmatpush1.msra.mxu0 %v7600_v18 }
 0x170   :  { %1226 = vmatprep.subr.mxu1 %v7601_v13  ;;  %1297 = vmatprep.subr.mxu0 %v7602_v14 }
 0x171   :  { %1227 = vmatpush1.msra.mxu1 %v7603_v11  ;;  %1298 = vmatpush1.msra.mxu0 %v7604_v15 }
 0x172   :  { %1228 = vmatprep.subr.mxu1 %v7605_v27  ;;  %1299 = vmatprep.subr.mxu0 %v7606_v34 }
 0x173   :  { %1229 = vmatpush1.msra.mxu1 %v7607_v12  ;;  %1300 = vmatpush1.msra.mxu0 %v7608_v28 }
 0x174   :  { %1230 = vmatprep.subr.mxu1 %v7609_v29  ;;  %1301 = vmatprep.subr.mxu0 %v7610_v7 }
 0x175   :  { %1231 = vmatpush1.msra.mxu1 %v7611_v8  ;;  %1302 = vmatpush1.msra.mxu0 %v7612_v25 }
 0x176   :  { %1232 = vmatprep.subr.mxu1 %v7613_v20  ;;  %1303 = vmatprep.subr.mxu0 %v7614_v0 }
 0x177   :  { %1233 = vmatpush1.msra.mxu1 %v7615_v10  ;;  %1304 = vmatpush1.msra.mxu0 %v7616_v43 }
 0x178   :  { %1234 = vmatprep.subr.mxu1 %v7617_v23  ;;  %1305 = vmatprep.subr.mxu0 %v7618_v37 }
 0x179   :  { %1235 = vmatpush1.msra.mxu1 %v7619_v9  ;;  %1306 = vmatpush1.msra.mxu0 %v7620_v4 }
 0x17a   :  { %1236 = vmatprep.subr.mxu1 %v7621_v21  ;;  %1307 = vmatprep.subr.mxu0 %v7622_v3  ;;  %v7645_v3 = vld [vmem:[#allocation51_spill] sm:$0xff] }
 0x17b   :  { %1237 = vmatpush1.msra.mxu1 %v7623_v2  ;;  %1308 = vmatpush1.msra.mxu0 %v7624_v39  ;;  %v7646_v2 = vld [vmem:[#allocation52_spill] sm:$0xff] }
 0x17c   :  { %1238 = vmatprep.subr.mxu1 %v7641_v38  ;;  %1309 = vmatprep.subr.mxu0 %v7642_v40 }
 0x17d   :  { %1239 = vmatpush1.msra.mxu1 %v7643_v6  ;;  %1310 = vmatpush1.msra.mxu0 %v7644_v42  ;;  %v7647_v42 = vld [vmem:[#allocation55_spill] sm:$0xff] }
 0x17e   :  { %1240 = vmatprep.subr.mxu1 %v7629_v35  ;;  %1311 = vmatprep.subr.mxu0 %v7630_v17 }
 0x17f   :  { %1241 = vmatpush1.msra.mxu1 %v7631_v24  ;;  %1312 = vmatpush1.msra.mxu0 %v7632_v22 }
 0x180   :  { %1242 = vmatprep.subr.mxu1 %v7645_v3  ;;  %1313 = vmatprep.subr.mxu0 %v7646_v2 }
 0x181   :  { %1243 = vmatpush1.msra.mxu1 %v7635_v41  ;;  %1276 = vmatprep.mubr.f32.mxu1 %v7636_v16 }
 0x182   :  { %1314 = vmatpush1.msra.mxu0 %v7637_v5  ;;  %1347 = vmatprep.mubr.f32.mxu0 %v7636_v16 }
 0x183   :  { %1277 = vmatmul.mubr.f32.vlgmr.msra.gmra.mxu1 %v7647_v42  ;;  %1348 = vmatmul.mubr.f32.vlgmr.msra.gmra.mxu0 %v5609_v36  ;;  %v7648_v36 = vld [vmem:[#allocation40_spill] sm:$0xff] }
 0x184   :  { %1359 = vmatprep.subr.mxu1 %v7639_v32  ;;  %1430 = vmatprep.subr.mxu0 %v7640_v30 }
 0x185   :  { %1360 = vmatpush1.msra.mxu1 %v5306_v44  ;;  %1431 = vmatpush1.msra.mxu0 %v5308_v45 }
 0x186   :  { %1361 = vmatprep.subr.mxu1 %v5312_v46  ;;  %1432 = vmatprep.subr.mxu0 %v5314_v47 }
 0x187   :  { %1362 = vmatpush1.msra.mxu1 %v5318_v48  ;;  %1433 = vmatpush1.msra.mxu0 %v5320_v49 }
 0x188   :  { %1363 = vmatprep.subr.mxu1 %v5324_v50  ;;  %1434 = vmatprep.subr.mxu0 %v5326_v51 }
 0x189   :  { %1364 = vmatpush1.msra.mxu1 %v5330_v52  ;;  %1435 = vmatpush1.msra.mxu0 %v5332_v53 }
 0x18a   :  { %1365 = vmatprep.subr.mxu1 %v5336_v54  ;;  %1436 = vmatprep.subr.mxu0 %v5338_v55 }
 0x18b   :  { %1366 = vmatpush1.msra.mxu1 %v5342_v56  ;;  %1437 = vmatpush1.msra.mxu0 %v5344_v57 }
 0x18c   :  { %1367 = vmatprep.subr.mxu1 %v5348_v58  ;;  %1438 = vmatprep.subr.mxu0 %v5350_v59 }
 0x18d   :  { %1368 = vmatpush1.msra.mxu1 %v5354_v60  ;;  %1439 = vmatpush1.msra.mxu0 %v5356_v61 }
 0x18e   :  { %1369 = vmatprep.subr.mxu1 %v5360_v62  ;;  %1440 = vmatprep.subr.mxu0 %v5362_v63 }
 0x18f   :  { %1370 = vmatpush1.msra.mxu1 %v5366_v1  ;;  %1441 = vmatpush1.msra.mxu0 %v7596_v26 }
 0x190   :  { %1371 = vmatprep.subr.mxu1 %v7597_v19  ;;  %1442 = vmatprep.subr.mxu0 %v7598_v33 }
 0x191   :  { %1372 = vmatpush1.msra.mxu1 %v7599_v31  ;;  %1443 = vmatpush1.msra.mxu0 %v7600_v18 }
 0x192   :  { %1373 = vmatprep.subr.mxu1 %v7601_v13  ;;  %1444 = vmatprep.subr.mxu0 %v7602_v14 }
 0x193   :  { %1374 = vmatpush1.msra.mxu1 %v7603_v11  ;;  %1445 = vmatpush1.msra.mxu0 %v7604_v15 }
 0x194   :  { %1375 = vmatprep.subr.mxu1 %v7605_v27  ;;  %1446 = vmatprep.subr.mxu0 %v7606_v34 }
 0x195   :  { %1376 = vmatpush1.msra.mxu1 %v7607_v12  ;;  %1447 = vmatpush1.msra.mxu0 %v7608_v28 }
 0x196   :  { %1377 = vmatprep.subr.mxu1 %v7609_v29  ;;  %1448 = vmatprep.subr.mxu0 %v7610_v7 }
 0x197   :  { %1378 = vmatpush1.msra.mxu1 %v7611_v8  ;;  %1449 = vmatpush1.msra.mxu0 %v7612_v25  ;;  %v7649_v25 = vld [vmem:[#allocation41_spill] sm:$0xff] }
 0x198   :  { %1379 = vmatprep.subr.mxu1 %v7613_v20  ;;  %1450 = vmatprep.subr.mxu0 %v7614_v0 }
 0x199   :  { %1380 = vmatpush1.msra.mxu1 %v7615_v10  ;;  %1451 = vmatpush1.msra.mxu0 %v7616_v43 }
 0x19a   :  { %1381 = vmatprep.subr.mxu1 %v7617_v23  ;;  %1452 = vmatprep.subr.mxu0 %v7618_v37  ;;  %v7650_v23 = vld [vmem:[#allocation46_spill] sm:$0xff] }
 0x19b   :  { %1382 = vmatpush1.msra.mxu1 %v7619_v9  ;;  %1453 = vmatpush1.msra.mxu0 %v7620_v4 }
 0x19c   :  { %1383 = vmatprep.subr.mxu1 %v7621_v21  ;;  %1454 = vmatprep.subr.mxu0 %v7648_v36 }
 0x19d   :  { %1384 = vmatpush1.msra.mxu1 %v7649_v25  ;;  %1455 = vmatpush1.msra.mxu0 %v7624_v39 }
 0x19e   :  { %1385 = vmatprep.subr.mxu1 %v7641_v38  ;;  %1456 = vmatprep.subr.mxu0 %v7642_v40 }
 0x19f   :  { %1386 = vmatpush1.msra.mxu1 %v7643_v6  ;;  %1457 = vmatpush1.msra.mxu0 %v7650_v23  ;;  %v7651_v23 = vld [vmem:[#allocation56_spill] sm:$0xff] }
 0x1a0   :  { %1387 = vmatprep.subr.mxu1 %v7629_v35  ;;  %1458 = vmatprep.subr.mxu0 %v7630_v17 }
 0x1a1   :  { %1388 = vmatpush1.msra.mxu1 %v7631_v24  ;;  %1459 = vmatpush1.msra.mxu0 %v7632_v22 }
 0x1a2   :  { %1389 = vmatprep.subr.mxu1 %v7645_v3  ;;  %1460 = vmatprep.subr.mxu0 %v7646_v2 }
 0x1a3   :  { %1390 = vmatpush1.msra.mxu1 %v7635_v41  ;;  %1423 = vmatprep.mubr.f32.mxu1 %v7636_v16 }
 0x1a4   :  { %1461 = vmatpush1.msra.mxu0 %v7637_v5  ;;  %1494 = vmatprep.mubr.f32.mxu0 %v7636_v16 }
 0x1a5   :  { %1424 = vmatmul.mubr.f32.vlgmr.msra.gmra.mxu1 %v7651_v23  ;;  %1495 = vmatmul.mubr.f32.vlgmr.msra.gmra.mxu0 %v7647_v42  ;;  %v6000_v42 = vld [vmem:[#allocation2 + $0x8] sm:$0xff] }
 0x1a6   :  { %1505 = vmatprep.subr.mxu1 %v7639_v32  ;;  %1576 = vmatprep.subr.mxu0 %v7640_v30  ;;  %v5868_v30 = vld [vmem:[#allocation2 + $0xb8] sm:$0xff]  ;;  %v5871_v32 = vld [vmem:[#allocation2 + $0x1b0] sm:$0xff] }
 0x1a7   :  { %1506 = vmatpush1.msra.mxu1 %v5306_v44  ;;  %1577 = vmatpush1.msra.mxu0 %v5308_v45  ;;  %v7652_v44 = vld [vmem:[#allocation30_spill] sm:$0xff]  ;;  %v7653_v45 = vld [vmem:[#allocation35_spill] sm:$0xff] }
 0x1a8   :  { %1507 = vmatprep.subr.mxu1 %v5312_v46  ;;  %1578 = vmatprep.subr.mxu0 %v5314_v47  ;;  %v7654_v46 = vld [vmem:[#allocation46_spill] sm:$0xff]  ;;  %v7655_v47 = vld [vmem:[#allocation57_spill] sm:$0xff] }
 0x1a9   :  { %1508 = vmatpush1.msra.mxu1 %v5318_v48  ;;  %1579 = vmatpush1.msra.mxu0 %v5320_v49  ;;  %v5817_v48 = vld [vmem:[#allocation2 + $0x1f8] sm:$0xff] }
 0x1aa   :  { %1509 = vmatprep.subr.mxu1 %v5324_v50  ;;  %1580 = vmatprep.subr.mxu0 %v5326_v51  ;;  %v5820_v49 = vld [vmem:[#allocation2 + $0xf8] sm:$0xff]  ;;  %v5823_v50 = vld [vmem:[#allocation2 + $0x1f0] sm:$0xff] }
 0x1ab   :  { %1510 = vmatpush1.msra.mxu1 %v5330_v52  ;;  %1581 = vmatpush1.msra.mxu0 %v5332_v53  ;;  %v5826_v51 = vld [vmem:[#allocation2 + $0xf0] sm:$0xff]  ;;  %v5829_v52 = vld [vmem:[#allocation2 + $0x1e8] sm:$0xff] }
 0x1ac   :  { %1511 = vmatprep.subr.mxu1 %v5336_v54  ;;  %1582 = vmatprep.subr.mxu0 %v5338_v55  ;;  %v5832_v53 = vld [vmem:[#allocation2 + $0xe8] sm:$0xff]  ;;  %v5835_v54 = vld [vmem:[#allocation2 + $0x1e0] sm:$0xff] }
 0x1ad   :  { %1512 = vmatpush1.msra.mxu1 %v5342_v56  ;;  %1583 = vmatpush1.msra.mxu0 %v5344_v57  ;;  %v5838_v55 = vld [vmem:[#allocation2 + $0xe0] sm:$0xff]  ;;  %v5841_v56 = vld [vmem:[#allocation2 + $0x1d8] sm:$0xff] }
 0x1ae   :  { %1513 = vmatprep.subr.mxu1 %v5348_v58  ;;  %1584 = vmatprep.subr.mxu0 %v5350_v59  ;;  %v5844_v57 = vld [vmem:[#allocation2 + $0xd8] sm:$0xff]  ;;  %v5847_v58 = vld [vmem:[#allocation2 + $0x1d0] sm:$0xff] }
 0x1af   :  { %1514 = vmatpush1.msra.mxu1 %v5354_v60  ;;  %1585 = vmatpush1.msra.mxu0 %v5356_v61  ;;  %v5850_v59 = vld [vmem:[#allocation2 + $0xd0] sm:$0xff]  ;;  %v5853_v60 = vld [vmem:[#allocation2 + $0x1c8] sm:$0xff] }
 0x1b0   :  { %1515 = vmatprep.subr.mxu1 %v5360_v62  ;;  %1586 = vmatprep.subr.mxu0 %v5362_v63  ;;  %v5856_v61 = vld [vmem:[#allocation2 + $0xc8] sm:$0xff]  ;;  %v5859_v62 = vld [vmem:[#allocation2 + $0x1c0] sm:$0xff] }
 0x1b1   :  { %1516 = vmatpush1.msra.mxu1 %v5366_v1  ;;  %1587 = vmatpush1.msra.mxu0 %v7596_v26  ;;  %v5862_v63 = vld [vmem:[#allocation2 + $0xc0] sm:$0xff]  ;;  %v5865_v1 = vld [vmem:[#allocation2 + $0x1b8] sm:$0xff] }
 0x1b2   :  { %1517 = vmatprep.subr.mxu1 %v7597_v19  ;;  %1588 = vmatprep.subr.mxu0 %v7598_v33  ;;  %v5889_v26 = vld [vmem:[#allocation2 + $0x198] sm:$0xff]  ;;  %v5895_v33 = vld [vmem:[#allocation2 + $0x190] sm:$0xff] }
 0x1b3   :  { %1518 = vmatpush1.msra.mxu1 %v7599_v31  ;;  %1589 = vmatpush1.msra.mxu0 %v7600_v18  ;;  %v5892_v19 = vld [vmem:[#allocation2 + $0x98] sm:$0xff]  ;;  %v5898_v31 = vld [vmem:[#allocation2 + $0x90] sm:$0xff]  ;;  %v5901_v18 = vld [vmem:[#allocation2 + $0x188] sm:$0xff] }
 0x1b4   :  { %1519 = vmatprep.subr.mxu1 %v7601_v13  ;;  %1590 = vmatprep.subr.mxu0 %v7602_v14  ;;  %v5904_v13 = vld [vmem:[#allocation2 + $0x88] sm:$0xff]  ;;  %v5907_v14 = vld [vmem:[#allocation2 + $0x180] sm:$0xff] }
 0x1b5   :  { %1520 = vmatpush1.msra.mxu1 %v7603_v11  ;;  %1591 = vmatpush1.msra.mxu0 %v7604_v15  ;;  %v5910_v11 = vld [vmem:[#allocation2 + $0x80] sm:$0xff]  ;;  %v5913_v15 = vld [vmem:[#allocation2 + $0x178] sm:$0xff] }
 0x1b6   :  { %1521 = vmatprep.subr.mxu1 %v7605_v27  ;;  %1592 = vmatprep.subr.mxu0 %v7606_v34  ;;  %v5916_v27 = vld [vmem:[#allocation2 + $0x78] sm:$0xff]  ;;  %v5919_v34 = vld [vmem:[#allocation2 + $0x170] sm:$0xff] }
 0x1b7   :  { %1522 = vmatpush1.msra.mxu1 %v7607_v12  ;;  %1593 = vmatpush1.msra.mxu0 %v7608_v28  ;;  %v5922_v12 = vld [vmem:[#allocation2 + $0x70] sm:$0xff]  ;;  %v5925_v28 = vld [vmem:[#allocation2 + $0x168] sm:$0xff] }
 0x1b8   :  { %1523 = vmatprep.subr.mxu1 %v7609_v29  ;;  %1594 = vmatprep.subr.mxu0 %v7610_v7  ;;  %v5928_v29 = vld [vmem:[#allocation2 + $0x68] sm:$0xff]  ;;  %v5931_v7 = vld [vmem:[#allocation2 + $0x160] sm:$0xff] }
 0x1b9   :  { %1524 = vmatpush1.msra.mxu1 %v7611_v8  ;;  %1595 = vmatpush1.msra.mxu0 %v7652_v44  ;;  %v5934_v8 = vld [vmem:[#allocation2 + $0x60] sm:$0xff]  ;;  %v5988_v44 = vld [vmem:[#allocation2 + $0x18] sm:$0xff] }
 0x1ba   :  { %1525 = vmatprep.subr.mxu1 %v7613_v20  ;;  %1596 = vmatprep.subr.mxu0 %v7614_v0  ;;  %v5940_v20 = vld [vmem:[#allocation2 + $0x58] sm:$0xff]  ;;  %v5943_v0 = vld [vmem:[#allocation2 + $0x150] sm:$0xff]  ;;  %7660 = vst [vmem:[#allocation19_spill] sm:$0xff] %v5988_v44 }
 0x1bb   :  { %1526 = vmatpush1.msra.mxu1 %v7615_v10  ;;  %1597 = vmatpush1.msra.mxu0 %v7616_v43  ;;  %v5946_v10 = vld [vmem:[#allocation2 + $0x50] sm:$0xff]  ;;  %v5949_v43 = vld [vmem:[#allocation2 + $0x148] sm:$0xff] }
 0x1bc   :  { %1527 = vmatprep.subr.mxu1 %v7653_v45  ;;  %1598 = vmatprep.subr.mxu0 %v7618_v37  ;;  %v5952_v37 = vld [vmem:[#allocation2 + $0x48] sm:$0xff]  ;;  %v5991_v45 = vld [vmem:[#allocation2 + $0x110] sm:$0xff] }
 0x1bd   :  { %1528 = vmatpush1.msra.mxu1 %v7619_v9  ;;  %1599 = vmatpush1.msra.mxu0 %v7620_v4  ;;  %v5955_v9 = vld [vmem:[#allocation2 + $0x140] sm:$0xff] }
 0x1be   :  { %1529 = vmatprep.subr.mxu1 %v7621_v21  ;;  %1600 = vmatprep.subr.mxu0 %v7648_v36  ;;  %7656 = vst [vmem:[#allocation15_spill] sm:$0xff] %v5955_v9  ;;  %v5958_v4 = vld [vmem:[#allocation2 + $0x40] sm:$0xff]  ;;  %v5961_v21 = vld [vmem:[#allocation2 + $0x138] sm:$0xff]  ;;  %v5976_v36 = vld [vmem:[#allocation2 + $0x28] sm:$0xff] }
 0x1bf   :  { %1530 = vmatpush1.msra.mxu1 %v7649_v25  ;;  %1601 = vmatpush1.msra.mxu0 %v7624_v39  ;;  %v5937_v25 = vld [vmem:[#allocation2 + $0x158] sm:$0xff]  ;;  %7657 = vst [vmem:[#allocation16_spill] sm:$0xff] %v5961_v21  ;;  %v5970_v39 = vld [vmem:[#allocation2 + $0x30] sm:$0xff] }
 0x1c0   :  { %1531 = vmatprep.subr.mxu1 %v7641_v38  ;;  %1602 = vmatprep.subr.mxu0 %v7642_v40  ;;  %v5979_v38 = vld [vmem:[#allocation2 + $0x120] sm:$0xff] }
 0x1c1   :  { %1532 = vmatpush1.msra.mxu1 %v7643_v6  ;;  %1603 = vmatpush1.msra.mxu0 %v7654_v46  ;;  %v5982_v40 = vld [vmem:[#allocation2 + $0x20] sm:$0xff]  ;;  %v5985_v6 = vld [vmem:[#allocation2 + $0x118] sm:$0xff]  ;;  %v5994_v46 = vld [vmem:[#allocation2 + $0x10] sm:$0xff] }
 0x1c2   :  { %1533 = vmatprep.subr.mxu1 %v7629_v35  ;;  %1604 = vmatprep.subr.mxu0 %v7630_v17  ;;  %v5880_v17 = vld [vmem:[#allocation2 + $0xa8] sm:$0xff]  ;;  %v5883_v35 = vld [vmem:[#allocation2 + $0x1a0] sm:$0xff]  ;;  %7658 = vst [vmem:[#allocation17_spill] sm:$0xff] %v5982_v40  ;;  %7659 = vst [vmem:[#allocation18_spill] sm:$0xff] %v5985_v6 }
 0x1c3   :  { %1534 = vmatpush1.msra.mxu1 %v7631_v24  ;;  %1605 = vmatpush1.msra.mxu0 %v7632_v22  ;;  %v5874_v22 = vld [vmem:[#allocation2 + $0xb0] sm:$0xff]  ;;  %v5877_v24 = vld [vmem:[#allocation2 + $0x1a8] sm:$0xff]  ;;  %7661 = vst [vmem:[#allocation20_spill] sm:$0xff] %v5994_v46 }
 0x1c4   :  { %1535 = vmatprep.subr.mxu1 %v7645_v3  ;;  %1606 = vmatprep.subr.mxu0 %v7646_v2  ;;  %v5964_v3 = vld [vmem:[#allocation2 + $0x38] sm:$0xff]  ;;  %v5967_v2 = vld [vmem:[#allocation2 + $0x130] sm:$0xff] }
 0x1c5   :  { %1536 = vmatpush1.msra.mxu1 %v7635_v41  ;;  %1569 = vmatprep.mubr.f32.mxu1 %v7636_v16  ;;  %v5973_v41 = vld [vmem:[#allocation2 + $0x128] sm:$0xff] }
 0x1c6   :  { %1607 = vmatpush1.msra.mxu0 %v7637_v5  ;;  %1640 = vmatprep.mubr.f32.mxu0 %v7636_v16  ;;  %v5886_v5 = vld [vmem:[#allocation2 + $0xa0] sm:$0xff] }
 0x1c7   :  { %1570 = vmatmul.mubr.f32.vlgmr.msra.gmra.mxu1 %v7655_v47  ;;  %1641 = vmatmul.mubr.f32.vlgmr.msra.gmra.mxu0 %v7651_v23  ;;  %v5997_v23 = vld [vmem:[#allocation2 + $0x108] sm:$0xff] }
 0x1c8   :  { %1651 = vmatprep.subr.mxu1 %v5817_v48  ;;  %1722 = vmatprep.subr.mxu0 %v5820_v49 }
 0x1c9   :  { %1652 = vmatpush1.msra.mxu1 %v5823_v50  ;;  %1723 = vmatpush1.msra.mxu0 %v5826_v51 }
 0x1ca   :  { %1653 = vmatprep.subr.mxu1 %v5829_v52  ;;  %1724 = vmatprep.subr.mxu0 %v5832_v53 }
 0x1cb   :  { %1654 = vmatpush1.msra.mxu1 %v5835_v54  ;;  %1725 = vmatpush1.msra.mxu0 %v5838_v55 }
 0x1cc   :  { %1655 = vmatprep.subr.mxu1 %v5841_v56  ;;  %1726 = vmatprep.subr.mxu0 %v5844_v57 }
 0x1cd   :  { %1656 = vmatpush1.msra.mxu1 %v5847_v58  ;;  %1727 = vmatpush1.msra.mxu0 %v5850_v59 }
 0x1ce   :  { %1657 = vmatprep.subr.mxu1 %v5853_v60  ;;  %1728 = vmatprep.subr.mxu0 %v5856_v61 }
 0x1cf   :  { %1658 = vmatpush1.msra.mxu1 %v5859_v62  ;;  %1729 = vmatpush1.msra.mxu0 %v5862_v63 }
 0x1d0   :  { %1659 = vmatprep.subr.mxu1 %v5865_v1  ;;  %1730 = vmatprep.subr.mxu0 %v5868_v30 }
 0x1d1   :  { %1660 = vmatpush1.msra.mxu1 %v5871_v32  ;;  %1731 = vmatpush1.msra.mxu0 %v5874_v22 }
 0x1d2   :  { %1661 = vmatprep.subr.mxu1 %v5877_v24  ;;  %1732 = vmatprep.subr.mxu0 %v5880_v17 }
 0x1d3   :  { %1662 = vmatpush1.msra.mxu1 %v5883_v35  ;;  %1733 = vmatpush1.msra.mxu0 %v5886_v5 }
 0x1d4   :  { %1663 = vmatprep.subr.mxu1 %v5889_v26  ;;  %1734 = vmatprep.subr.mxu0 %v5892_v19 }
 0x1d5   :  { %1664 = vmatpush1.msra.mxu1 %v5895_v33  ;;  %1735 = vmatpush1.msra.mxu0 %v5898_v31 }
 0x1d6   :  { %1665 = vmatprep.subr.mxu1 %v5901_v18  ;;  %1736 = vmatprep.subr.mxu0 %v5904_v13 }
 0x1d7   :  { %1666 = vmatpush1.msra.mxu1 %v5907_v14  ;;  %1737 = vmatpush1.msra.mxu0 %v5910_v11 }
 0x1d8   :  { %1667 = vmatprep.subr.mxu1 %v5913_v15  ;;  %1738 = vmatprep.subr.mxu0 %v5916_v27 }
 0x1d9   :  { %1668 = vmatpush1.msra.mxu1 %v5919_v34  ;;  %1739 = vmatpush1.msra.mxu0 %v5922_v12 }
 0x1da   :  { %1669 = vmatprep.subr.mxu1 %v5925_v28  ;;  %1740 = vmatprep.subr.mxu0 %v5928_v29 }
 0x1db   :  { %1670 = vmatpush1.msra.mxu1 %v5931_v7  ;;  %1741 = vmatpush1.msra.mxu0 %v5934_v8 }
 0x1dc   :  { %1671 = vmatprep.subr.mxu1 %v5937_v25  ;;  %1742 = vmatprep.subr.mxu0 %v5940_v20 }
 0x1dd   :  { %1672 = vmatpush1.msra.mxu1 %v5943_v0  ;;  %1743 = vmatpush1.msra.mxu0 %v5946_v10 }
 0x1de   :  { %1673 = vmatprep.subr.mxu1 %v5949_v43  ;;  %1744 = vmatprep.subr.mxu0 %v5952_v37 }
 0x1df   :  { %1674 = vmatpush1.msra.mxu1 %v5955_v9  ;;  %1745 = vmatpush1.msra.mxu0 %v5958_v4 }
 0x1e0   :  { %1675 = vmatprep.subr.mxu1 %v5961_v21  ;;  %1746 = vmatprep.subr.mxu0 %v5964_v3 }
 0x1e1   :  { %1676 = vmatpush1.msra.mxu1 %v5967_v2  ;;  %1747 = vmatpush1.msra.mxu0 %v5970_v39 }
 0x1e2   :  { %1677 = vmatprep.subr.mxu1 %v5973_v41  ;;  %1748 = vmatprep.subr.mxu0 %v5976_v36 }
 0x1e3   :  { %1678 = vmatpush1.msra.mxu1 %v5979_v38  ;;  %1749 = vmatpush1.msra.mxu0 %v5982_v40 }
 0x1e4   :  { %1679 = vmatprep.subr.mxu1 %v5985_v6  ;;  %1750 = vmatprep.subr.mxu0 %v5988_v44  ;;  %v6003_v6 = vld [vmem:[#allocation2 + $0x100] sm:$0xff] }
 0x1e5   :  { %1680 = vmatpush1.msra.mxu1 %v5991_v45  ;;  %1751 = vmatpush1.msra.mxu0 %v5994_v46  ;;  %v6007_v44 = vld [vmem:[#allocation2] sm:$0xff]  ;;  %v7662_v46 = vld [vmem:[#allocation58_spill] sm:$0xff] }
 0x1e6   :  { %1681 = vmatprep.subr.mxu1 %v5997_v23  ;;  %1752 = vmatprep.subr.mxu0 %v6000_v42 }
 0x1e7   :  { %1682 = vmatpush1.msra.mxu1 %v6003_v6  ;;  %1715 = vmatprep.mubr.f32.mxu1 %v7636_v16 }
 0x1e8   :  { %1753 = vmatpush1.msra.mxu0 %v6007_v44  ;;  %1786 = vmatprep.mubr.f32.mxu0 %v7636_v16 }
 0x1e9   :  { %1716 = vmatmul.mubr.f32.vlgmr.msra.gmra.mxu1 %v7662_v46  ;;  %1787 = vmatmul.mubr.f32.vlgmr.msra.gmra.mxu0 %v7655_v47  ;;  %v7663_v47 = vld [vmem:[#allocation18_spill] sm:$0xff] }
 0x1ea   :  { %1797 = vmatprep.subr.mxu1 %v5817_v48  ;;  %1868 = vmatprep.subr.mxu0 %v5820_v49 }
 0x1eb   :  { %1798 = vmatpush1.msra.mxu1 %v5823_v50  ;;  %1869 = vmatpush1.msra.mxu0 %v5826_v51 }
 0x1ec   :  { %1799 = vmatprep.subr.mxu1 %v5829_v52  ;;  %1870 = vmatprep.subr.mxu0 %v5832_v53 }
 0x1ed   :  { %1800 = vmatpush1.msra.mxu1 %v5835_v54  ;;  %1871 = vmatpush1.msra.mxu0 %v5838_v55 }
 0x1ee   :  { %1801 = vmatprep.subr.mxu1 %v5841_v56  ;;  %1872 = vmatprep.subr.mxu0 %v5844_v57 }
 0x1ef   :  { %1802 = vmatpush1.msra.mxu1 %v5847_v58  ;;  %1873 = vmatpush1.msra.mxu0 %v5850_v59 }
 0x1f0   :  { %1803 = vmatprep.subr.mxu1 %v5853_v60  ;;  %1874 = vmatprep.subr.mxu0 %v5856_v61 }
 0x1f1   :  { %1804 = vmatpush1.msra.mxu1 %v5859_v62  ;;  %1875 = vmatpush1.msra.mxu0 %v5862_v63 }
 0x1f2   :  { %1805 = vmatprep.subr.mxu1 %v5865_v1  ;;  %1876 = vmatprep.subr.mxu0 %v5868_v30 }
 0x1f3   :  { %1806 = vmatpush1.msra.mxu1 %v5871_v32  ;;  %1877 = vmatpush1.msra.mxu0 %v5874_v22 }
 0x1f4   :  { %1807 = vmatprep.subr.mxu1 %v5877_v24  ;;  %1878 = vmatprep.subr.mxu0 %v5880_v17 }
 0x1f5   :  { %1808 = vmatpush1.msra.mxu1 %v5883_v35  ;;  %1879 = vmatpush1.msra.mxu0 %v5886_v5 }
 0x1f6   :  { %1809 = vmatprep.subr.mxu1 %v5889_v26  ;;  %1880 = vmatprep.subr.mxu0 %v5892_v19 }
 0x1f7   :  { %1810 = vmatpush1.msra.mxu1 %v5895_v33  ;;  %1881 = vmatpush1.msra.mxu0 %v5898_v31 }
 0x1f8   :  { %1811 = vmatprep.subr.mxu1 %v5901_v18  ;;  %1882 = vmatprep.subr.mxu0 %v5904_v13 }
 0x1f9   :  { %1812 = vmatpush1.msra.mxu1 %v5907_v14  ;;  %1883 = vmatpush1.msra.mxu0 %v5910_v11 }
 0x1fa   :  { %1813 = vmatprep.subr.mxu1 %v5913_v15  ;;  %1884 = vmatprep.subr.mxu0 %v5916_v27 }
 0x1fb   :  { %1814 = vmatpush1.msra.mxu1 %v5919_v34  ;;  %1885 = vmatpush1.msra.mxu0 %v5922_v12 }
 0x1fc   :  { %1815 = vmatprep.subr.mxu1 %v5925_v28  ;;  %1886 = vmatprep.subr.mxu0 %v5928_v29 }
 0x1fd   :  { %1816 = vmatpush1.msra.mxu1 %v5931_v7  ;;  %1887 = vmatpush1.msra.mxu0 %v5934_v8 }
 0x1fe   :  { %1817 = vmatprep.subr.mxu1 %v5937_v25  ;;  %1888 = vmatprep.subr.mxu0 %v5940_v20 }
 0x1ff   :  { %1818 = vmatpush1.msra.mxu1 %v5943_v0  ;;  %1889 = vmatpush1.msra.mxu0 %v5946_v10 }
 0x200   :  { %1819 = vmatprep.subr.mxu1 %v5949_v43  ;;  %1890 = vmatprep.subr.mxu0 %v5952_v37 }
 0x201   :  { %1820 = vmatpush1.msra.mxu1 %v5955_v9  ;;  %1891 = vmatpush1.msra.mxu0 %v5958_v4  ;;  %v7664_v9 = vld [vmem:[#allocation19_spill] sm:$0xff] }
 0x202   :  { %1821 = vmatprep.subr.mxu1 %v5961_v21  ;;  %1892 = vmatprep.subr.mxu0 %v5964_v3  ;;  %v7665_v21 = vld [vmem:[#allocation20_spill] sm:$0xff] }
 0x203   :  { %1822 = vmatpush1.msra.mxu1 %v5967_v2  ;;  %1893 = vmatpush1.msra.mxu0 %v5970_v39 }
 0x204   :  { %1823 = vmatprep.subr.mxu1 %v5973_v41  ;;  %1894 = vmatprep.subr.mxu0 %v5976_v36 }
 0x205   :  { %1824 = vmatpush1.msra.mxu1 %v5979_v38  ;;  %1895 = vmatpush1.msra.mxu0 %v5982_v40  ;;  %v7666_v40 = vld [vmem:[#allocation59_spill] sm:$0xff] }
 0x206   :  { %1825 = vmatprep.subr.mxu1 %v7663_v47  ;;  %1896 = vmatprep.subr.mxu0 %v7664_v9 }
 0x207   :  { %1826 = vmatpush1.msra.mxu1 %v5991_v45  ;;  %1897 = vmatpush1.msra.mxu0 %v7665_v21 }
 0x208   :  { %1827 = vmatprep.subr.mxu1 %v5997_v23  ;;  %1898 = vmatprep.subr.mxu0 %v6000_v42 }
 0x209   :  { %1828 = vmatpush1.msra.mxu1 %v6003_v6  ;;  %1861 = vmatprep.mubr.f32.mxu1 %v7636_v16 }
 0x20a   :  { %1899 = vmatpush1.msra.mxu0 %v6007_v44  ;;  %1932 = vmatprep.mubr.f32.mxu0 %v7636_v16 }
 0x20b   :  { %1862 = vmatmul.mubr.f32.vlgmr.msra.gmra.mxu1 %v7666_v40  ;;  %1933 = vmatmul.mubr.f32.vlgmr.msra.gmra.mxu0 %v7662_v46 }
 0x20c   :  { %1944 = vmatprep.subr.mxu1 %v5817_v48  ;;  %2015 = vmatprep.subr.mxu0 %v5820_v49  ;;  %v7667_v48 = vld [vmem:[#allocation15_spill] sm:$0xff]  ;;  %v7668_v49 = vld [vmem:[#allocation16_spill] sm:$0xff] }
 0x20d   :  { %1945 = vmatpush1.msra.mxu1 %v5823_v50  ;;  %2016 = vmatpush1.msra.mxu0 %v5826_v51  ;;  %v7669_v50 = vld [vmem:[#allocation17_spill] sm:$0xff]  ;;  %v6145_v51 = vld [vmem:[#allocation2 + $0x2f8] sm:$0xff] }
 0x20e   :  { %1946 = vmatprep.subr.mxu1 %v5829_v52  ;;  %2017 = vmatprep.subr.mxu0 %v5832_v53  ;;  %v7670_v52 = vld [vmem:[#allocation60_spill] sm:$0xff] }
 0x20f   :  { %1947 = vmatpush1.msra.mxu1 %v5835_v54  ;;  %2018 = vmatpush1.msra.mxu0 %v5838_v55  ;;  %v6153_v53 = vld [vmem:[#allocation2 + $0x2e8] sm:$0xff]  ;;  %v6165_v54 = vld [vmem:[#allocation2 + $0x2d0] sm:$0xff] }
 0x210   :  { %1948 = vmatprep.subr.mxu1 %v5841_v56  ;;  %2019 = vmatprep.subr.mxu0 %v5844_v57  ;;  %v6169_v55 = vld [vmem:[#allocation2 + $0x2c8] sm:$0xff]  ;;  %v6173_v56 = vld [vmem:[#allocation2 + $0x2c0] sm:$0xff]  ;;  %v6177_v57 = vld [vmem:[#allocation2 + $0x2b8] sm:$0xff] }
 0x211   :  { %1949 = vmatpush1.msra.mxu1 %v5847_v58  ;;  %2020 = vmatpush1.msra.mxu0 %v5850_v59  ;;  %v6181_v58 = vld [vmem:[#allocation2 + $0x2b0] sm:$0xff]  ;;  %v6185_v59 = vld [vmem:[#allocation2 + $0x2a8] sm:$0xff] }
 0x212   :  { %1950 = vmatprep.subr.mxu1 %v5853_v60  ;;  %2021 = vmatprep.subr.mxu0 %v5856_v61  ;;  %v6189_v60 = vld [vmem:[#allocation2 + $0x2a0] sm:$0xff]  ;;  %v6191_v61 = vpop.f32.mrf.mxu1 }
 0x213   :  { %1951 = vmatpush1.msra.mxu1 %v5859_v62  ;;  %2022 = vmatpush1.msra.mxu0 %v5862_v63  ;;  %v6193_v62 = vpop.f32.mrf.mxu0  ;;  %v6197_v63 = vld [vmem:[#allocation2 + $0x298] sm:$0xff] }
 0x214   :  { %1952 = vmatprep.subr.mxu1 %v5865_v1  ;;  %2023 = vmatprep.subr.mxu0 %v5868_v30  ;;  %v6201_v1 = vld [vmem:[#allocation2 + $0x290] sm:$0xff]  ;;  %v6205_v30 = vld [vmem:[#allocation2 + $0x288] sm:$0xff] }
 0x215   :  { %1953 = vmatpush1.msra.mxu1 %v5871_v32  ;;  %2024 = vmatpush1.msra.mxu0 %v5874_v22  ;;  %v6209_v32 = vld [vmem:[#allocation2 + $0x280] sm:$0xff]  ;;  %v6211_v22 = vpop.f32.mrf.mxu1 }
 0x216   :  { %1954 = vmatprep.subr.mxu1 %v5877_v24  ;;  %2025 = vmatprep.subr.mxu0 %v5880_v17  ;;  %v6213_v24 = vpop.f32.mrf.mxu0  ;;  %v6217_v17 = vld [vmem:[#allocation2 + $0x278] sm:$0xff] }
 0x217   :  { %1955 = vmatpush1.msra.mxu1 %v5883_v35  ;;  %2026 = vmatpush1.msra.mxu0 %v5886_v5  ;;  %v6221_v35 = vld [vmem:[#allocation2 + $0x270] sm:$0xff] }
 0x218   :  { %1956 = vmatprep.subr.mxu1 %v5889_v26  ;;  %2027 = vmatprep.subr.mxu0 %v5892_v19  ;;  %v6229_v19 = vld [vmem:[#allocation2 + $0x268] sm:$0xff] }
 0x219   :  { %1957 = vmatpush1.msra.mxu1 %v5895_v33  ;;  %2028 = vmatpush1.msra.mxu0 %v5898_v31  ;;  %v6233_v33 = vld [vmem:[#allocation2 + $0x260] sm:$0xff]  ;;  %v6237_v31 = vld [vmem:[#allocation2 + $0x258] sm:$0xff] }
 0x21a   :  { %1958 = vmatprep.subr.mxu1 %v5901_v18  ;;  %2029 = vmatprep.subr.mxu0 %v5904_v13  ;;  %v6241_v18 = vld [vmem:[#allocation2 + $0x250] sm:$0xff] }
 0x21b   :  { %1959 = vmatpush1.msra.mxu1 %v5907_v14  ;;  %2030 = vmatpush1.msra.mxu0 %v5910_v11  ;;  %v6249_v11 = vld [vmem:[#allocation2 + $0x248] sm:$0xff] }
 0x21c   :  { %1960 = vmatprep.subr.mxu1 %v5913_v15  ;;  %2031 = vmatprep.subr.mxu0 %v5916_v27  ;;  %v6253_v15 = vld [vmem:[#allocation2 + $0x240] sm:$0xff]  ;;  %v6257_v27 = vld [vmem:[#allocation2 + $0x238] sm:$0xff] }
 0x21d   :  { %1961 = vmatpush1.msra.mxu1 %v5919_v34  ;;  %2032 = vmatpush1.msra.mxu0 %v5922_v12 }
 0x21e   :  { %1962 = vmatprep.subr.mxu1 %v5925_v28  ;;  %2033 = vmatprep.subr.mxu0 %v5928_v29  ;;  %v6261_v28 = vld [vmem:[#allocation2 + $0x230] sm:$0xff] }
 0x21f   :  { %1963 = vmatpush1.msra.mxu1 %v5931_v7  ;;  %2034 = vmatpush1.msra.mxu0 %v5934_v8  ;;  %v6267_v7 = vld [vmem:[#allocation2 + $0x228] sm:$0xff] }
 0x220   :  { %1964 = vmatprep.subr.mxu1 %v5937_v25  ;;  %2035 = vmatprep.subr.mxu0 %v5940_v20  ;;  %v6271_v20 = vld [vmem:[#allocation2 + $0x220] sm:$0xff] }
 0x221   :  { %1965 = vmatpush1.msra.mxu1 %v5943_v0  ;;  %2036 = vmatpush1.msra.mxu0 %v5946_v10  ;;  %v6223_v5 = vpop.f32.mrf.mxu1  ;;  %v6225_v26 = vpop.f32.mrf.mxu0  ;;  %v6277_v10 = vld [vmem:[#allocation2 + $0x218] sm:$0xff] }
 0x222   :  { %1966 = vmatprep.subr.mxu1 %v5949_v43  ;;  %2037 = vmatprep.subr.mxu0 %v5952_v37  ;;  %v6281_v43 = vld [vmem:[#allocation2 + $0x210] sm:$0xff]  ;;  %v6285_v37 = vld [vmem:[#allocation2 + $0x208] sm:$0xff] }
 0x223   :  { %1967 = vmatpush1.msra.mxu1 %v7667_v48  ;;  %2038 = vmatpush1.msra.mxu0 %v5958_v4  ;;  %v6243_v13 = vpop.f32.mrf.mxu1  ;;  %v6245_v14 = vpop.f32.mrf.mxu0  ;;  %v7673_v4 = vld [vmem:[#allocation14_spill] sm:$0xff] }
 0x224   :  { %1968 = vmatprep.subr.mxu1 %v7668_v49  ;;  %2039 = vmatprep.subr.mxu0 %v5964_v3 }
 0x225   :  { %1969 = vmatpush1.msra.mxu1 %v5967_v2  ;;  %2040 = vmatpush1.msra.mxu0 %v5970_v39 }
 0x226   :  { %1970 = vmatprep.subr.mxu1 %v5973_v41  ;;  %2041 = vmatprep.subr.mxu0 %v5976_v36 }
 0x227   :  { %1971 = vmatpush1.msra.mxu1 %v5979_v38  ;;  %2042 = vmatpush1.msra.mxu0 %v7669_v50 }
 0x228   :  { %1972 = vmatprep.subr.mxu1 %v7663_v47  ;;  %2043 = vmatprep.subr.mxu0 %v7664_v9  ;;  %v6149_v47 = vld [vmem:[#allocation2 + $0x2f0] sm:$0xff]  ;;  %v6289_v9 = vld [vmem:[#allocation2 + $0x200] sm:$0xff] }
 0x229   :  { %1973 = vmatpush1.msra.mxu1 %v5991_v45  ;;  %2044 = vmatpush1.msra.mxu0 %v7665_v21  ;;  %v7674_v21 = vld [vmem:[#allocation55_spill] sm:$0xff] }
 0x22a   :  { %1974 = vmatprep.subr.mxu1 %v5997_v23  ;;  %2045 = vmatprep.subr.mxu0 %v6000_v42  ;;  %v6157_v23 = vld [vmem:[#allocation2 + $0x2e0] sm:$0xff]  ;;  %v6161_v42 = vld [vmem:[#allocation2 + $0x2d8] sm:$0xff] }
 0x22b   :  { %1975 = vmatpush1.msra.mxu1 %v6003_v6  ;;  %2008 = vmatprep.mubr.f32.mxu1 %v7636_v16  ;;  %v7677_v6 = vld [vmem:[#allocation56_spill] sm:$0xff] }
 0x22c   :  { %2046 = vmatpush1.msra.mxu0 %v6007_v44  ;;  %2079 = vmatprep.mubr.f32.mxu0 %v7636_v16  ;;  %v7678_v44 = vld [vmem:[#allocation57_spill] sm:$0xff] }
 0x22d   :  { %2009 = vmatmul.mubr.f32.vlgmr.msra.gmra.mxu1 %v7670_v52  ;;  %2080 = vmatmul.mubr.f32.vlgmr.msra.gmra.mxu0 %v7666_v40 }
 0x22e   :  { %2119 = vmatprep.subr.mxu1 %v6145_v51  ;;  %2192 = vmatprep.subr.mxu0 %v6145_v51 }
 0x22f   :  { %2120 = vmatpush1.msra.mxu1 %v6149_v47  ;;  %2193 = vmatpush1.msra.mxu0 %v6149_v47 }
 0x230   :  { %2121 = vmatprep.subr.mxu1 %v6153_v53  ;;  %2194 = vmatprep.subr.mxu0 %v6153_v53 }
 0x231   :  { %2122 = vmatpush1.msra.mxu1 %v6157_v23  ;;  %2195 = vmatpush1.msra.mxu0 %v6157_v23 }
 0x232   :  { %2123 = vmatprep.subr.mxu1 %v6161_v42  ;;  %2196 = vmatprep.subr.mxu0 %v6161_v42 }
 0x233   :  { %2124 = vmatpush1.msra.mxu1 %v6165_v54  ;;  %2197 = vmatpush1.msra.mxu0 %v6165_v54 }
 0x234   :  { %2125 = vmatprep.subr.mxu1 %v6169_v55  ;;  %2198 = vmatprep.subr.mxu0 %v6169_v55 }
 0x235   :  { %2126 = vmatpush1.msra.mxu1 %v6173_v56  ;;  %2199 = vmatpush1.msra.mxu0 %v6173_v56 }
 0x236   :  { %2127 = vmatprep.subr.mxu1 %v6177_v57  ;;  %2200 = vmatprep.subr.mxu0 %v6177_v57 }
 0x237   :  { %2128 = vmatpush1.msra.mxu1 %v6181_v58  ;;  %2201 = vmatpush1.msra.mxu0 %v6181_v58 }
 0x238   :  { %2129 = vmatprep.subr.mxu1 %v6185_v59  ;;  %2202 = vmatprep.subr.mxu0 %v6185_v59 }
 0x239   :  { %2130 = vmatpush1.msra.mxu1 %v6189_v60  ;;  %2203 = vmatpush1.msra.mxu0 %v6189_v60 }
 0x23a   :  { %2131 = vmatprep.subr.mxu1 %v6197_v63  ;;  %2204 = vmatprep.subr.mxu0 %v6197_v63 }
 0x23b   :  { %2132 = vmatpush1.msra.mxu1 %v6201_v1  ;;  %2205 = vmatpush1.msra.mxu0 %v6201_v1 }
 0x23c   :  { %2133 = vmatprep.subr.mxu1 %v6205_v30  ;;  %2206 = vmatprep.subr.mxu0 %v6205_v30 }
 0x23d   :  { %2134 = vmatpush1.msra.mxu1 %v6209_v32  ;;  %2207 = vmatpush1.msra.mxu0 %v6209_v32 }
 0x23e   :  { %2135 = vmatprep.subr.mxu1 %v6217_v17  ;;  %2208 = vmatprep.subr.mxu0 %v6217_v17 }
 0x23f   :  { %2136 = vmatpush1.msra.mxu1 %v6221_v35  ;;  %2209 = vmatpush1.msra.mxu0 %v6221_v35 }
 0x240   :  { %2137 = vmatprep.subr.mxu1 %v6229_v19  ;;  %2210 = vmatprep.subr.mxu0 %v6229_v19 }
 0x241   :  { %2138 = vmatpush1.msra.mxu1 %v6233_v33  ;;  %2211 = vmatpush1.msra.mxu0 %v6233_v33 }
 0x242   :  { %2139 = vmatprep.subr.mxu1 %v6237_v31  ;;  %2212 = vmatprep.subr.mxu0 %v6237_v31 }
 0x243   :  { %2140 = vmatpush1.msra.mxu1 %v6241_v18  ;;  %2213 = vmatpush1.msra.mxu0 %v6241_v18  ;;  %v1278_v34 = vpop.f32.mrf.mxu1  ;;  %v1349_v12 = vpop.f32.mrf.mxu0 }
 0x244   :  { %2141 = vmatprep.subr.mxu1 %v6249_v11  ;;  %2214 = vmatprep.subr.mxu0 %v6249_v11  ;;  %v6263_v29 = vadd.f32 %v1349_v12, %v1278_v34 }
 0x245   :  { %2142 = vmatpush1.msra.mxu1 %v6253_v15  ;;  %2215 = vmatpush1.msra.mxu0 %v6253_v15  ;;  %v1280_v8 = vpop.f32.mrf.mxu1  ;;  %v1351_v25 = vpop.f32.mrf.mxu0 }
 0x246   :  { %7671 = vst [vmem:[#allocation21_spill] sm:$0xff] %v6263_v29  ;;  %2143 = vmatprep.subr.mxu1 %v6257_v27  ;;  %2216 = vmatprep.subr.mxu0 %v6257_v27  ;;  %v6273_v0 = vadd.f32 %v1351_v25, %v1280_v8  ;;  %v6593_v8 = vld [vmem:[#allocation2 + $0x358] sm:$0xff]  ;;  %v6597_v25 = vld [vmem:[#allocation2 + $0x350] sm:$0xff] }
 0x247   :  { %2144 = vmatpush1.msra.mxu1 %v6261_v28  ;;  %2217 = vmatpush1.msra.mxu0 %v6261_v28 }
 0x248   :  { %7672 = vst [vmem:[#allocation22_spill] sm:$0xff] %v6273_v0  ;;  %2145 = vmatprep.subr.mxu1 %v6267_v7  ;;  %2218 = vmatprep.subr.mxu0 %v6267_v7 }
 0x249   :  { %2146 = vmatpush1.msra.mxu1 %v6271_v20  ;;  %2219 = vmatpush1.msra.mxu0 %v6271_v20 }
 0x24a   :  { %2147 = vmatprep.subr.mxu1 %v6277_v10  ;;  %2220 = vmatprep.subr.mxu0 %v6277_v10 }
 0x24b   :  { %2148 = vmatpush1.msra.mxu1 %v6281_v43  ;;  %2221 = vmatpush1.msra.mxu0 %v6281_v43 }
 0x24c   :  { %2149 = vmatprep.subr.mxu1 %v6285_v37  ;;  %2222 = vmatprep.subr.mxu0 %v6285_v37 }
 0x24d   :  { %2150 = vmatpush1.msra.mxu1 %v6289_v9  ;;  %2183 = vmatprep.mubr.f32.mxu1 %v7636_v16 }
 0x24e   :  { %2223 = vmatpush1.msra.mxu0 %v6289_v9  ;;  %2256 = vmatprep.mubr.f32.mxu0 %v7636_v16 }
 0x24f   :  { %2184 = vmatmul.mubr.f32.vlgmr.msra.gmra.mxu1 %v7673_v4  ;;  %2257 = vmatmul.mubr.f32.vlgmr.msra.gmra.mxu0 %v7674_v21  ;;  %v6613_v4 = vld [vmem:[#allocation2 + $0x330] sm:$0xff] }
 0x250   :  { %2265 = vmatprep.subr.mxu1 %v6145_v51  ;;  %2338 = vmatprep.subr.mxu0 %v6145_v51 }
 0x251   :  { %2266 = vmatpush1.msra.mxu1 %v6149_v47  ;;  %2339 = vmatpush1.msra.mxu0 %v6149_v47 }
 0x252   :  { %2267 = vmatprep.subr.mxu1 %v6153_v53  ;;  %2340 = vmatprep.subr.mxu0 %v6153_v53 }
 0x253   :  { %2268 = vmatpush1.msra.mxu1 %v6157_v23  ;;  %2341 = vmatpush1.msra.mxu0 %v6157_v23 }
 0x254   :  { %2269 = vmatprep.subr.mxu1 %v6161_v42  ;;  %2342 = vmatprep.subr.mxu0 %v6161_v42 }
 0x255   :  { %2270 = vmatpush1.msra.mxu1 %v6165_v54  ;;  %2343 = vmatpush1.msra.mxu0 %v6165_v54 }
 0x256   :  { %2271 = vmatprep.subr.mxu1 %v6169_v55  ;;  %2344 = vmatprep.subr.mxu0 %v6169_v55 }
 0x257   :  { %2272 = vmatpush1.msra.mxu1 %v6173_v56  ;;  %2345 = vmatpush1.msra.mxu0 %v6173_v56 }
 0x258   :  { %2273 = vmatprep.subr.mxu1 %v6177_v57  ;;  %2346 = vmatprep.subr.mxu0 %v6177_v57 }
 0x259   :  { %2274 = vmatpush1.msra.mxu1 %v6181_v58  ;;  %2347 = vmatpush1.msra.mxu0 %v6181_v58 }
 0x25a   :  { %2275 = vmatprep.subr.mxu1 %v6185_v59  ;;  %2348 = vmatprep.subr.mxu0 %v6185_v59 }
 0x25b   :  { %2276 = vmatpush1.msra.mxu1 %v6189_v60  ;;  %2349 = vmatpush1.msra.mxu0 %v6189_v60 }
 0x25c   :  { %2277 = vmatprep.subr.mxu1 %v6197_v63  ;;  %2350 = vmatprep.subr.mxu0 %v6197_v63 }
 0x25d   :  { %2278 = vmatpush1.msra.mxu1 %v6201_v1  ;;  %2351 = vmatpush1.msra.mxu0 %v6201_v1 }
 0x25e   :  { %2279 = vmatprep.subr.mxu1 %v6205_v30  ;;  %2352 = vmatprep.subr.mxu0 %v6205_v30 }
 0x25f   :  { %2280 = vmatpush1.msra.mxu1 %v6209_v32  ;;  %2353 = vmatpush1.msra.mxu0 %v6209_v32 }
 0x260   :  { %2281 = vmatprep.subr.mxu1 %v6217_v17  ;;  %2354 = vmatprep.subr.mxu0 %v6217_v17 }
 0x261   :  { %2282 = vmatpush1.msra.mxu1 %v6221_v35  ;;  %2355 = vmatpush1.msra.mxu0 %v6221_v35 }
 0x262   :  { %2283 = vmatprep.subr.mxu1 %v6229_v19  ;;  %2356 = vmatprep.subr.mxu0 %v6229_v19 }
 0x263   :  { %2284 = vmatpush1.msra.mxu1 %v6233_v33  ;;  %2357 = vmatpush1.msra.mxu0 %v6233_v33 }
 0x264   :  { %2285 = vmatprep.subr.mxu1 %v6237_v31  ;;  %2358 = vmatprep.subr.mxu0 %v6237_v31 }
 0x265   :  { %2286 = vmatpush1.msra.mxu1 %v6241_v18  ;;  %2359 = vmatpush1.msra.mxu0 %v6241_v18  ;;  %v1425_v3 = vpop.f32.mrf.mxu1  ;;  %v1496_v2 = vpop.f32.mrf.mxu0 }
 0x266   :  { %2287 = vmatprep.subr.mxu1 %v6249_v11  ;;  %2360 = vmatprep.subr.mxu0 %v6249_v11  ;;  %v6347_v39 = vadd.f32 %v1496_v2, %v1425_v3  ;;  %v6619_v2 = vld [vmem:[#allocation2 + $0x328] sm:$0xff] }
 0x267   :  { %2288 = vmatpush1.msra.mxu1 %v6253_v15  ;;  %2361 = vmatpush1.msra.mxu0 %v6253_v15  ;;  %v1427_v41 = vpop.f32.mrf.mxu1  ;;  %v1498_v36 = vpop.f32.mrf.mxu0 }
 0x268   :  { %7675 = vst [vmem:[#allocation23_spill] sm:$0xff] %v6347_v39  ;;  %2289 = vmatprep.subr.mxu1 %v6257_v27  ;;  %2362 = vmatprep.subr.mxu0 %v6257_v27  ;;  %v6353_v38 = vadd.f32 %v1498_v36, %v1427_v41  ;;  %v6987_v39 = vld [vmem:[#allocation2 + $0x420] sm:$0xff] }
 0x269   :  { %2290 = vmatpush1.msra.mxu1 %v6261_v28  ;;  %2363 = vmatpush1.msra.mxu0 %v6261_v28 }
 0x26a   :  { %7676 = vst [vmem:[#allocation24_spill] sm:$0xff] %v6353_v38  ;;  %2291 = vmatprep.subr.mxu1 %v6267_v7  ;;  %2364 = vmatprep.subr.mxu0 %v6267_v7 }
 0x26b   :  { %2292 = vmatpush1.msra.mxu1 %v6271_v20  ;;  %2365 = vmatpush1.msra.mxu0 %v6271_v20 }
 0x26c   :  { %2293 = vmatprep.subr.mxu1 %v6277_v10  ;;  %2366 = vmatprep.subr.mxu0 %v6277_v10 }
 0x26d   :  { %2294 = vmatpush1.msra.mxu1 %v6281_v43  ;;  %2367 = vmatpush1.msra.mxu0 %v6281_v43 }
 0x26e   :  { %2295 = vmatprep.subr.mxu1 %v6285_v37  ;;  %2368 = vmatprep.subr.mxu0 %v6285_v37 }
 0x26f   :  { %2296 = vmatpush1.msra.mxu1 %v6289_v9  ;;  %2329 = vmatprep.mubr.f32.mxu1 %v7636_v16 }
 0x270   :  { %2369 = vmatpush1.msra.mxu0 %v6289_v9  ;;  %2402 = vmatprep.mubr.f32.mxu0 %v7636_v16 }
 0x271   :  { %2330 = vmatmul.mubr.f32.vlgmr.msra.gmra.mxu1 %v7677_v6  ;;  %2403 = vmatmul.mubr.f32.vlgmr.msra.gmra.mxu0 %v7678_v44 }
 0x272   :  { %2411 = vmatprep.subr.mxu1 %v6145_v51  ;;  %2484 = vmatprep.subr.mxu0 %v6145_v51 }
 0x273   :  { %2412 = vmatpush1.msra.mxu1 %v6149_v47  ;;  %2485 = vmatpush1.msra.mxu0 %v6149_v47 }
 0x274   :  { %2413 = vmatprep.subr.mxu1 %v6153_v53  ;;  %2486 = vmatprep.subr.mxu0 %v6153_v53 }
 0x275   :  { %2414 = vmatpush1.msra.mxu1 %v6157_v23  ;;  %2487 = vmatpush1.msra.mxu0 %v6157_v23 }
 0x276   :  { %2415 = vmatprep.subr.mxu1 %v6161_v42  ;;  %2488 = vmatprep.subr.mxu0 %v6161_v42 }
 0x277   :  { %2416 = vmatpush1.msra.mxu1 %v6165_v54  ;;  %2489 = vmatpush1.msra.mxu0 %v6165_v54 }
 0x278   :  { %2417 = vmatprep.subr.mxu1 %v6169_v55  ;;  %2490 = vmatprep.subr.mxu0 %v6169_v55 }
 0x279   :  { %2418 = vmatpush1.msra.mxu1 %v6173_v56  ;;  %2491 = vmatpush1.msra.mxu0 %v6173_v56 }
 0x27a   :  { %2419 = vmatprep.subr.mxu1 %v6177_v57  ;;  %2492 = vmatprep.subr.mxu0 %v6177_v57 }
 0x27b   :  { %2420 = vmatpush1.msra.mxu1 %v6181_v58  ;;  %2493 = vmatpush1.msra.mxu0 %v6181_v58 }
 0x27c   :  { %2421 = vmatprep.subr.mxu1 %v6185_v59  ;;  %2494 = vmatprep.subr.mxu0 %v6185_v59 }
 0x27d   :  { %2422 = vmatpush1.msra.mxu1 %v6189_v60  ;;  %2495 = vmatpush1.msra.mxu0 %v6189_v60 }
 0x27e   :  { %2423 = vmatprep.subr.mxu1 %v6197_v63  ;;  %2496 = vmatprep.subr.mxu0 %v6197_v63 }
 0x27f   :  { %2424 = vmatpush1.msra.mxu1 %v6201_v1  ;;  %2497 = vmatpush1.msra.mxu0 %v6201_v1 }
 0x280   :  { %2425 = vmatprep.subr.mxu1 %v6205_v30  ;;  %2498 = vmatprep.subr.mxu0 %v6205_v30 }
 0x281   :  { %2426 = vmatpush1.msra.mxu1 %v6209_v32  ;;  %2499 = vmatpush1.msra.mxu0 %v6209_v32 }
 0x282   :  { %2427 = vmatprep.subr.mxu1 %v6217_v17  ;;  %2500 = vmatprep.subr.mxu0 %v6217_v17 }
 0x283   :  { %2428 = vmatpush1.msra.mxu1 %v6221_v35  ;;  %2501 = vmatpush1.msra.mxu0 %v6221_v35 }
 0x284   :  { %2429 = vmatprep.subr.mxu1 %v6229_v19  ;;  %2502 = vmatprep.subr.mxu0 %v6229_v19 }
 0x285   :  { %2430 = vmatpush1.msra.mxu1 %v6233_v33  ;;  %2503 = vmatpush1.msra.mxu0 %v6233_v33 }
 0x286   :  { %2431 = vmatprep.subr.mxu1 %v6237_v31  ;;  %2504 = vmatprep.subr.mxu0 %v6237_v31 }
 0x287   :  { %2432 = vmatpush1.msra.mxu1 %v6241_v18  ;;  %2505 = vmatpush1.msra.mxu0 %v6241_v18  ;;  %v1571_v45 = vpop.f32.mrf.mxu1  ;;  %v1642_v48 = vpop.f32.mrf.mxu0 }
 0x288   :  { %2433 = vmatprep.subr.mxu1 %v6249_v11  ;;  %2506 = vmatprep.subr.mxu0 %v6249_v11  ;;  %v6419_v49 = vadd.f32 %v1642_v48, %v1571_v45  ;;  %v6623_v45 = vld [vmem:[#allocation2 + $0x320] sm:$0xff] }
 0x289   :  { %2434 = vmatpush1.msra.mxu1 %v6253_v15  ;;  %2507 = vmatpush1.msra.mxu0 %v6253_v15  ;;  %v1573_v50 = vpop.f32.mrf.mxu1  ;;  %v1644_v34 = vpop.f32.mrf.mxu0 }
 0x28a   :  { %2435 = vmatprep.subr.mxu1 %v6257_v27  ;;  %2508 = vmatprep.subr.mxu0 %v6257_v27  ;;  %v6425_v12 = vadd.f32 %v1644_v34, %v1573_v50  ;;  %v6629_v50 = vld [vmem:[#allocation2 + $0x318] sm:$0xff]  ;;  %v6633_v34 = vld [vmem:[#allocation2 + $0x310] sm:$0xff] }
 0x28b   :  { %2436 = vmatpush1.msra.mxu1 %v6261_v28  ;;  %2509 = vmatpush1.msra.mxu0 %v6261_v28 }
 0x28c   :  { %2437 = vmatprep.subr.mxu1 %v6267_v7  ;;  %2510 = vmatprep.subr.mxu0 %v6267_v7 }
 0x28d   :  { %2438 = vmatpush1.msra.mxu1 %v6271_v20  ;;  %2511 = vmatpush1.msra.mxu0 %v6271_v20 }
 0x28e   :  { %2439 = vmatprep.subr.mxu1 %v6277_v10  ;;  %2512 = vmatprep.subr.mxu0 %v6277_v10 }
 0x28f   :  { %2440 = vmatpush1.msra.mxu1 %v6281_v43  ;;  %2513 = vmatpush1.msra.mxu0 %v6281_v43 }
 0x290   :  { %2441 = vmatprep.subr.mxu1 %v6285_v37  ;;  %2514 = vmatprep.subr.mxu0 %v6285_v37 }
 0x291   :  { %2442 = vmatpush1.msra.mxu1 %v6289_v9  ;;  %2475 = vmatprep.mubr.f32.mxu1 %v7636_v16 }
 0x292   :  { %2515 = vmatpush1.msra.mxu0 %v6289_v9  ;;  %2548 = vmatprep.mubr.f32.mxu0 %v7636_v16 }
 0x293   :  { %2476 = vmatmul.mubr.f32.vlgmr.msra.gmra.mxu1 %v7662_v46  ;;  %2549 = vmatmul.mubr.f32.vlgmr.msra.gmra.mxu0 %v7666_v40 }
 0x294   :  { %2557 = vmatprep.subr.mxu1 %v6145_v51  ;;  %2634 = vmatprep.subr.mxu0 %v6145_v51 }
 0x295   :  { %2558 = vmatpush1.msra.mxu1 %v6149_v47  ;;  %2635 = vmatpush1.msra.mxu0 %v6149_v47 }
 0x296   :  { %2559 = vmatprep.subr.mxu1 %v6153_v53  ;;  %2636 = vmatprep.subr.mxu0 %v6153_v53 }
 0x297   :  { %2560 = vmatpush1.msra.mxu1 %v6157_v23  ;;  %2637 = vmatpush1.msra.mxu0 %v6157_v23 }
 0x298   :  { %2561 = vmatprep.subr.mxu1 %v6161_v42  ;;  %2638 = vmatprep.subr.mxu0 %v6161_v42 }
 0x299   :  { %2562 = vmatpush1.msra.mxu1 %v6165_v54  ;;  %2639 = vmatpush1.msra.mxu0 %v6165_v54 }
 0x29a   :  { %2563 = vmatprep.subr.mxu1 %v6169_v55  ;;  %2640 = vmatprep.subr.mxu0 %v6169_v55  ;;  %v6513_v55 = vld [vmem:[#allocation2 + $0x3f8] sm:$0xff] }
 0x29b   :  { %2564 = vmatpush1.msra.mxu1 %v6173_v56  ;;  %2641 = vmatpush1.msra.mxu0 %v6173_v56  ;;  %v6517_v56 = vld [vmem:[#allocation2 + $0x3f0] sm:$0xff] }
 0x29c   :  { %2565 = vmatprep.subr.mxu1 %v6177_v57  ;;  %2642 = vmatprep.subr.mxu0 %v6177_v57  ;;  %v7679_v57 = vld [vmem:[#allocation61_spill] sm:$0xff] }
 0x29d   :  { %2566 = vmatpush1.msra.mxu1 %v6181_v58  ;;  %2643 = vmatpush1.msra.mxu0 %v6181_v58  ;;  %v6521_v58 = vld [vmem:[#allocation2 + $0x3e8] sm:$0xff] }
 0x29e   :  { %2567 = vmatprep.subr.mxu1 %v6185_v59  ;;  %2644 = vmatprep.subr.mxu0 %v6185_v59  ;;  %v6525_v59 = vld [vmem:[#allocation2 + $0x3e0] sm:$0xff] }
 0x29f   :  { %2568 = vmatpush1.msra.mxu1 %v6189_v60  ;;  %2645 = vmatpush1.msra.mxu0 %v6189_v60  ;;  %v6529_v60 = vld [vmem:[#allocation2 + $0x3d8] sm:$0xff] }
 0x2a0   :  { %2569 = vmatprep.subr.mxu1 %v6197_v63  ;;  %2646 = vmatprep.subr.mxu0 %v6197_v63  ;;  %v6533_v63 = vld [vmem:[#allocation2 + $0x3d0] sm:$0xff] }
 0x2a1   :  { %2570 = vmatpush1.msra.mxu1 %v6201_v1  ;;  %2647 = vmatpush1.msra.mxu0 %v6201_v1  ;;  %v6537_v1 = vld [vmem:[#allocation2 + $0x3c8] sm:$0xff] }
 0x2a2   :  { %2571 = vmatprep.subr.mxu1 %v6205_v30  ;;  %2648 = vmatprep.subr.mxu0 %v6205_v30  ;;  %v6541_v30 = vld [vmem:[#allocation2 + $0x3c0] sm:$0xff] }
 0x2a3   :  { %2572 = vmatpush1.msra.mxu1 %v6209_v32  ;;  %2649 = vmatpush1.msra.mxu0 %v6209_v32  ;;  %v6545_v32 = vld [vmem:[#allocation2 + $0x3b8] sm:$0xff] }
 0x2a4   :  { %2573 = vmatprep.subr.mxu1 %v6217_v17  ;;  %2650 = vmatprep.subr.mxu0 %v6217_v17  ;;  %v6549_v17 = vld [vmem:[#allocation2 + $0x3b0] sm:$0xff] }
 0x2a5   :  { %2574 = vmatpush1.msra.mxu1 %v6221_v35  ;;  %2651 = vmatpush1.msra.mxu0 %v6221_v35  ;;  %v6553_v35 = vld [vmem:[#allocation2 + $0x3a8] sm:$0xff] }
 0x2a6   :  { %2575 = vmatprep.subr.mxu1 %v6229_v19  ;;  %2652 = vmatprep.subr.mxu0 %v6229_v19  ;;  %v6557_v19 = vld [vmem:[#allocation2 + $0x3a0] sm:$0xff] }
 0x2a7   :  { %2576 = vmatpush1.msra.mxu1 %v6233_v33  ;;  %2653 = vmatpush1.msra.mxu0 %v6233_v33  ;;  %v6561_v33 = vld [vmem:[#allocation2 + $0x398] sm:$0xff] }
 0x2a8   :  { %2577 = vmatprep.subr.mxu1 %v6237_v31  ;;  %2654 = vmatprep.subr.mxu0 %v6237_v31  ;;  %v6565_v31 = vld [vmem:[#allocation2 + $0x390] sm:$0xff] }
 0x2a9   :  { %2578 = vmatpush1.msra.mxu1 %v6241_v18  ;;  %2655 = vmatpush1.msra.mxu0 %v6241_v18  ;;  %v1717_v51 = vpop.f32.mrf.mxu1  ;;  %v1788_v47 = vpop.f32.mrf.mxu0  ;;  %v6569_v18 = vld [vmem:[#allocation2 + $0x388] sm:$0xff] }
 0x2aa   :  { %2579 = vmatprep.subr.mxu1 %v6249_v11  ;;  %2656 = vmatprep.subr.mxu0 %v6249_v11  ;;  %v6491_v53 = vadd.f32 %v1788_v47, %v1717_v51  ;;  %v6573_v11 = vld [vmem:[#allocation2 + $0x380] sm:$0xff]  ;;  %v6637_v51 = vld [vmem:[#allocation2 + $0x308] sm:$0xff] }
 0x2ab   :  { %2580 = vmatpush1.msra.mxu1 %v6253_v15  ;;  %2657 = vmatpush1.msra.mxu0 %v6253_v15  ;;  %v1719_v23 = vpop.f32.mrf.mxu1  ;;  %v1790_v42 = vpop.f32.mrf.mxu0  ;;  %v6577_v15 = vld [vmem:[#allocation2 + $0x378] sm:$0xff]  ;;  %v6641_v47 = vld [vmem:[#allocation2 + $0x300] sm:$0xff] }
 0x2ac   :  { %2581 = vmatprep.subr.mxu1 %v6257_v27  ;;  %2658 = vmatprep.subr.mxu0 %v6257_v27  ;;  %v6497_v54 = vadd.f32 %v1790_v42, %v1719_v23  ;;  %v6581_v27 = vld [vmem:[#allocation2 + $0x370] sm:$0xff] }
 0x2ad   :  { %2582 = vmatpush1.msra.mxu1 %v6261_v28  ;;  %2659 = vmatpush1.msra.mxu0 %v6261_v28  ;;  %v6585_v28 = vld [vmem:[#allocation2 + $0x368] sm:$0xff] }
 0x2ae   :  { %2583 = vmatprep.subr.mxu1 %v6267_v7  ;;  %2660 = vmatprep.subr.mxu0 %v6267_v7  ;;  %v6589_v7 = vld [vmem:[#allocation2 + $0x360] sm:$0xff] }
 0x2af   :  { %2584 = vmatpush1.msra.mxu1 %v6271_v20  ;;  %2661 = vmatpush1.msra.mxu0 %v6271_v20  ;;  %v6601_v20 = vld [vmem:[#allocation2 + $0x348] sm:$0xff] }
 0x2b0   :  { %2585 = vmatprep.subr.mxu1 %v6277_v10  ;;  %2662 = vmatprep.subr.mxu0 %v6277_v10  ;;  %v6605_v10 = vld [vmem:[#allocation2 + $0x340] sm:$0xff] }
 0x2b1   :  { %2586 = vmatpush1.msra.mxu1 %v6281_v43  ;;  %2663 = vmatpush1.msra.mxu0 %v6281_v43  ;;  %v6609_v43 = vld [vmem:[#allocation2 + $0x338] sm:$0xff] }
 0x2b2   :  { %2587 = vmatprep.subr.mxu1 %v6285_v37  ;;  %2664 = vmatprep.subr.mxu0 %v6285_v37 }
 0x2b3   :  { %2588 = vmatpush1.msra.mxu1 %v6289_v9  ;;  %2621 = vmatprep.mubr.f32.mxu1 %v7636_v16 }
 0x2b4   :  { %2665 = vmatpush1.msra.mxu0 %v6289_v9  ;;  %2698 = vmatprep.mubr.f32.mxu0 %v7636_v16 }
 0x2b5   :  { %2622 = vmatmul.mubr.f32.vlgmr.msra.gmra.mxu1 %v7670_v52  ;;  %2699 = vmatmul.mubr.f32.vlgmr.msra.gmra.mxu0 %v7679_v57 }
 0x2b6   :  { %2740 = vmatprep.subr.mxu1 %v6513_v55  ;;  %2813 = vmatprep.subr.mxu0 %v6513_v55 }
 0x2b7   :  { %2741 = vmatpush1.msra.mxu1 %v6517_v56  ;;  %2814 = vmatpush1.msra.mxu0 %v6517_v56 }
 0x2b8   :  { %2742 = vmatprep.subr.mxu1 %v6521_v58  ;;  %2815 = vmatprep.subr.mxu0 %v6521_v58 }
 0x2b9   :  { %2743 = vmatpush1.msra.mxu1 %v6525_v59  ;;  %2816 = vmatpush1.msra.mxu0 %v6525_v59 }
 0x2ba   :  { %2744 = vmatprep.subr.mxu1 %v6529_v60  ;;  %2817 = vmatprep.subr.mxu0 %v6529_v60 }
 0x2bb   :  { %2745 = vmatpush1.msra.mxu1 %v6533_v63  ;;  %2818 = vmatpush1.msra.mxu0 %v6533_v63 }
 0x2bc   :  { %2746 = vmatprep.subr.mxu1 %v6537_v1  ;;  %2819 = vmatprep.subr.mxu0 %v6537_v1 }
 0x2bd   :  { %2747 = vmatpush1.msra.mxu1 %v6541_v30  ;;  %2820 = vmatpush1.msra.mxu0 %v6541_v30 }
 0x2be   :  { %2748 = vmatprep.subr.mxu1 %v6545_v32  ;;  %2821 = vmatprep.subr.mxu0 %v6545_v32 }
 0x2bf   :  { %2749 = vmatpush1.msra.mxu1 %v6549_v17  ;;  %2822 = vmatpush1.msra.mxu0 %v6549_v17 }
 0x2c0   :  { %2750 = vmatprep.subr.mxu1 %v6553_v35  ;;  %2823 = vmatprep.subr.mxu0 %v6553_v35 }
 0x2c1   :  { %2751 = vmatpush1.msra.mxu1 %v6557_v19  ;;  %2824 = vmatpush1.msra.mxu0 %v6557_v19 }
 0x2c2   :  { %2752 = vmatprep.subr.mxu1 %v6561_v33  ;;  %2825 = vmatprep.subr.mxu0 %v6561_v33 }
 0x2c3   :  { %2753 = vmatpush1.msra.mxu1 %v6565_v31  ;;  %2826 = vmatpush1.msra.mxu0 %v6565_v31 }
 0x2c4   :  { %2754 = vmatprep.subr.mxu1 %v6569_v18  ;;  %2827 = vmatprep.subr.mxu0 %v6569_v18 }
 0x2c5   :  { %2755 = vmatpush1.msra.mxu1 %v6573_v11  ;;  %2828 = vmatpush1.msra.mxu0 %v6573_v11 }
 0x2c6   :  { %2756 = vmatprep.subr.mxu1 %v6577_v15  ;;  %2829 = vmatprep.subr.mxu0 %v6577_v15 }
 0x2c7   :  { %2757 = vmatpush1.msra.mxu1 %v6581_v27  ;;  %2830 = vmatpush1.msra.mxu0 %v6581_v27 }
 0x2c8   :  { %2758 = vmatprep.subr.mxu1 %v6585_v28  ;;  %2831 = vmatprep.subr.mxu0 %v6585_v28 }
 0x2c9   :  { %2759 = vmatpush1.msra.mxu1 %v6589_v7  ;;  %2832 = vmatpush1.msra.mxu0 %v6589_v7 }
 0x2ca   :  { %2760 = vmatprep.subr.mxu1 %v6593_v8  ;;  %2833 = vmatprep.subr.mxu0 %v6593_v8 }
 0x2cb   :  { %2761 = vmatpush1.msra.mxu1 %v6597_v25  ;;  %2834 = vmatpush1.msra.mxu0 %v6597_v25  ;;  %v1863_v37 = vpop.f32.mrf.mxu1  ;;  %v1934_v9 = vpop.f32.mrf.mxu0 }
 0x2cc   :  { %2762 = vmatprep.subr.mxu1 %v6601_v20  ;;  %2835 = vmatprep.subr.mxu0 %v6601_v20  ;;  %v6615_v3 = vadd.f32 %v1934_v9, %v1863_v37 }
 0x2cd   :  { %2763 = vmatpush1.msra.mxu1 %v6605_v10  ;;  %2836 = vmatpush1.msra.mxu0 %v6605_v10  ;;  %v1865_v41 = vpop.f32.mrf.mxu1  ;;  %v1936_v36 = vpop.f32.mrf.mxu0 }
 0x2ce   :  { %2764 = vmatprep.subr.mxu1 %v6609_v43  ;;  %2837 = vmatprep.subr.mxu0 %v6609_v43  ;;  %v6625_v48 = vadd.f32 %v1936_v36, %v1865_v41  ;;  %v6949_v36 = vld [vmem:[#allocation2 + $0x458] sm:$0xff] }
 0x2cf   :  { %2765 = vmatpush1.msra.mxu1 %v6613_v4  ;;  %2838 = vmatpush1.msra.mxu0 %v6613_v4 }
 0x2d0   :  { %2766 = vmatprep.subr.mxu1 %v6619_v2  ;;  %2839 = vmatprep.subr.mxu0 %v6619_v2 }
 0x2d1   :  { %2767 = vmatpush1.msra.mxu1 %v6623_v45  ;;  %2840 = vmatpush1.msra.mxu0 %v6623_v45 }
 0x2d2   :  { %2768 = vmatprep.subr.mxu1 %v6629_v50  ;;  %2841 = vmatprep.subr.mxu0 %v6629_v50 }
 0x2d3   :  { %2769 = vmatpush1.msra.mxu1 %v6633_v34  ;;  %2842 = vmatpush1.msra.mxu0 %v6633_v34 }
 0x2d4   :  { %2770 = vmatprep.subr.mxu1 %v6637_v51  ;;  %2843 = vmatprep.subr.mxu0 %v6637_v51 }
 0x2d5   :  { %2771 = vmatpush1.msra.mxu1 %v6641_v47  ;;  %2804 = vmatprep.mubr.f32.mxu1 %v7636_v16 }
 0x2d6   :  { %2844 = vmatpush1.msra.mxu0 %v6641_v47  ;;  %2877 = vmatprep.mubr.f32.mxu0 %v7636_v16 }
 0x2d7   :  { %2805 = vmatmul.mubr.f32.vlgmr.msra.gmra.mxu1 %v7674_v21  ;;  %2878 = vmatmul.mubr.f32.vlgmr.msra.gmra.mxu0 %v7677_v6 }
 0x2d8   :  { %2886 = vmatprep.subr.mxu1 %v6513_v55  ;;  %2959 = vmatprep.subr.mxu0 %v6513_v55 }
 0x2d9   :  { %2887 = vmatpush1.msra.mxu1 %v6517_v56  ;;  %2960 = vmatpush1.msra.mxu0 %v6517_v56 }
 0x2da   :  { %2888 = vmatprep.subr.mxu1 %v6521_v58  ;;  %2961 = vmatprep.subr.mxu0 %v6521_v58 }
 0x2db   :  { %2889 = vmatpush1.msra.mxu1 %v6525_v59  ;;  %2962 = vmatpush1.msra.mxu0 %v6525_v59 }
 0x2dc   :  { %2890 = vmatprep.subr.mxu1 %v6529_v60  ;;  %2963 = vmatprep.subr.mxu0 %v6529_v60 }
 0x2dd   :  { %2891 = vmatpush1.msra.mxu1 %v6533_v63  ;;  %2964 = vmatpush1.msra.mxu0 %v6533_v63 }
 0x2de   :  { %2892 = vmatprep.subr.mxu1 %v6537_v1  ;;  %2965 = vmatprep.subr.mxu0 %v6537_v1 }
 0x2df   :  { %2893 = vmatpush1.msra.mxu1 %v6541_v30  ;;  %2966 = vmatpush1.msra.mxu0 %v6541_v30 }
 0x2e0   :  { %2894 = vmatprep.subr.mxu1 %v6545_v32  ;;  %2967 = vmatprep.subr.mxu0 %v6545_v32 }
 0x2e1   :  { %2895 = vmatpush1.msra.mxu1 %v6549_v17  ;;  %2968 = vmatpush1.msra.mxu0 %v6549_v17 }
 0x2e2   :  { %2896 = vmatprep.subr.mxu1 %v6553_v35  ;;  %2969 = vmatprep.subr.mxu0 %v6553_v35 }
 0x2e3   :  { %2897 = vmatpush1.msra.mxu1 %v6557_v19  ;;  %2970 = vmatpush1.msra.mxu0 %v6557_v19 }
 0x2e4   :  { %2898 = vmatprep.subr.mxu1 %v6561_v33  ;;  %2971 = vmatprep.subr.mxu0 %v6561_v33 }
 0x2e5   :  { %2899 = vmatpush1.msra.mxu1 %v6565_v31  ;;  %2972 = vmatpush1.msra.mxu0 %v6565_v31 }
 0x2e6   :  { %2900 = vmatprep.subr.mxu1 %v6569_v18  ;;  %2973 = vmatprep.subr.mxu0 %v6569_v18 }
 0x2e7   :  { %2901 = vmatpush1.msra.mxu1 %v6573_v11  ;;  %2974 = vmatpush1.msra.mxu0 %v6573_v11 }
 0x2e8   :  { %2902 = vmatprep.subr.mxu1 %v6577_v15  ;;  %2975 = vmatprep.subr.mxu0 %v6577_v15 }
 0x2e9   :  { %2903 = vmatpush1.msra.mxu1 %v6581_v27  ;;  %2976 = vmatpush1.msra.mxu0 %v6581_v27 }
 0x2ea   :  { %2904 = vmatprep.subr.mxu1 %v6585_v28  ;;  %2977 = vmatprep.subr.mxu0 %v6585_v28 }
 0x2eb   :  { %2905 = vmatpush1.msra.mxu1 %v6589_v7  ;;  %2978 = vmatpush1.msra.mxu0 %v6589_v7 }
 0x2ec   :  { %2906 = vmatprep.subr.mxu1 %v6593_v8  ;;  %2979 = vmatprep.subr.mxu0 %v6593_v8 }
 0x2ed   :  { %2907 = vmatpush1.msra.mxu1 %v6597_v25  ;;  %2980 = vmatpush1.msra.mxu0 %v6597_v25  ;;  %v2010_v21 = vpop.f32.mrf.mxu1  ;;  %v2081_v23 = vpop.f32.mrf.mxu0 }
 0x2ee   :  { %2908 = vmatprep.subr.mxu1 %v6601_v20  ;;  %2981 = vmatprep.subr.mxu0 %v6601_v20  ;;  %v6699_v42 = vadd.f32 %v2081_v23, %v2010_v21  ;;  %v6969_v21 = vld [vmem:[#allocation2 + $0x438] sm:$0xff] }
 0x2ef   :  { %2909 = vmatpush1.msra.mxu1 %v6605_v10  ;;  %2982 = vmatpush1.msra.mxu0 %v6605_v10  ;;  %v2012_v37 = vpop.f32.mrf.mxu1  ;;  %v2083_v9 = vpop.f32.mrf.mxu0 }
 0x2f0   :  { %2910 = vmatprep.subr.mxu1 %v6609_v43  ;;  %2983 = vmatprep.subr.mxu0 %v6609_v43  ;;  %v6705_v41 = vadd.f32 %v2083_v9, %v2012_v37  ;;  %v6973_v9 = vld [vmem:[#allocation2 + $0x430] sm:$0xff] }
 0x2f1   :  { %2911 = vmatpush1.msra.mxu1 %v6613_v4  ;;  %2984 = vmatpush1.msra.mxu0 %v6613_v4 }
 0x2f2   :  { %2912 = vmatprep.subr.mxu1 %v6619_v2  ;;  %2985 = vmatprep.subr.mxu0 %v6619_v2 }
 0x2f3   :  { %2913 = vmatpush1.msra.mxu1 %v6623_v45  ;;  %2986 = vmatpush1.msra.mxu0 %v6623_v45 }
 0x2f4   :  { %2914 = vmatprep.subr.mxu1 %v6629_v50  ;;  %2987 = vmatprep.subr.mxu0 %v6629_v50 }
 0x2f5   :  { %2915 = vmatpush1.msra.mxu1 %v6633_v34  ;;  %2988 = vmatpush1.msra.mxu0 %v6633_v34 }
 0x2f6   :  { %2916 = vmatprep.subr.mxu1 %v6637_v51  ;;  %2989 = vmatprep.subr.mxu0 %v6637_v51 }
 0x2f7   :  { %2917 = vmatpush1.msra.mxu1 %v6641_v47  ;;  %2950 = vmatprep.mubr.f32.mxu1 %v7636_v16 }
 0x2f8   :  { %2990 = vmatpush1.msra.mxu0 %v6641_v47  ;;  %3023 = vmatprep.mubr.f32.mxu0 %v7636_v16 }
 0x2f9   :  { %2951 = vmatmul.mubr.f32.vlgmr.msra.gmra.mxu1 %v7678_v44  ;;  %3024 = vmatmul.mubr.f32.vlgmr.msra.gmra.mxu0 %v7662_v46 }
 0x2fa   :  { %3032 = vmatprep.subr.mxu1 %v6513_v55  ;;  %3105 = vmatprep.subr.mxu0 %v6513_v55 }
 0x2fb   :  { %3033 = vmatpush1.msra.mxu1 %v6517_v56  ;;  %3106 = vmatpush1.msra.mxu0 %v6517_v56 }
 0x2fc   :  { %3034 = vmatprep.subr.mxu1 %v6521_v58  ;;  %3107 = vmatprep.subr.mxu0 %v6521_v58 }
 0x2fd   :  { %3035 = vmatpush1.msra.mxu1 %v6525_v59  ;;  %3108 = vmatpush1.msra.mxu0 %v6525_v59 }
 0x2fe   :  { %3036 = vmatprep.subr.mxu1 %v6529_v60  ;;  %3109 = vmatprep.subr.mxu0 %v6529_v60 }
 0x2ff   :  { %3037 = vmatpush1.msra.mxu1 %v6533_v63  ;;  %3110 = vmatpush1.msra.mxu0 %v6533_v63 }
 0x300   :  { %3038 = vmatprep.subr.mxu1 %v6537_v1  ;;  %3111 = vmatprep.subr.mxu0 %v6537_v1 }
 0x301   :  { %3039 = vmatpush1.msra.mxu1 %v6541_v30  ;;  %3112 = vmatpush1.msra.mxu0 %v6541_v30 }
 0x302   :  { %3040 = vmatprep.subr.mxu1 %v6545_v32  ;;  %3113 = vmatprep.subr.mxu0 %v6545_v32 }
 0x303   :  { %3041 = vmatpush1.msra.mxu1 %v6549_v17  ;;  %3114 = vmatpush1.msra.mxu0 %v6549_v17 }
 0x304   :  { %3042 = vmatprep.subr.mxu1 %v6553_v35  ;;  %3115 = vmatprep.subr.mxu0 %v6553_v35 }
 0x305   :  { %3043 = vmatpush1.msra.mxu1 %v6557_v19  ;;  %3116 = vmatpush1.msra.mxu0 %v6557_v19 }
 0x306   :  { %3044 = vmatprep.subr.mxu1 %v6561_v33  ;;  %3117 = vmatprep.subr.mxu0 %v6561_v33 }
 0x307   :  { %3045 = vmatpush1.msra.mxu1 %v6565_v31  ;;  %3118 = vmatpush1.msra.mxu0 %v6565_v31 }
 0x308   :  { %3046 = vmatprep.subr.mxu1 %v6569_v18  ;;  %3119 = vmatprep.subr.mxu0 %v6569_v18 }
 0x309   :  { %3047 = vmatpush1.msra.mxu1 %v6573_v11  ;;  %3120 = vmatpush1.msra.mxu0 %v6573_v11 }
 0x30a   :  { %3048 = vmatprep.subr.mxu1 %v6577_v15  ;;  %3121 = vmatprep.subr.mxu0 %v6577_v15 }
 0x30b   :  { %3049 = vmatpush1.msra.mxu1 %v6581_v27  ;;  %3122 = vmatpush1.msra.mxu0 %v6581_v27 }
 0x30c   :  { %3050 = vmatprep.subr.mxu1 %v6585_v28  ;;  %3123 = vmatprep.subr.mxu0 %v6585_v28 }
 0x30d   :  { %3051 = vmatpush1.msra.mxu1 %v6589_v7  ;;  %3124 = vmatpush1.msra.mxu0 %v6589_v7 }
 0x30e   :  { %3052 = vmatprep.subr.mxu1 %v6593_v8  ;;  %3125 = vmatprep.subr.mxu0 %v6593_v8 }
 0x30f   :  { %3053 = vmatpush1.msra.mxu1 %v6597_v25  ;;  %3126 = vmatpush1.msra.mxu0 %v6597_v25 }
 0x310   :  { %3054 = vmatprep.subr.mxu1 %v6601_v20  ;;  %3127 = vmatprep.subr.mxu0 %v6601_v20 }
 0x311   :  { %3055 = vmatpush1.msra.mxu1 %v6605_v10  ;;  %3128 = vmatpush1.msra.mxu0 %v6605_v10 }
 0x312   :  { %3056 = vmatprep.subr.mxu1 %v6609_v43  ;;  %3129 = vmatprep.subr.mxu0 %v6609_v43 }
 0x313   :  { %3057 = vmatpush1.msra.mxu1 %v6613_v4  ;;  %3130 = vmatpush1.msra.mxu0 %v6613_v4 }
 0x314   :  { %3058 = vmatprep.subr.mxu1 %v6619_v2  ;;  %3131 = vmatprep.subr.mxu0 %v6619_v2 }
 0x315   :  { %3059 = vmatpush1.msra.mxu1 %v6623_v45  ;;  %3132 = vmatpush1.msra.mxu0 %v6623_v45 }
 0x316   :  { %3060 = vmatprep.subr.mxu1 %v6629_v50  ;;  %3133 = vmatprep.subr.mxu0 %v6629_v50 }
 0x317   :  { %3061 = vmatpush1.msra.mxu1 %v6633_v34  ;;  %3134 = vmatpush1.msra.mxu0 %v6633_v34 }
 0x318   :  { %3062 = vmatprep.subr.mxu1 %v6637_v51  ;;  %3135 = vmatprep.subr.mxu0 %v6637_v51 }
 0x319   :  { %3063 = vmatpush1.msra.mxu1 %v6641_v47  ;;  %3096 = vmatprep.mubr.f32.mxu1 %v7636_v16 }
 0x31a   :  { %3136 = vmatpush1.msra.mxu0 %v6641_v47  ;;  %3169 = vmatprep.mubr.f32.mxu0 %v7636_v16 }
 0x31b   :  { %3097 = vmatmul.mubr.f32.vlgmr.msra.gmra.mxu1 %v7666_v40  ;;  %3170 = vmatmul.mubr.f32.vlgmr.msra.gmra.mxu0 %v7670_v52 }
 0x31c   :  { %3178 = vmatprep.subr.mxu1 %v6513_v55  ;;  %3255 = vmatprep.subr.mxu0 %v6513_v55  ;;  %v6857_v55 = vld [vmem:[#allocation2 + $0x4f8] sm:$0xff] }
 0x31d   :  { %3179 = vmatpush1.msra.mxu1 %v6517_v56  ;;  %3256 = vmatpush1.msra.mxu0 %v6517_v56  ;;  %v6861_v56 = vld [vmem:[#allocation2 + $0x4f0] sm:$0xff] }
 0x31e   :  { %3180 = vmatprep.subr.mxu1 %v6521_v58  ;;  %3257 = vmatprep.subr.mxu0 %v6521_v58  ;;  %v7680_v58 = vld [vmem:[#allocation62_spill] sm:$0xff] }
 0x31f   :  { %3181 = vmatpush1.msra.mxu1 %v6525_v59  ;;  %3258 = vmatpush1.msra.mxu0 %v6525_v59  ;;  %v6865_v59 = vld [vmem:[#allocation2 + $0x4e8] sm:$0xff] }
 0x320   :  { %3182 = vmatprep.subr.mxu1 %v6529_v60  ;;  %3259 = vmatprep.subr.mxu0 %v6529_v60  ;;  %v6869_v60 = vld [vmem:[#allocation2 + $0x4e0] sm:$0xff] }
 0x321   :  { %3183 = vmatpush1.msra.mxu1 %v6533_v63  ;;  %3260 = vmatpush1.msra.mxu0 %v6533_v63  ;;  %v6873_v63 = vld [vmem:[#allocation2 + $0x4d8] sm:$0xff] }
 0x322   :  { %3184 = vmatprep.subr.mxu1 %v6537_v1  ;;  %3261 = vmatprep.subr.mxu0 %v6537_v1  ;;  %v6877_v1 = vld [vmem:[#allocation2 + $0x4d0] sm:$0xff] }
 0x323   :  { %3185 = vmatpush1.msra.mxu1 %v6541_v30  ;;  %3262 = vmatpush1.msra.mxu0 %v6541_v30  ;;  %v6881_v30 = vld [vmem:[#allocation2 + $0x4c8] sm:$0xff] }
 0x324   :  { %3186 = vmatprep.subr.mxu1 %v6545_v32  ;;  %3263 = vmatprep.subr.mxu0 %v6545_v32  ;;  %v6885_v32 = vld [vmem:[#allocation2 + $0x4c0] sm:$0xff] }
 0x325   :  { %3187 = vmatpush1.msra.mxu1 %v6549_v17  ;;  %3264 = vmatpush1.msra.mxu0 %v6549_v17  ;;  %v6889_v17 = vld [vmem:[#allocation2 + $0x4b8] sm:$0xff] }
 0x326   :  { %3188 = vmatprep.subr.mxu1 %v6553_v35  ;;  %3265 = vmatprep.subr.mxu0 %v6553_v35  ;;  %v6893_v35 = vld [vmem:[#allocation2 + $0x4b0] sm:$0xff] }
 0x327   :  { %3189 = vmatpush1.msra.mxu1 %v6557_v19  ;;  %3266 = vmatpush1.msra.mxu0 %v6557_v19  ;;  %v6897_v19 = vld [vmem:[#allocation2 + $0x4a8] sm:$0xff] }
 0x328   :  { %3190 = vmatprep.subr.mxu1 %v6561_v33  ;;  %3267 = vmatprep.subr.mxu0 %v6561_v33  ;;  %v6901_v33 = vld [vmem:[#allocation2 + $0x4a0] sm:$0xff] }
 0x329   :  { %3191 = vmatpush1.msra.mxu1 %v6565_v31  ;;  %3268 = vmatpush1.msra.mxu0 %v6565_v31  ;;  %v6903_v31 = vpop.f32.mrf.mxu1 }
 0x32a   :  { %3192 = vmatprep.subr.mxu1 %v6569_v18  ;;  %3269 = vmatprep.subr.mxu0 %v6569_v18  ;;  %v6905_v18 = vpop.f32.mrf.mxu0 }
 0x32b   :  { %3193 = vmatpush1.msra.mxu1 %v6573_v11  ;;  %3270 = vmatpush1.msra.mxu0 %v6573_v11  ;;  %v6909_v11 = vld [vmem:[#allocation2 + $0x498] sm:$0xff] }
 0x32c   :  { %3194 = vmatprep.subr.mxu1 %v6577_v15  ;;  %3271 = vmatprep.subr.mxu0 %v6577_v15  ;;  %v6913_v15 = vld [vmem:[#allocation2 + $0x490] sm:$0xff] }
 0x32d   :  { %3195 = vmatpush1.msra.mxu1 %v6581_v27  ;;  %3272 = vmatpush1.msra.mxu0 %v6581_v27  ;;  %v6917_v27 = vld [vmem:[#allocation2 + $0x488] sm:$0xff] }
 0x32e   :  { %3196 = vmatprep.subr.mxu1 %v6585_v28  ;;  %3273 = vmatprep.subr.mxu0 %v6585_v28  ;;  %v6921_v28 = vld [vmem:[#allocation2 + $0x480] sm:$0xff] }
 0x32f   :  { %3197 = vmatpush1.msra.mxu1 %v6589_v7  ;;  %3274 = vmatpush1.msra.mxu0 %v6589_v7  ;;  %v6923_v7 = vpop.f32.mrf.mxu1 }
 0x330   :  { %3198 = vmatprep.subr.mxu1 %v6593_v8  ;;  %3275 = vmatprep.subr.mxu0 %v6593_v8  ;;  %7681 = vst [vmem:[#allocation25_spill] sm:$0xff] %v6923_v7  ;;  %v6925_v8 = vpop.f32.mrf.mxu0 }
 0x331   :  { %3199 = vmatpush1.msra.mxu1 %v6597_v25  ;;  %3276 = vmatpush1.msra.mxu0 %v6597_v25  ;;  %7682 = vst [vmem:[#allocation26_spill] sm:$0xff] %v6925_v8  ;;  %v6929_v25 = vld [vmem:[#allocation2 + $0x478] sm:$0xff] }
 0x332   :  { %3200 = vmatprep.subr.mxu1 %v6601_v20  ;;  %3277 = vmatprep.subr.mxu0 %v6601_v20  ;;  %v6933_v20 = vld [vmem:[#allocation2 + $0x470] sm:$0xff] }
 0x333   :  { %3201 = vmatpush1.msra.mxu1 %v6605_v10  ;;  %3278 = vmatpush1.msra.mxu0 %v6605_v10  ;;  %v6935_v10 = vpop.f32.mrf.mxu1 }
 0x334   :  { %3202 = vmatprep.subr.mxu1 %v6609_v43  ;;  %3279 = vmatprep.subr.mxu0 %v6609_v43  ;;  %7683 = vst [vmem:[#allocation27_spill] sm:$0xff] %v6935_v10  ;;  %v6937_v43 = vpop.f32.mrf.mxu0 }
 0x335   :  { %3203 = vmatpush1.msra.mxu1 %v6613_v4  ;;  %3280 = vmatpush1.msra.mxu0 %v6613_v4  ;;  %7684 = vst [vmem:[#allocation28_spill] sm:$0xff] %v6937_v43  ;;  %v6941_v4 = vld [vmem:[#allocation2 + $0x468] sm:$0xff] }
 0x336   :  { %3204 = vmatprep.subr.mxu1 %v6619_v2  ;;  %3281 = vmatprep.subr.mxu0 %v6619_v2  ;;  %v6945_v2 = vld [vmem:[#allocation2 + $0x460] sm:$0xff] }
 0x337   :  { %3205 = vmatpush1.msra.mxu1 %v6623_v45  ;;  %3282 = vmatpush1.msra.mxu0 %v6623_v45  ;;  %v6953_v45 = vld [vmem:[#allocation2 + $0x450] sm:$0xff] }
 0x338   :  { %3206 = vmatprep.subr.mxu1 %v6629_v50  ;;  %3283 = vmatprep.subr.mxu0 %v6629_v50  ;;  %v6955_v50 = vpop.f32.mrf.mxu1 }
 0x339   :  { %3207 = vmatpush1.msra.mxu1 %v6633_v34  ;;  %3284 = vmatpush1.msra.mxu0 %v6633_v34  ;;  %7685 = vst [vmem:[#allocation29_spill] sm:$0xff] %v6955_v50  ;;  %v6957_v34 = vpop.f32.mrf.mxu0  ;;  %v6983_v50 = vld [vmem:[#allocation2 + $0x428] sm:$0xff] }
 0x33a   :  { %3208 = vmatprep.subr.mxu1 %v6637_v51  ;;  %3285 = vmatprep.subr.mxu0 %v6637_v51  ;;  %7686 = vst [vmem:[#allocation31_spill] sm:$0xff] %v6957_v34  ;;  %v6961_v51 = vld [vmem:[#allocation2 + $0x448] sm:$0xff] }
 0x33b   :  { %3209 = vmatpush1.msra.mxu1 %v6641_v47  ;;  %3242 = vmatprep.mubr.f32.mxu1 %v7636_v16 }
 0x33c   :  { %3286 = vmatpush1.msra.mxu0 %v6641_v47  ;;  %3319 = vmatprep.mubr.f32.mxu0 %v7636_v16  ;;  %v6965_v47 = vld [vmem:[#allocation2 + $0x440] sm:$0xff] }
 0x33d   :  { %3243 = vmatmul.mubr.f32.vlgmr.msra.gmra.mxu1 %v7679_v57  ;;  %3320 = vmatmul.mubr.f32.vlgmr.msra.gmra.mxu0 %v7680_v58 }
 0x33e   :  { %3361 = vmatprep.subr.mxu1 %v6857_v55  ;;  %3434 = vmatprep.subr.mxu0 %v6857_v55 }
 0x33f   :  { %3362 = vmatpush1.msra.mxu1 %v6861_v56  ;;  %3435 = vmatpush1.msra.mxu0 %v6861_v56 }
 0x340   :  { %3363 = vmatprep.subr.mxu1 %v6865_v59  ;;  %3436 = vmatprep.subr.mxu0 %v6865_v59 }
 0x341   :  { %3364 = vmatpush1.msra.mxu1 %v6869_v60  ;;  %3437 = vmatpush1.msra.mxu0 %v6869_v60 }
 0x342   :  { %3365 = vmatprep.subr.mxu1 %v6873_v63  ;;  %3438 = vmatprep.subr.mxu0 %v6873_v63 }
 0x343   :  { %3366 = vmatpush1.msra.mxu1 %v6877_v1  ;;  %3439 = vmatpush1.msra.mxu0 %v6877_v1 }
 0x344   :  { %3367 = vmatprep.subr.mxu1 %v6881_v30  ;;  %3440 = vmatprep.subr.mxu0 %v6881_v30 }
 0x345   :  { %3368 = vmatpush1.msra.mxu1 %v6885_v32  ;;  %3441 = vmatpush1.msra.mxu0 %v6885_v32 }
 0x346   :  { %3369 = vmatprep.subr.mxu1 %v6889_v17  ;;  %3442 = vmatprep.subr.mxu0 %v6889_v17 }
 0x347   :  { %3370 = vmatpush1.msra.mxu1 %v6893_v35  ;;  %3443 = vmatpush1.msra.mxu0 %v6893_v35 }
 0x348   :  { %3371 = vmatprep.subr.mxu1 %v6897_v19  ;;  %3444 = vmatprep.subr.mxu0 %v6897_v19 }
 0x349   :  { %3372 = vmatpush1.msra.mxu1 %v6901_v33  ;;  %3445 = vmatpush1.msra.mxu0 %v6901_v33 }
 0x34a   :  { %3373 = vmatprep.subr.mxu1 %v6909_v11  ;;  %3446 = vmatprep.subr.mxu0 %v6909_v11 }
 0x34b   :  { %3374 = vmatpush1.msra.mxu1 %v6913_v15  ;;  %3447 = vmatpush1.msra.mxu0 %v6913_v15 }
 0x34c   :  { %3375 = vmatprep.subr.mxu1 %v6917_v27  ;;  %3448 = vmatprep.subr.mxu0 %v6917_v27 }
 0x34d   :  { %3376 = vmatpush1.msra.mxu1 %v6921_v28  ;;  %3449 = vmatpush1.msra.mxu0 %v6921_v28 }
 0x34e   :  { %3377 = vmatprep.subr.mxu1 %v6929_v25  ;;  %3450 = vmatprep.subr.mxu0 %v6929_v25 }
 0x34f   :  { %3378 = vmatpush1.msra.mxu1 %v6933_v20  ;;  %3451 = vmatpush1.msra.mxu0 %v6933_v20 }
 0x350   :  { %3379 = vmatprep.subr.mxu1 %v6941_v4  ;;  %3452 = vmatprep.subr.mxu0 %v6941_v4 }
 0x351   :  { %3380 = vmatpush1.msra.mxu1 %v6945_v2  ;;  %3453 = vmatpush1.msra.mxu0 %v6945_v2 }
 0x352   :  { %3381 = vmatprep.subr.mxu1 %v6949_v36  ;;  %3454 = vmatprep.subr.mxu0 %v6949_v36 }
 0x353   :  { %3382 = vmatpush1.msra.mxu1 %v6953_v45  ;;  %3455 = vmatpush1.msra.mxu0 %v6953_v45  ;;  %v2477_v23 = vpop.f32.mrf.mxu1  ;;  %v2550_v37 = vpop.f32.mrf.mxu0 }
 0x354   :  { %3383 = vmatprep.subr.mxu1 %v6961_v51  ;;  %3456 = vmatprep.subr.mxu0 %v6961_v51  ;;  %v6976_v34 = vadd.f32 %v2477_v23, %v6419_v49  ;;  %v6979_v38 = vadd.f32 %v2550_v37, %v6491_v53  ;;  %v6997_v23 = vld [vmem:[#allocation2 + $0x418] sm:$0xff]  ;;  %v7001_v37 = vld [vmem:[#allocation2 + $0x410] sm:$0xff] }
 0x355   :  { %3384 = vmatpush1.msra.mxu1 %v6965_v47  ;;  %3457 = vmatpush1.msra.mxu0 %v6965_v47  ;;  %v2479_v0 = vpop.f32.mrf.mxu1  ;;  %v2552_v43 = vpop.f32.mrf.mxu0 }
 0x356   :  { %3385 = vmatprep.subr.mxu1 %v6969_v21  ;;  %3458 = vmatprep.subr.mxu0 %v6969_v21  ;;  %v6990_v49 = vadd.f32 %v2479_v0, %v6425_v12  ;;  %v6993_v53 = vadd.f32 %v2552_v43, %v6497_v54  ;;  %v7005_v0 = vld [vmem:[#allocation2 + $0x408] sm:$0xff]  ;;  %v7009_v12 = vld [vmem:[#allocation2 + $0x400] sm:$0xff] }
 0x357   :  { %3386 = vmatpush1.msra.mxu1 %v6973_v9  ;;  %3459 = vmatpush1.msra.mxu0 %v6973_v9 }
 0x358   :  { %3387 = vmatprep.subr.mxu1 %v6983_v50  ;;  %3460 = vmatprep.subr.mxu0 %v6983_v50 }
 0x359   :  { %3388 = vmatpush1.msra.mxu1 %v6987_v39  ;;  %3461 = vmatpush1.msra.mxu0 %v6987_v39 }
 0x35a   :  { %3389 = vmatprep.subr.mxu1 %v6997_v23  ;;  %3462 = vmatprep.subr.mxu0 %v6997_v23 }
 0x35b   :  { %3390 = vmatpush1.msra.mxu1 %v7001_v37  ;;  %3463 = vmatpush1.msra.mxu0 %v7001_v37 }
 0x35c   :  { %3391 = vmatprep.subr.mxu1 %v7005_v0  ;;  %3464 = vmatprep.subr.mxu0 %v7005_v0 }
 0x35d   :  { %3392 = vmatpush1.msra.mxu1 %v7009_v12  ;;  %3425 = vmatprep.mubr.f32.mxu1 %v7636_v16 }
 0x35e   :  { %3465 = vmatpush1.msra.mxu0 %v7009_v12  ;;  %3498 = vmatprep.mubr.f32.mxu0 %v7636_v16 }
 0x35f   :  { %3426 = vmatmul.mubr.f32.vlgmr.msra.gmra.mxu1 %v7677_v6  ;;  %3499 = vmatmul.mubr.f32.vlgmr.msra.gmra.mxu0 %v7678_v44 }
 0x360   :  { %3507 = vmatprep.subr.mxu1 %v6857_v55  ;;  %3580 = vmatprep.subr.mxu0 %v6857_v55 }
 0x361   :  { %3508 = vmatpush1.msra.mxu1 %v6861_v56  ;;  %3581 = vmatpush1.msra.mxu0 %v6861_v56 }
 0x362   :  { %3509 = vmatprep.subr.mxu1 %v6865_v59  ;;  %3582 = vmatprep.subr.mxu0 %v6865_v59 }
 0x363   :  { %3510 = vmatpush1.msra.mxu1 %v6869_v60  ;;  %3583 = vmatpush1.msra.mxu0 %v6869_v60 }
 0x364   :  { %3511 = vmatprep.subr.mxu1 %v6873_v63  ;;  %3584 = vmatprep.subr.mxu0 %v6873_v63 }
 0x365   :  { %3512 = vmatpush1.msra.mxu1 %v6877_v1  ;;  %3585 = vmatpush1.msra.mxu0 %v6877_v1 }
 0x366   :  { %3513 = vmatprep.subr.mxu1 %v6881_v30  ;;  %3586 = vmatprep.subr.mxu0 %v6881_v30 }
 0x367   :  { %3514 = vmatpush1.msra.mxu1 %v6885_v32  ;;  %3587 = vmatpush1.msra.mxu0 %v6885_v32 }
 0x368   :  { %3515 = vmatprep.subr.mxu1 %v6889_v17  ;;  %3588 = vmatprep.subr.mxu0 %v6889_v17 }
 0x369   :  { %3516 = vmatpush1.msra.mxu1 %v6893_v35  ;;  %3589 = vmatpush1.msra.mxu0 %v6893_v35 }
 0x36a   :  { %3517 = vmatprep.subr.mxu1 %v6897_v19  ;;  %3590 = vmatprep.subr.mxu0 %v6897_v19 }
 0x36b   :  { %3518 = vmatpush1.msra.mxu1 %v6901_v33  ;;  %3591 = vmatpush1.msra.mxu0 %v6901_v33 }
 0x36c   :  { %3519 = vmatprep.subr.mxu1 %v6909_v11  ;;  %3592 = vmatprep.subr.mxu0 %v6909_v11 }
 0x36d   :  { %3520 = vmatpush1.msra.mxu1 %v6913_v15  ;;  %3593 = vmatpush1.msra.mxu0 %v6913_v15 }
 0x36e   :  { %3521 = vmatprep.subr.mxu1 %v6917_v27  ;;  %3594 = vmatprep.subr.mxu0 %v6917_v27 }
 0x36f   :  { %3522 = vmatpush1.msra.mxu1 %v6921_v28  ;;  %3595 = vmatpush1.msra.mxu0 %v6921_v28 }
 0x370   :  { %3523 = vmatprep.subr.mxu1 %v6929_v25  ;;  %3596 = vmatprep.subr.mxu0 %v6929_v25 }
 0x371   :  { %3524 = vmatpush1.msra.mxu1 %v6933_v20  ;;  %3597 = vmatpush1.msra.mxu0 %v6933_v20 }
 0x372   :  { %3525 = vmatprep.subr.mxu1 %v6941_v4  ;;  %3598 = vmatprep.subr.mxu0 %v6941_v4 }
 0x373   :  { %3526 = vmatpush1.msra.mxu1 %v6945_v2  ;;  %3599 = vmatpush1.msra.mxu0 %v6945_v2 }
 0x374   :  { %3527 = vmatprep.subr.mxu1 %v6949_v36  ;;  %3600 = vmatprep.subr.mxu0 %v6949_v36 }
 0x375   :  { %3528 = vmatpush1.msra.mxu1 %v6953_v45  ;;  %3601 = vmatpush1.msra.mxu0 %v6953_v45  ;;  %v2623_v6 = vpop.f32.mrf.mxu1  ;;  %v2700_v44 = vpop.f32.mrf.mxu0 }
 0x376   :  { %3529 = vmatprep.subr.mxu1 %v6961_v51  ;;  %3602 = vmatprep.subr.mxu0 %v6961_v51  ;;  %v7068_v54 = vadd.f32 %v2623_v6, %v6615_v3  ;;  %v7071_v43 = vadd.f32 %v2700_v44, %v6699_v42  ;;  %v4006_v3 = vld [vmem:[#allocation5 + $0xe8] sm:$0xff]  ;;  %v4005_v42 = vld [vmem:[#allocation5 + $0xe0] sm:$0xff] }
 0x377   :  { %3530 = vmatpush1.msra.mxu1 %v6965_v47  ;;  %3603 = vmatpush1.msra.mxu0 %v6965_v47  ;;  %v2625_v10 = vpop.f32.mrf.mxu1  ;;  %v2702_v29 = vpop.f32.mrf.mxu0  ;;  %v3977_v6 = vld [vmem:[#allocation5 + $0x8] sm:$0xff]  ;;  %v3993_v44 = vld [vmem:[#allocation5 + $0x80] sm:$0xff] }
 0x378   :  { %3531 = vmatprep.subr.mxu1 %v6969_v21  ;;  %3604 = vmatprep.subr.mxu0 %v6969_v21  ;;  %v7078_v8 = vadd.f32 %v2625_v10, %v6625_v48  ;;  %v7081_v7 = vadd.f32 %v2702_v29, %v6705_v41  ;;  %v3990_v29 = vld [vmem:[#allocation5 + $0x70] sm:$0xff]  ;;  %v3988_v48 = vld [vmem:[#allocation5 + $0x60] sm:$0xff]  ;;  %v3987_v41 = vld [vmem:[#allocation5 + $0x58] sm:$0xff] }
 0x379   :  { %3532 = vmatpush1.msra.mxu1 %v6973_v9  ;;  %3605 = vmatpush1.msra.mxu0 %v6973_v9 }
 0x37a   :  { %3533 = vmatprep.subr.mxu1 %v6983_v50  ;;  %3606 = vmatprep.subr.mxu0 %v6983_v50 }
 0x37b   :  { %3534 = vmatpush1.msra.mxu1 %v6987_v39  ;;  %3607 = vmatpush1.msra.mxu0 %v6987_v39 }
 0x37c   :  { %3535 = vmatprep.subr.mxu1 %v6997_v23  ;;  %3608 = vmatprep.subr.mxu0 %v6997_v23 }
 0x37d   :  { %3536 = vmatpush1.msra.mxu1 %v7001_v37  ;;  %3609 = vmatpush1.msra.mxu0 %v7001_v37 }
 0x37e   :  { %3537 = vmatprep.subr.mxu1 %v7005_v0  ;;  %3610 = vmatprep.subr.mxu0 %v7005_v0 }
 0x37f   :  { %3538 = vmatpush1.msra.mxu1 %v7009_v12  ;;  %3571 = vmatprep.mubr.f32.mxu1 %v7636_v16 }
 0x380   :  { %3611 = vmatpush1.msra.mxu0 %v7009_v12  ;;  %3644 = vmatprep.mubr.f32.mxu0 %v7636_v16 }
 0x381   :  { %3572 = vmatmul.mubr.f32.vlgmr.msra.gmra.mxu1 %v7662_v46  ;;  %3645 = vmatmul.mubr.f32.vlgmr.msra.gmra.mxu0 %v7666_v40  ;;  %v3991_v40 = vld [vmem:[#allocation5 + $0x78] sm:$0xff] }
 0x382   :  { %3653 = vmatprep.subr.mxu1 %v6857_v55  ;;  %3726 = vmatprep.subr.mxu0 %v6857_v55  ;;  %v7687_v46 = vld [vmem:[#allocation63_spill] sm:$0xff] }
 0x383   :  { %3654 = vmatpush1.msra.mxu1 %v6861_v56  ;;  %3727 = vmatpush1.msra.mxu0 %v6861_v56 }
 0x384   :  { %3655 = vmatprep.subr.mxu1 %v6865_v59  ;;  %3728 = vmatprep.subr.mxu0 %v6865_v59 }
 0x385   :  { %3656 = vmatpush1.msra.mxu1 %v6869_v60  ;;  %3729 = vmatpush1.msra.mxu0 %v6869_v60 }
 0x386   :  { %3657 = vmatprep.subr.mxu1 %v6873_v63  ;;  %3730 = vmatprep.subr.mxu0 %v6873_v63 }
 0x387   :  { %3658 = vmatpush1.msra.mxu1 %v6877_v1  ;;  %3731 = vmatpush1.msra.mxu0 %v6877_v1 }
 0x388   :  { %3659 = vmatprep.subr.mxu1 %v6881_v30  ;;  %3732 = vmatprep.subr.mxu0 %v6881_v30 }
 0x389   :  { %3660 = vmatpush1.msra.mxu1 %v6885_v32  ;;  %3733 = vmatpush1.msra.mxu0 %v6885_v32 }
 0x38a   :  { %3661 = vmatprep.subr.mxu1 %v6889_v17  ;;  %3734 = vmatprep.subr.mxu0 %v6889_v17 }
 0x38b   :  { %3662 = vmatpush1.msra.mxu1 %v6893_v35  ;;  %3735 = vmatpush1.msra.mxu0 %v6893_v35 }
 0x38c   :  { %3663 = vmatprep.subr.mxu1 %v6897_v19  ;;  %3736 = vmatprep.subr.mxu0 %v6897_v19 }
 0x38d   :  { %3664 = vmatpush1.msra.mxu1 %v6901_v33  ;;  %3737 = vmatpush1.msra.mxu0 %v6901_v33 }
 0x38e   :  { %3665 = vmatprep.subr.mxu1 %v6909_v11  ;;  %3738 = vmatprep.subr.mxu0 %v6909_v11 }
 0x38f   :  { %3666 = vmatpush1.msra.mxu1 %v6913_v15  ;;  %3739 = vmatpush1.msra.mxu0 %v6913_v15 }
 0x390   :  { %3667 = vmatprep.subr.mxu1 %v6917_v27  ;;  %3740 = vmatprep.subr.mxu0 %v6917_v27 }
 0x391   :  { %3668 = vmatpush1.msra.mxu1 %v6921_v28  ;;  %3741 = vmatpush1.msra.mxu0 %v6921_v28 }
 0x392   :  { %3669 = vmatprep.subr.mxu1 %v6929_v25  ;;  %3742 = vmatprep.subr.mxu0 %v6929_v25 }
 0x393   :  { %3670 = vmatpush1.msra.mxu1 %v6933_v20  ;;  %3743 = vmatpush1.msra.mxu0 %v6933_v20 }
 0x394   :  { %3671 = vmatprep.subr.mxu1 %v6941_v4  ;;  %3744 = vmatprep.subr.mxu0 %v6941_v4 }
 0x395   :  { %3672 = vmatpush1.msra.mxu1 %v6945_v2  ;;  %3745 = vmatpush1.msra.mxu0 %v6945_v2 }
 0x396   :  { %3673 = vmatprep.subr.mxu1 %v6949_v36  ;;  %3746 = vmatprep.subr.mxu0 %v6949_v36 }
 0x397   :  { %3674 = vmatpush1.msra.mxu1 %v6953_v45  ;;  %3747 = vmatpush1.msra.mxu0 %v6953_v45 }
 0x398   :  { %3675 = vmatprep.subr.mxu1 %v6961_v51  ;;  %3748 = vmatprep.subr.mxu0 %v6961_v51 }
 0x399   :  { %3676 = vmatpush1.msra.mxu1 %v6965_v47  ;;  %3749 = vmatpush1.msra.mxu0 %v6965_v47 }
 0x39a   :  { %3677 = vmatprep.subr.mxu1 %v6969_v21  ;;  %3750 = vmatprep.subr.mxu0 %v6969_v21 }
 0x39b   :  { %3678 = vmatpush1.msra.mxu1 %v6973_v9  ;;  %3751 = vmatpush1.msra.mxu0 %v6973_v9 }
 0x39c   :  { %3679 = vmatprep.subr.mxu1 %v6983_v50  ;;  %3752 = vmatprep.subr.mxu0 %v6983_v50 }
 0x39d   :  { %3680 = vmatpush1.msra.mxu1 %v6987_v39  ;;  %3753 = vmatpush1.msra.mxu0 %v6987_v39 }
 0x39e   :  { %3681 = vmatprep.subr.mxu1 %v6997_v23  ;;  %3754 = vmatprep.subr.mxu0 %v6997_v23 }
 0x39f   :  { %3682 = vmatpush1.msra.mxu1 %v7001_v37  ;;  %3755 = vmatpush1.msra.mxu0 %v7001_v37 }
 0x3a0   :  { %3683 = vmatprep.subr.mxu1 %v7005_v0  ;;  %3756 = vmatprep.subr.mxu0 %v7005_v0 }
 0x3a1   :  { %3684 = vmatpush1.msra.mxu1 %v7009_v12  ;;  %3717 = vmatprep.mubr.f32.mxu1 %v7636_v16 }
 0x3a2   :  { %3757 = vmatpush1.msra.mxu0 %v7009_v12  ;;  %3790 = vmatprep.mubr.f32.mxu0 %v7636_v16 }
 0x3a3   :  { %3718 = vmatmul.mubr.f32.vlgmr.msra.gmra.mxu1 %v7670_v52  ;;  %3791 = vmatmul.mubr.f32.vlgmr.msra.gmra.mxu0 %v7679_v57  ;;  %v4008_v52 = vld [vmem:[#allocation5 + $0xf8] sm:$0xff]  ;;  %v3989_v57 = vld [vmem:[#allocation5 + $0x68] sm:$0xff] }
 0x3a4   :  { %3799 = vmatprep.subr.mxu1 %v6857_v55  ;;  %3876 = vmatprep.subr.mxu0 %v6857_v55  ;;  %v4004_v55 = vld [vmem:[#allocation5 + $0xd8] sm:$0xff] }
 0x3a5   :  { %3800 = vmatpush1.msra.mxu1 %v6861_v56  ;;  %3877 = vmatpush1.msra.mxu0 %v6861_v56  ;;  %v3986_v56 = vld [vmem:[#allocation5 + $0x50] sm:$0xff] }
 0x3a6   :  { %3801 = vmatprep.subr.mxu1 %v6865_v59  ;;  %3878 = vmatprep.subr.mxu0 %v6865_v59  ;;  %v7250_v59 = vpop.f32.mrf.mxu0 }
 0x3a7   :  { %3802 = vmatpush1.msra.mxu1 %v6869_v60  ;;  %3879 = vmatpush1.msra.mxu0 %v6869_v60  ;;  %v4003_v60 = vld [vmem:[#allocation5 + $0xd0] sm:$0xff] }
 0x3a8   :  { %3803 = vmatprep.subr.mxu1 %v6873_v63  ;;  %3880 = vmatprep.subr.mxu0 %v6873_v63  ;;  %v3985_v63 = vld [vmem:[#allocation5 + $0x48] sm:$0xff] }
 0x3a9   :  { %3804 = vmatpush1.msra.mxu1 %v6877_v1  ;;  %3881 = vmatpush1.msra.mxu0 %v6877_v1  ;;  %v4002_v1 = vld [vmem:[#allocation5 + $0xc8] sm:$0xff] }
 0x3aa   :  { %3805 = vmatprep.subr.mxu1 %v6881_v30  ;;  %3882 = vmatprep.subr.mxu0 %v6881_v30  ;;  %v3984_v30 = vld [vmem:[#allocation5 + $0x40] sm:$0xff] }
 0x3ab   :  { %3806 = vmatpush1.msra.mxu1 %v6885_v32  ;;  %3883 = vmatpush1.msra.mxu0 %v6885_v32 }
 0x3ac   :  { %3807 = vmatprep.subr.mxu1 %v6889_v17  ;;  %3884 = vmatprep.subr.mxu0 %v6889_v17  ;;  %v7258_v17 = vpop.f32.mrf.mxu0 }
 0x3ad   :  { %3808 = vmatpush1.msra.mxu1 %v6893_v35  ;;  %3885 = vmatpush1.msra.mxu0 %v6893_v35  ;;  %v4001_v35 = vld [vmem:[#allocation5 + $0xc0] sm:$0xff] }
 0x3ae   :  { %3809 = vmatprep.subr.mxu1 %v6897_v19  ;;  %3886 = vmatprep.subr.mxu0 %v6897_v19  ;;  %v3983_v19 = vld [vmem:[#allocation5 + $0x38] sm:$0xff] }
 0x3af   :  { %3810 = vmatpush1.msra.mxu1 %v6901_v33  ;;  %3887 = vmatpush1.msra.mxu0 %v6901_v33 }
 0x3b0   :  { %3811 = vmatprep.subr.mxu1 %v6909_v11  ;;  %3888 = vmatprep.subr.mxu0 %v6909_v11 }
 0x3b1   :  { %3812 = vmatpush1.msra.mxu1 %v6913_v15  ;;  %3889 = vmatpush1.msra.mxu0 %v6913_v15  ;;  %v4000_v15 = vld [vmem:[#allocation5 + $0xb8] sm:$0xff] }
 0x3b2   :  { %3813 = vmatprep.subr.mxu1 %v6917_v27  ;;  %3890 = vmatprep.subr.mxu0 %v6917_v27  ;;  %v3982_v27 = vld [vmem:[#allocation5 + $0x30] sm:$0xff] }
 0x3b3   :  { %3814 = vmatpush1.msra.mxu1 %v6921_v28  ;;  %3891 = vmatpush1.msra.mxu0 %v6921_v28  ;;  %v3999_v28 = vld [vmem:[#allocation5 + $0xb0] sm:$0xff] }
 0x3b4   :  { %3815 = vmatprep.subr.mxu1 %v6929_v25  ;;  %3892 = vmatprep.subr.mxu0 %v6929_v25  ;;  %v3981_v25 = vld [vmem:[#allocation5 + $0x28] sm:$0xff] }
 0x3b5   :  { %3816 = vmatpush1.msra.mxu1 %v6933_v20  ;;  %3893 = vmatpush1.msra.mxu0 %v6933_v20 }
 0x3b6   :  { %3817 = vmatprep.subr.mxu1 %v6941_v4  ;;  %3894 = vmatprep.subr.mxu0 %v6941_v4  ;;  %v3998_v4 = vld [vmem:[#allocation5 + $0xa8] sm:$0xff] }
 0x3b7   :  { %3818 = vmatpush1.msra.mxu1 %v6945_v2  ;;  %3895 = vmatpush1.msra.mxu0 %v6945_v2  ;;  %v3980_v2 = vld [vmem:[#allocation5 + $0x20] sm:$0xff] }
 0x3b8   :  { %3819 = vmatprep.subr.mxu1 %v6949_v36  ;;  %3896 = vmatprep.subr.mxu0 %v6949_v36 }
 0x3b9   :  { %3820 = vmatpush1.msra.mxu1 %v6953_v45  ;;  %3897 = vmatpush1.msra.mxu0 %v6953_v45  ;;  %v7264_v11 = vpop.f32.mrf.mxu0 }
 0x3ba   :  { %3821 = vmatprep.subr.mxu1 %v6961_v51  ;;  %3898 = vmatprep.subr.mxu0 %v6961_v51 }
 0x3bb   :  { %3822 = vmatpush1.msra.mxu1 %v6965_v47  ;;  %3899 = vmatpush1.msra.mxu0 %v6965_v47  ;;  %v7272_v10 = vpop.f32.mrf.mxu0 }
 0x3bc   :  { %3823 = vmatprep.subr.mxu1 %v6969_v21  ;;  %3900 = vmatprep.subr.mxu0 %v6969_v21  ;;  %v3979_v21 = vld [vmem:[#allocation5 + $0x18] sm:$0xff] }
 0x3bd   :  { %3824 = vmatpush1.msra.mxu1 %v6973_v9  ;;  %3901 = vmatpush1.msra.mxu0 %v6973_v9 }
 0x3be   :  { %3825 = vmatprep.subr.mxu1 %v6983_v50  ;;  %3902 = vmatprep.subr.mxu0 %v6983_v50  ;;  %v3997_v50 = vld [vmem:[#allocation5 + $0xa0] sm:$0xff] }
 0x3bf   :  { %3826 = vmatpush1.msra.mxu1 %v6987_v39  ;;  %3903 = vmatpush1.msra.mxu0 %v6987_v39  ;;  %v4007_v39 = vld [vmem:[#allocation5 + $0xf0] sm:$0xff] }
 0x3c0   :  { %3827 = vmatprep.subr.mxu1 %v6997_v23  ;;  %3904 = vmatprep.subr.mxu0 %v6997_v23 }
 0x3c1   :  { %3828 = vmatpush1.msra.mxu1 %v7001_v37  ;;  %3905 = vmatpush1.msra.mxu0 %v7001_v37  ;;  %v3996_v37 = vld [vmem:[#allocation5 + $0x98] sm:$0xff] }
 0x3c2   :  { %3829 = vmatprep.subr.mxu1 %v7005_v0  ;;  %3906 = vmatprep.subr.mxu0 %v7005_v0 }
 0x3c3   :  { %3830 = vmatpush1.msra.mxu1 %v7009_v12  ;;  %3863 = vmatprep.mubr.f32.mxu1 %v7636_v16 }
 0x3c4   :  { %3907 = vmatpush1.msra.mxu0 %v7009_v12  ;;  %3940 = vmatprep.mubr.f32.mxu0 %v7636_v16 }
 0x3c5   :  { %3864 = vmatmul.mubr.f32.vlgmr.msra.gmra.mxu1 %v7680_v58  ;;  %3941 = vmatmul.mubr.f32.vlgmr.msra.gmra.mxu0 %v7687_v46  ;;  %v7248_v58 = vpop.f32.mrf.mxu1 }
 0x3c6   :  { %4643 = vmatprep.subr.mxu0 %v7636_v16  ;;  %4675 = vmatprep.mubr.msk.f32.mxu0 %vm4955_vm6, %v7636_v16 }
 0x3c7   :  { %4644 = vmatpush3.msra.mxu0 %v3991_v40  ;;  %4608 = vmatprep.subr.mxu1 %v7636_v16  ;;  %v7256_v32 = vpop.f32.mrf.mxu1 }
 0x3c8   :  { %4645 = vmatprep.subr.mxu0 %v7636_v16  ;;  %4609 = vmatpush3.msra.mxu1 %v4008_v52 }
 0x3c9   :  { %4646 = vmatpush3.msra.mxu0 %v3990_v29  ;;  %4610 = vmatprep.subr.mxu1 %v7636_v16  ;;  %v7262_v33 = vpop.f32.mrf.mxu1 }
 0x3ca   :  { %4647 = vmatprep.subr.mxu0 %v7636_v16  ;;  %4611 = vmatpush3.msra.mxu1 %v4007_v39 }
 0x3cb   :  { %4648 = vmatpush3.msra.mxu0 %v3989_v57  ;;  %4612 = vmatprep.subr.mxu1 %v7636_v16  ;;  %v7270_v20 = vpop.f32.mrf.mxu1 }
 0x3cc   :  { %4649 = vmatprep.subr.mxu0 %v7636_v16  ;;  %4613 = vmatpush3.msra.mxu1 %v4006_v3 }
 0x3cd   :  { %4650 = vmatpush3.msra.mxu0 %v3988_v48  ;;  %4614 = vmatprep.subr.mxu1 %v7636_v16 }
 0x3ce   :  { %4651 = vmatprep.subr.mxu0 %v7636_v16  ;;  %4615 = vmatpush3.msra.mxu1 %v4005_v42  ;;  %v1058_v42 = vadd.f32 %v6193_v62, %v6191_v61 }
 0x3cf   :  { %4652 = vmatpush3.msra.mxu0 %v3987_v41  ;;  %4616 = vmatprep.subr.mxu1 %v7636_v16  ;;  %v1060_v41 = vadd.f32 %v6213_v24, %v6211_v22 }
 0x3d0   :  { %4653 = vmatprep.subr.mxu0 %v7636_v16  ;;  %4617 = vmatpush3.msra.mxu1 %v4004_v55  ;;  %v2190_v55 = vadd.f32 %v6903_v31, %v1058_v42  ;;  %v4242_v42 = vld [vmem:[#allocation5 + $0x1a0] sm:$0xff] }
 0x3d1   :  { %4654 = vmatpush3.msra.mxu0 %v3986_v56  ;;  %4618 = vmatprep.subr.mxu1 %v7636_v16  ;;  %v7688_v56 = vld [vmem:[#allocation25_spill] sm:$0xff] }
 0x3d2   :  { %4655 = vmatprep.subr.mxu0 %v7636_v16  ;;  %4619 = vmatpush3.msra.mxu1 %v4003_v60  ;;  %v2191_v60 = vadd.f32 %v7688_v56, %v1060_v41  ;;  %v2811_v61 = vadd.f32 %v7248_v58, %v2190_v55 }
 0x3d3   :  { %4656 = vmatpush3.msra.mxu0 %v3985_v63  ;;  %4620 = vmatprep.subr.mxu1 %v7636_v16 }
 0x3d4   :  { %4657 = vmatprep.subr.mxu0 %v7636_v16  ;;  %4621 = vmatpush3.msra.mxu1 %v4002_v1  ;;  %v2812_v22 = vadd.f32 %v7256_v32, %v2191_v60  ;;  %v4253_v32 = vld [vmem:[#allocation5 + $0x1f8] sm:$0xff] }
 0x3d5   :  { %4658 = vmatpush3.msra.mxu0 %v3984_v30  ;;  %4622 = vmatprep.subr.mxu1 %v7636_v16  ;;  %v4241_v60 = vld [vmem:[#allocation5 + $0x198] sm:$0xff] }
 0x3d6   :  { %4659 = vmatprep.subr.mxu0 %v7636_v16  ;;  %4623 = vmatpush3.msra.mxu1 %v4001_v35 }
 0x3d7   :  { %4660 = vmatpush3.msra.mxu0 %v3983_v19  ;;  %4624 = vmatprep.subr.mxu1 %v7636_v16 }
 0x3d8   :  { %4661 = vmatprep.subr.mxu0 %v7636_v16  ;;  %4625 = vmatpush3.msra.mxu1 %v4000_v15  ;;  %v7334_v15 = vld [vmem:[%s7425_s4] ss:$0 sm:$0xff] }
 0x3d9   :  { %4662 = vmatpush3.msra.mxu0 %v3982_v27  ;;  %4626 = vmatprep.subr.mxu1 %v7636_v16 }
 0x3da   :  { %4663 = vmatprep.subr.mxu0 %v7636_v16  ;;  %4627 = vmatpush3.msra.mxu1 %v3999_v28  ;;  %v4251_v28 = vld [vmem:[#allocation5 + $0x1e8] sm:$0xff] }
 0x3db   :  { %v3098_v36 = vpop.f32.mrf.mxu1  ;;  %v3171_v45 = vpop.f32.mrf.mxu0  ;;  %4664 = vmatpush3.msra.mxu0 %v3981_v25  ;;  %4628 = vmatprep.subr.mxu1 %v7636_v16  ;;  %v4250_v25 = vld [vmem:[#allocation5 + $0x1e0] sm:$0xff] }
 0x3dc   :  { %v7278_v51 = vadd.f32 %v3098_v36, %v6976_v34  ;;  %v7281_v47 = vadd.f32 %v3171_v45, %v6979_v38  ;;  %4665 = vmatprep.subr.mxu0 %v7636_v16  ;;  %4629 = vmatpush3.msra.mxu1 %v3998_v4  ;;  %v3978_v38 = vld [vmem:[#allocation5 + $0x10] sm:$0xff]  ;;  %v4249_v4 = vld [vmem:[#allocation5 + $0x1d8] sm:$0xff]  ;;  %v4247_v36 = vld [vmem:[#allocation5 + $0x1c8] sm:$0xff] }
 0x3dd   :  { %v3100_v9 = vpop.f32.mrf.mxu1  ;;  %v3173_v23 = vpop.f32.mrf.mxu0  ;;  %4666 = vmatpush3.msra.mxu0 %v3980_v2  ;;  %4630 = vmatprep.subr.mxu1 %v7636_v16  ;;  %v3995_v34 = vld [vmem:[#allocation5 + $0x90] sm:$0xff]  ;;  %v4246_v45 = vld [vmem:[#allocation5 + $0x1c0] sm:$0xff] }
 0x3de   :  { %v7286_v0 = vadd.f32 %v3100_v9, %v6990_v49  ;;  %v7289_v12 = vadd.f32 %v3173_v23, %v6993_v53  ;;  %4667 = vmatprep.subr.mxu0 %v7636_v16  ;;  %4631 = vmatpush3.msra.mxu1 %v3997_v50  ;;  %v3994_v49 = vld [vmem:[#allocation5 + $0x88] sm:$0xff]  ;;  %v3976_v53 = vld [vmem:[#allocation5] sm:$0xff]  ;;  %v4248_v2 = vld [vmem:[#allocation5 + $0x1d0] sm:$0xff] }
 0x3df   :  { %4668 = vmatpush3.msra.mxu0 %v3979_v21  ;;  %4632 = vmatprep.subr.mxu1 %v7636_v16  ;;  %v4245_v50 = vld [vmem:[#allocation5 + $0x1b8] sm:$0xff]  ;;  %v4244_v21 = vld [vmem:[#allocation5 + $0x1b0] sm:$0xff]  ;;  %v4243_v9 = vld [vmem:[#allocation5 + $0x1a8] sm:$0xff] }
 0x3e0   :  { %4669 = vmatprep.subr.mxu0 %v7636_v16  ;;  %4633 = vmatpush3.msra.mxu1 %v3996_v37  ;;  %v7690_v23 = vld [vmem:[#allocation21_spill] sm:$0xff]  ;;  %v7691_v37 = vld [vmem:[#allocation27_spill] sm:$0xff] }
 0x3e1   :  { %4670 = vmatpush3.msra.mxu0 %v3978_v38  ;;  %4634 = vmatprep.subr.mxu1 %v7636_v16  ;;  %v2336_v38 = vadd.f32 %v7691_v37, %v7690_v23  ;;  %v4152_v37 = vld [vmem:[#allocation5 + $0x110] sm:$0xff] }
 0x3e2   :  { %4671 = vmatprep.subr.mxu0 %v7636_v16  ;;  %4635 = vmatpush3.msra.mxu1 %v3995_v34  ;;  %v7692_v34 = vld [vmem:[#allocation23_spill] sm:$0xff] }
 0x3e3   :  { %4672 = vmatpush3.msra.mxu0 %v3977_v6  ;;  %4636 = vmatprep.subr.mxu1 %v7636_v16  ;;  %v7693_v6 = vld [vmem:[#allocation28_spill] sm:$0xff] }
 0x3e4   :  { %4673 = vmatprep.subr.mxu0 %v7636_v16  ;;  %4637 = vmatpush3.msra.mxu1 %v3994_v49  ;;  %v2409_v49 = vadd.f32 %v7693_v6, %v7692_v34  ;;  %v4151_v6 = vld [vmem:[#allocation5 + $0x108] sm:$0xff] }
 0x3e5   :  { %4674 = vmatpush3.msra.mxu0 %v3976_v53  ;;  %4638 = vmatprep.subr.mxu1 %v7636_v16  ;;  %v7694_v53 = vld [vmem:[#allocation22_spill] sm:$0xff] }
 0x3e6   :  { %4639 = vmatpush3.msra.mxu1 %v3993_v44  ;;  %4640 = vmatprep.mubr.msk.f32.mxu1 %vm4955_vm6, %v7636_v16  ;;  %v7695_v44 = vld [vmem:[#allocation29_spill] sm:$0xff]  ;;  %v3030_v55 = vadd.f32 %v7264_v11, %v2409_v49 }
 0x3e7   :  { %4678 = vmatprep.subr.mxu1 %v7636_v16  ;;  %4713 = vmatprep.subr.mxu0 %v7636_v16 }
 0x3fd   :  { %v3244_v40 = vpop.f32.mrf.mxu1  ;;  %v3321_v46 = vpop.f32.mrf.mxu0 }
 0x3fe   :  { %v7304_v52 = vadd.f32 %v3244_v40, %v7068_v54  ;;  %v7307_v29 = vadd.f32 %v3321_v46, %v7071_v43  ;;  %v1204_v54 = vadd.f32 %v6225_v26, %v6223_v5  ;;  %v1206_v43 = vadd.f32 %v6245_v14, %v6243_v13  ;;  %v7696_v46 = vld [vmem:[#allocation24_spill] sm:$0xff] }
 0x3ff   :  { %v3246_v39 = vpop.f32.mrf.mxu1  ;;  %v3323_v57 = vpop.f32.mrf.mxu0  ;;  %v2337_v40 = vadd.f32 %v7695_v44, %v7694_v53 }
 0x400   :  { %v7310_v3 = vadd.f32 %v3246_v39, %v7078_v8  ;;  %v7313_v48 = vadd.f32 %v3323_v57, %v7081_v7  ;;  %v2263_v8 = vadd.f32 %v6905_v18, %v1204_v54  ;;  %v7689_v7 = vld [vmem:[#allocation26_spill] sm:$0xff]  ;;  %v7697_v39 = vld [vmem:[#allocation31_spill] sm:$0xff] }
 0x401   :  { %v2264_v63 = vadd.f32 %v7689_v7, %v1206_v43  ;;  %v2410_v57 = vadd.f32 %v7697_v39, %v7696_v46  ;;  %v2957_v43 = vadd.f32 %v7262_v33, %v2336_v38 }
 0x402   :  { %v2884_v62 = vadd.f32 %v7250_v59, %v2263_v8  ;;  %v2958_v8 = vadd.f32 %v7270_v20, %v2337_v40  ;;  %v4239_v20 = vld [vmem:[#allocation5 + $0x188] sm:$0xff] }
 0x403   :  { %v2885_v24 = vadd.f32 %v7258_v17, %v2264_v63  ;;  %v4252_v17 = vld [vmem:[#allocation5 + $0x1f0] sm:$0xff]  ;;  %v3031_v56 = vadd.f32 %v7272_v10, %v2410_v57 }
 0x41f   :  { %v3427_v1 = vpop.f32.mrf.mxu1  ;;  %v3500_v30 = vpop.f32.mrf.mxu0 }
 0x420   :  { %v3432_v13 = vadd.f32 %v3427_v1, %v2811_v61  ;;  %v3505_v14 = vadd.f32 %v3500_v30, %v2884_v62 }
 0x421   :  { %v3429_v5 = vpop.f32.mrf.mxu1  ;;  %v3502_v26 = vpop.f32.mrf.mxu0 }
 0x422   :  { %v3433_v31 = vadd.f32 %v3429_v5, %v2812_v22  ;;  %v3506_v18 = vadd.f32 %v3502_v26, %v2885_v24  ;;  %v4240_v22 = vld [vmem:[#allocation5 + $0x190] sm:$0xff]  ;;  %v4238_v24 = vld [vmem:[#allocation5 + $0x180] sm:$0xff] }
 0x424   :  { %v3950_v35 = vmax.f32 %v3432_v13, %v3433_v31  ;;  %v3951_v19 = vmax.f32 %v3505_v14, %v3506_v18  ;;  %v4165_v13 = vld [vmem:[#allocation5 + $0x178] sm:$0xff]  ;;  %v4164_v14 = vld [vmem:[#allocation5 + $0x170] sm:$0xff]  ;;  %v4163_v31 = vld [vmem:[#allocation5 + $0x168] sm:$0xff] }
 0x425   :  { %v4162_v18 = vld [vmem:[#allocation5 + $0x160] sm:$0xff] }
 0x426   :  { %v3958_v58 = vmax.f32 %v3950_v35, %v3951_v19  ;;  %v4161_v35 = vld [vmem:[#allocation5 + $0x158] sm:$0xff]  ;;  %v4160_v19 = vld [vmem:[#allocation5 + $0x150] sm:$0xff] }
 0x428   :  { %v3965_v59 = vadd.f32 %v7334_v15, %v3958_v58  ;;  %v4159_v58 = vld [vmem:[#allocation5 + $0x148] sm:$0xff] }
 0x42a   :  { %v3966_v27 = vmax.f32 %v3965_v59, 0.0  ;;  %v4158_v59 = vld [vmem:[#allocation5 + $0x140] sm:$0xff] }
 0x42c   :  { %4676 = vmatmul.mubr.f32.vlgmr.msra.gmra.mxu0 %v3966_v27  ;;  %v4157_v27 = vld [vmem:[#allocation5 + $0x138] sm:$0xff] }
 0x42d   :  { %4714 = vmatpush3.msra.mxu0 %v4253_v32  ;;  %4745 = vmatprep.mubr.msk.f32.mxu0 %vm4955_vm6, %v7636_v16  ;;  %v4156_v32 = vld [vmem:[#allocation5 + $0x130] sm:$0xff] }
 0x42e   :  { %4715 = vmatprep.subr.mxu0 %v7636_v16 }
 0x42f   :  { %4716 = vmatpush3.msra.mxu0 %v4252_v17  ;;  %v4155_v17 = vld [vmem:[#allocation5 + $0x128] sm:$0xff] }
 0x430   :  { %4717 = vmatprep.subr.mxu0 %v7636_v16 }
 0x431   :  { %4718 = vmatpush3.msra.mxu0 %v4251_v28  ;;  %v4154_v28 = vld [vmem:[#allocation5 + $0x120] sm:$0xff] }
 0x432   :  { %4719 = vmatprep.subr.mxu0 %v7636_v16 }
 0x433   :  { %4720 = vmatpush3.msra.mxu0 %v4250_v25 }
 0x434   :  { %4721 = vmatprep.subr.mxu0 %v7636_v16 }
 0x435   :  { %4722 = vmatpush3.msra.mxu0 %v4249_v4 }
 0x436   :  { %4723 = vmatprep.subr.mxu0 %v7636_v16 }
 0x437   :  { %4724 = vmatpush3.msra.mxu0 %v4248_v2  ;;  %v4153_v2 = vld [vmem:[#allocation5 + $0x118] sm:$0xff] }
 0x438   :  { %4725 = vmatprep.subr.mxu0 %v7636_v16 }
 0x439   :  { %4726 = vmatpush3.msra.mxu0 %v4247_v36 }
 0x43a   :  { %4727 = vmatprep.subr.mxu0 %v7636_v16 }
 0x43b   :  { %4728 = vmatpush3.msra.mxu0 %v4246_v45 }
 0x43c   :  { %4729 = vmatprep.subr.mxu0 %v7636_v16 }
 0x43d   :  { %4730 = vmatpush3.msra.mxu0 %v4245_v50 }
 0x43e   :  { %4731 = vmatprep.subr.mxu0 %v7636_v16 }
 0x43f   :  { %4732 = vmatpush3.msra.mxu0 %v4244_v21 }
 0x440   :  { %4733 = vmatprep.subr.mxu0 %v7636_v16 }
 0x441   :  { %v3573_v41 = vpop.f32.mrf.mxu1  ;;  %v3646_v54 = vpop.f32.mrf.mxu0  ;;  %4734 = vmatpush3.msra.mxu0 %v4243_v9 }
 0x442   :  { %4735 = vmatprep.subr.mxu0 %v7636_v16  ;;  %v3578_v1 = vadd.f32 %v3573_v41, %v2957_v43  ;;  %v3651_v30 = vadd.f32 %v3646_v54, %v3030_v55 }
 0x443   :  { %v3575_v7 = vpop.f32.mrf.mxu1  ;;  %v3648_v63 = vpop.f32.mrf.mxu0  ;;  %4736 = vmatpush3.msra.mxu0 %v4242_v42 }
 0x444   :  { %v3579_v61 = vadd.f32 %v3575_v7, %v2958_v8  ;;  %v3652_v62 = vadd.f32 %v3648_v63, %v3031_v56  ;;  %4737 = vmatprep.subr.mxu0 %v7636_v16  ;;  %v4349_v56 = vld [vmem:[#allocation7 + $0x78] sm:$0xff]  ;;  %v4347_v7 = vld [vmem:[#allocation7 + $0x68] sm:$0xff] }
 0x445   :  { %4738 = vmatpush3.msra.mxu0 %v4241_v60  ;;  %v4348_v60 = vld [vmem:[#allocation7 + $0x70] sm:$0xff]  ;;  %v4341_v63 = vld [vmem:[#allocation7 + $0x38] sm:$0xff] }
 0x446   :  { %v3952_v33 = vmax.f32 %v3578_v1, %v3579_v61  ;;  %v3953_v11 = vmax.f32 %v3651_v30, %v3652_v62  ;;  %4739 = vmatprep.subr.mxu0 %v7636_v16  ;;  %v4340_v1 = vld [vmem:[#allocation7 + $0x30] sm:$0xff]  ;;  %v4339_v30 = vld [vmem:[#allocation7 + $0x28] sm:$0xff]  ;;  %v4338_v61 = vld [vmem:[#allocation7 + $0x20] sm:$0xff] }
 0x447   :  { %4740 = vmatpush3.msra.mxu0 %v4240_v22  ;;  %v4337_v62 = vld [vmem:[#allocation7 + $0x18] sm:$0xff]  ;;  %v4336_v22 = vld [vmem:[#allocation7 + $0x10] sm:$0xff] }
 0x448   :  { %v3967_v10 = vmax.f32 %v3952_v33, %v3953_v11  ;;  %4741 = vmatprep.subr.mxu0 %v7636_v16  ;;  %v4335_v33 = vld [vmem:[#allocation7 + $0x8] sm:$0xff]  ;;  %v4334_v11 = vld [vmem:[#allocation7] sm:$0xff] }
 0x449   :  { %4742 = vmatpush3.msra.mxu0 %v4239_v20 }
 0x44a   :  { %v3968_v5 = vadd.f32 %v7334_v15, %v3967_v10  ;;  %4743 = vmatprep.subr.mxu0 %v7636_v16 }
 0x44b   :  { %4744 = vmatpush3.msra.mxu0 %v4238_v24 }
 0x44c   :  { %v3969_v26 = vmax.f32 %v3968_v5, 0.0 }
 0x44e   :  { %4641 = vmatmul.mubr.f32.vlgmr.msra.gmra.mxu1 %v3969_v26 }
 0x44f   :  { %4679 = vmatpush3.msra.mxu1 %v4165_v13  ;;  %4710 = vmatprep.mubr.msk.f32.mxu1 %vm4955_vm6, %v7636_v16 }
 0x450   :  { %4680 = vmatprep.subr.mxu1 %v7636_v16 }
 0x451   :  { %4681 = vmatpush3.msra.mxu1 %v4164_v14 }
 0x452   :  { %4682 = vmatprep.subr.mxu1 %v7636_v16 }
 0x453   :  { %4683 = vmatpush3.msra.mxu1 %v4163_v31 }
 0x454   :  { %4684 = vmatprep.subr.mxu1 %v7636_v16 }
 0x455   :  { %4685 = vmatpush3.msra.mxu1 %v4162_v18 }
 0x456   :  { %4686 = vmatprep.subr.mxu1 %v7636_v16 }
 0x457   :  { %4687 = vmatpush3.msra.mxu1 %v4161_v35  ;;  %v4521_v35 = vld [vmem:[%s7427_s6] ss:$0 sm:$0xff]  ;;  %s4956_s6 = smov [#allocation8]  }
 0x458   :  { %4688 = vmatprep.subr.mxu1 %v7636_v16  ;;  %s4447_s30 = sshll.u32 %s4956_s6, 4  ;;  %s4448_s30 = int_to_ptr.vmem [resolvable:$true] %s4447_s30 }
 0x459   :  { %4689 = vmatpush3.msra.mxu1 %v4160_v19  ;;  %p4926_p2 = scmp.lt.s32.totalorder %s4448_s30, %s4448_s30 }
 0x45a   :  { %4690 = vmatprep.subr.mxu1 %v7636_v16 }
 0x45b   :  { %4691 = vmatpush3.msra.mxu1 %v4159_v58 }
 0x45c   :  { %4692 = vmatprep.subr.mxu1 %v7636_v16 }
 0x45d   :  { %4693 = vmatpush3.msra.mxu1 %v4158_v59 }
 0x45e   :  { %4694 = vmatprep.subr.mxu1 %v7636_v16 }
 0x45f   :  { %4695 = vmatpush3.msra.mxu1 %v4157_v27 }
 0x460   :  { %4696 = vmatprep.subr.mxu1 %v7636_v16 }
 0x461   :  { %4697 = vmatpush3.msra.mxu1 %v4156_v32 }
 0x462   :  { %4698 = vmatprep.subr.mxu1 %v7636_v16 }
 0x463   :  { %v3719_v25 = vpop.f32.mrf.mxu1  ;;  %v3792_v4 = vpop.f32.mrf.mxu0  ;;  %4699 = vmatpush3.msra.mxu1 %v4155_v17 }
 0x464   :  { %4700 = vmatprep.subr.mxu1 %v7636_v16  ;;  %v3724_v50 = vadd.f32 %v3719_v25, %v7278_v51  ;;  %v3797_v21 = vadd.f32 %v3792_v4, %v7281_v47  ;;  %v4150_v51 = vld [vmem:[#allocation5 + $0x100] sm:$0xff] }
 0x465   :  { %v3721_v36 = vpop.f32.mrf.mxu1  ;;  %v3794_v45 = vpop.f32.mrf.mxu0  ;;  %4701 = vmatpush3.msra.mxu1 %v4154_v28 }
 0x466   :  { %v3725_v9 = vadd.f32 %v3721_v36, %v7286_v0  ;;  %v3798_v23 = vadd.f32 %v3794_v45, %v7289_v12  ;;  %4702 = vmatprep.subr.mxu1 %v7636_v16 }
 0x467   :  { %4703 = vmatpush3.msra.mxu1 %v4153_v2 }
 0x468   :  { %v3954_v38 = vmax.f32 %v3724_v50, %v3725_v9  ;;  %v3955_v34 = vmax.f32 %v3797_v21, %v3798_v23  ;;  %4704 = vmatprep.subr.mxu1 %v7636_v16 }
 0x469   :  { %4705 = vmatpush3.msra.mxu1 %v4152_v37 }
 0x46a   :  { %v3970_v49 = vmax.f32 %v3954_v38, %v3955_v34  ;;  %4706 = vmatprep.subr.mxu1 %v7636_v16 }
 0x46b   :  { %4707 = vmatpush3.msra.mxu1 %v4151_v6 }
 0x46c   :  { %v3971_v47 = vadd.f32 %v7334_v15, %v3970_v49  ;;  %4708 = vmatprep.subr.mxu1 %v7636_v16 }
 0x46d   :  { %4709 = vmatpush3.msra.mxu1 %v4150_v51 }
 0x46e   :  { %v3972_v0 = vmax.f32 %v3971_v47, 0.0  ;;  %4748 = vmatprep.subr.mxu1 %v7636_v16 }
 0x470   :  { %4711 = vmatmul.mubr.f32.vlgmr.msra.gmra.mxu1 %v3972_v0 }
 0x471   :  { %4780 = vmatprep.mubr.msk.f32.mxu1 %vm4955_vm6, %v7636_v16  ;;  %4749 = vmatpush3.msra.mxu1 %v4349_v56 }
 0x472   :  { %4750 = vmatprep.subr.mxu1 %v7636_v16 }
 0x473   :  { %4751 = vmatpush3.msra.mxu1 %v4348_v60 }
 0x474   :  { %4752 = vmatprep.subr.mxu1 %v7636_v16 }
 0x475   :  { %4753 = vmatpush3.msra.mxu1 %v4347_v7 }
 0x476   :  { %4754 = vmatprep.subr.mxu1 %v7636_v16 }
 0x485   :  { %v3865_v12 = vpop.f32.mrf.mxu1  ;;  %v3942_v53 = vpop.f32.mrf.mxu0 }
 0x486   :  { %v3870_v46 = vadd.f32 %v3865_v12, %v7304_v52  ;;  %v3947_v39 = vadd.f32 %v3942_v53, %v7307_v29  ;;  %v4346_v52 = vld [vmem:[#allocation7 + $0x60] sm:$0xff]  ;;  %v4345_v29 = vld [vmem:[#allocation7 + $0x58] sm:$0xff] }
 0x487   :  { %v3867_v44 = vpop.f32.mrf.mxu1  ;;  %v3944_v40 = vpop.f32.mrf.mxu0  ;;  %4755 = vmatpush3.msra.mxu1 %v4346_v52 }
 0x488   :  { %v3871_v57 = vadd.f32 %v3867_v44, %v7310_v3  ;;  %v3948_v42 = vadd.f32 %v3944_v40, %v7313_v48  ;;  %4756 = vmatprep.subr.mxu1 %v7636_v16  ;;  %v4344_v3 = vld [vmem:[#allocation7 + $0x50] sm:$0xff]  ;;  %v4343_v48 = vld [vmem:[#allocation7 + $0x48] sm:$0xff] }
 0x489   :  { %4757 = vmatpush3.msra.mxu1 %v4345_v29 }
 0x48a   :  { %v3956_v41 = vmax.f32 %v3870_v46, %v3871_v57  ;;  %v3957_v54 = vmax.f32 %v3947_v39, %v3948_v42  ;;  %4758 = vmatprep.subr.mxu1 %v7636_v16 }
 0x48b   :  { %4759 = vmatpush3.msra.mxu1 %v4344_v3 }
 0x48c   :  { %v3973_v43 = vmax.f32 %v3956_v41, %v3957_v54  ;;  %4760 = vmatprep.subr.mxu1 %v7636_v16 }
 0x48d   :  { %4761 = vmatpush3.msra.mxu1 %v4343_v48 }
 0x48e   :  { %v3974_v55 = vadd.f32 %v7334_v15, %v3973_v43  ;;  %v4342_v15 = vld [vmem:[#allocation7 + $0x40] sm:$0xff]  ;;  %4762 = vmatprep.subr.mxu1 %v7636_v16 }
 0x48f   :  { %4763 = vmatpush3.msra.mxu1 %v4342_v15 }
 0x490   :  { %v3975_v8 = vmax.f32 %v3974_v55, 0.0  ;;  %4764 = vmatprep.subr.mxu1 %v7636_v16 }
 0x491   :  { %4765 = vmatpush3.msra.mxu1 %v4341_v63 }
 0x492   :  { %4746 = vmatmul.mubr.f32.vlgmr.msra.gmra.mxu0 %v3975_v8  ;;  %4766 = vmatprep.subr.mxu1 %v7636_v16 }
 0x493   :  { %4767 = vmatpush3.msra.mxu1 %v4340_v1 }
 0x494   :  { %4768 = vmatprep.subr.mxu1 %v7636_v16 }
 0x495   :  { %4769 = vmatpush3.msra.mxu1 %v4339_v30 }
 0x496   :  { %4770 = vmatprep.subr.mxu1 %v7636_v16 }
 0x497   :  { %4771 = vmatpush3.msra.mxu1 %v4338_v61 }
 0x498   :  { %4772 = vmatprep.subr.mxu1 %v7636_v16 }
 0x499   :  { %4773 = vmatpush3.msra.mxu1 %v4337_v62 }
 0x49a   :  { %4774 = vmatprep.subr.mxu1 %v7636_v16 }
 0x49b   :  { %4775 = vmatpush3.msra.mxu1 %v4336_v22 }
 0x49c   :  { %4776 = vmatprep.subr.mxu1 %v7636_v16 }
 0x49d   :  { %4777 = vmatpush3.msra.mxu1 %v4335_v33 }
 0x49e   :  { %4778 = vmatprep.subr.mxu1 %v7636_v16  ;;  %v4522_v16 = vld [vmem:[%s7429_s8] ss:$0 sm:$0xff]  ;;  %s4921_s8 = scalar_lea.vmem %s4448_s30, 32 }
 0x49f   :  { %4779 = vmatpush3.msra.mxu1 %v4334_v11  ;;  %p4922_p1 = scmp.ne.s32.totalorder %s4448_s30, %s4921_s8  ;;  %p4927_p3 = scmp.lt.s32.totalorder %s4921_s8, %s4921_s8 }
 0x4a1   :  { %p4928_p4 = por %p4927_p3, %p4926_p2 }
 0x4a3   :  { %p4929_p5 = pnand %p4928_p4, %p4922_p1 }
 0x4ec   :  { %v4145_v20 = vpop.f32.mrf.mxu0 }
 0x4ee   :  { %v4677_v10 = vpop.f32.mrf.mxu0 }
 0x50e   :  { %v4075_v24 = vpop.f32.mrf.mxu1 }
 0x50f   :  { %v4146_v5 = vadd.f32 %v4145_v20, %v4075_v24 }
 0x510   :  { %v4642_v26 = vpop.f32.mrf.mxu1 }
 0x530   :  { %v4232_v13 = vpop.f32.mrf.mxu1 }
 0x531   :  { %v4236_v31 = vadd.f32 %v4232_v13, %v4146_v5 }
 0x532   :  { %v4712_v14 = vpop.f32.mrf.mxu1 }
 0x552   :  { %v4320_v18 = vpop.f32.mrf.mxu0 }
 0x553   :  { %v4324_v19 = vadd.f32 %v4320_v18, %v4236_v31 }
 0x554   :  { %v4747_v58 = vpop.f32.mrf.mxu0 }
 0x555   :  { %v4332_v59 = vadd.f32 %v4521_v35, %v4324_v19 }
 0x557   :  { %v4333_v27 = vmax.f32 %v4332_v59, 0.0 }
 0x559   :  { %4781 = vmatmul.mubr.f32.vlgmr.msra.gmra.mxu1 %v4333_v27 }
 0x619   :  { %v4423_v32 = vpop.f32.mrf.mxu1 }
 0x61a   :  { %v4424_v17 = vadd.f32 %v4522_v16, %v4423_v32 }
 0x61b   :  { %v4782_v28 = vpop.f32.mrf.mxu1 }
 0x61c   :  { %v4428_v25 = vsel %vm4427_vm7, %v4424_v17, -inf }
 0x61d   :  { %4429 = vmax.xlane.f32.xlu0 %v4428_v25 }
 0x6a6   :  { %v4430_v4 = vpop.xlane.xlu0 %4429 }
 0x6a7   :  { %v4431_v2 = vsub.f32 %v4424_v17, %v4430_v4 }
 0x6a9   :  { %v4432_v36 = vmul.f32 1.442695, %v4431_v2 }
 0x6ab   :  { %4793 = vpow2.f32 %v4432_v36 }
 0x6b8   :  { %v4794_v45 = vpop.eup %4793 }
 0x6b9   :  { %v4434_v50 = vsel %vm4427_vm7, %v4794_v45, 0.0 }
 0x6ba   :  { %4435 = vadd.xlane.f32.xlu0 %v4434_v50 }
 0x743   :  { %v4436_v21 = vpop.xlane.xlu0 %4435 }
 0x744   :  { %4795 = vlog2.f32 %v4436_v21 }
 0x751   :  { %v4796_v9 = vpop.eup %4795 }
 0x752   :  { %v4438_v23 = vmul.f32 0.6931472, %v4796_v9 }
 0x754   :  { %v4439_v37 = vsub.f32 %v4431_v2, %v4438_v23 }
 0x756   :  { %4440 = vst [vmem:[#allocation8] sm:$0x3] %v4439_v37 }
 0x757   :  { %4932 = shalt.err (!%p4929_p5)
}
 0x758   :  { %4450 = dma.vmem_to_hbm [thread:$0]  %s4448_s30, 32, %s7430_s9, [#allocation4]  }
 0x759   :  { %4945 = dma.done.wait [#allocation4], 32  }
 0x75a   :  { %4946 = vsyncadd [#allocation4], 4294967264 }
 0x75b   :  { %4454 = vsyncpa [#allocation3], 1 }
 0x75c   :  { %4455 = vsyncpa [#allocation6], 1 }
 0x75d   :  { %4456 = vsyncpa [#allocation4], 1 }

</bundles_post_ra>
